<compile_context>
chip_gen: v7x
topology: tpu7x:2x2x1
jax: 0.10.0
libtpu: 0.0.40
codegen_flags: <defaults>
</compile_context>

<pallas_src>
import functools

import jax
import jax.numpy as jnp
from jax.experimental import pallas as pl
from jax.experimental.pallas import tpu as pltpu

MLP_HIDDEN_SIZE = 4096   # HPS['mlp_hidden_size']
PROJECTION_SIZE = 256    # HPS['projection_size']
BN_EPS = 1e-5            # HPS['batchnorm_kwargs']['eps']


def _default_hidden_splits():
    """2 on v7x (2 TensorCores/chip, shard hidden dim); 1 on v5e/v6e."""
    try:
        kind = jax.devices()[0].device_kind.lower()
    except Exception:  # pragma: no cover - defensive
        return 1
    return 2 if ("v7" in kind or "7x" in kind) else 1


def _mlp_kernel(x_ref, w1_ref, gb_ref, w2_ref, b2_ref, o_ref, *, eps):
    c = pl.program_id(0)            # hidden-split ("parallel") axis
    k = pl.program_id(1)            # reduction over hidden tiles within a split
    last = pl.num_programs(1) - 1

    # Layer1 matmul: bf16 operands on the MXU, f32 accumulation.
    # Layer1 bias is intentionally omitted — training-mode BatchNorm subtracts
    # the per-feature batch mean, which cancels a constant bias exactly.
    h = jnp.dot(x_ref[...].astype(jnp.bfloat16),
                w1_ref[...].astype(jnp.bfloat16),
                preferred_element_type=jnp.float32)

    # BatchNorm1d (training mode), fused into a single scale/shift pass:
    #   var = E[h^2] - mean^2 (biased), scale = gamma*rsqrt(var+eps),
    #   shift = beta - mean*scale, out = h*scale + shift.
    mean = jnp.mean(h, axis=0, keepdims=True)
    mean_sq = jnp.mean(h * h, axis=0, keepdims=True)
    var = mean_sq - mean * mean
    gamma = gb_ref[0:1, :]                       # (1, tile_h), per-tile block
    beta = gb_ref[1:2, :]
    scale = gamma * jax.lax.rsqrt(var + eps)
    shift = beta - mean * scale

    # ReLU fused with the affine.
    h = jnp.maximum(h * scale + shift, 0.0)

    # Layer2 partial matmul for this hidden tile, accumulated into the
    # resident output block (no scratch accumulator, no final copy).
    partial = jnp.dot(h.astype(jnp.bfloat16), w2_ref[...].astype(jnp.bfloat16),
                      preferred_element_type=jnp.float32)

    @pl.when(k == 0)
    def _():
        o_ref[0] = partial.astype(o_ref.dtype)

    @pl.when(k > 0)
    def _():
        o_ref[0] += partial.astype(o_ref.dtype)

    # b2 added exactly once (last reduction step, split 0 only) so per-split
    # partials can be summed without double-counting. For hidden_splits == 1
    # this makes the kernel output the final answer (no XLA epilogue).
    @pl.when(jnp.logical_and(k == last, c == 0))
    def _():
        o_ref[0] = (o_ref[0] + b2_ref[...]).astype(o_ref.dtype)


def mlp_forward(x, w1, b1, gamma, beta, w2, b2, *, tile_h=None,
                hidden_splits=None):
    """Fused MLP head. Pass w1/w2 already in bf16 (cast once at param setup);
    the wrapper performs no weight casts."""
    # b1 is accepted for API parity with nn.Linear but has exactly zero effect
    # on the output (cancelled by training-mode BatchNorm mean subtraction).
    del b1
    B, in_dim = x.shape
    H = w1.shape[1]
    P = w2.shape[1]

    if hidden_splits is None:
        hidden_splits = _default_hidden_splits()
    if tile_h is None:
        # Single step per split at small/medium B. NOTE: at production batch
        # sizes on v7x (64 MiB VMEM) the f32 (B, tile_h) intermediate scales
        # with B — shrink tile_h (e.g. 1024) and set vmem_limit_bytes there.
        tile_h = H // hidden_splits
    assert H % (tile_h * hidden_splits) == 0
    inner = H // (tile_h * hidden_splits)

    # gamma/beta packed into one small (2, H) array, DMA'd per tile.
    gb = jnp.stack([gamma, beta]).astype(jnp.float32)
    b2_row = b2.reshape(1, P).astype(jnp.float32)

    # Single-split: kernel writes the final dtype, no epilogue. Multi-split
    # (v7x): keep f32 partials for the tiny 2-way sum epilogue.
    out_dtype = x.dtype if hidden_splits == 1 else jnp.float32

    kernel = functools.partial(_mlp_kernel, eps=BN_EPS)

    partials = pl.pallas_call(
        kernel,
        out_shape=jax.ShapeDtypeStruct((hidden_splits, B, P), out_dtype),
        grid_spec=pltpu.PrefetchScalarGridSpec(
            num_scalar_prefetch=0,
            grid=(hidden_splits, inner),
            in_specs=[
                pl.BlockSpec((B, in_dim), lambda c, k: (0, 0)),            # x (resident)
                pl.BlockSpec((in_dim, tile_h),
                             lambda c, k: (0, c * inner + k)),             # W1 tile
                pl.BlockSpec((2, tile_h),
                             lambda c, k: (0, c * inner + k)),             # gamma/beta tile
                pl.BlockSpec((tile_h, P),
                             lambda c, k: (c * inner + k, 0)),             # W2 tile
                pl.BlockSpec((1, P), lambda c, k: (0, 0)),                 # b2 (resident)
            ],
            out_specs=pl.BlockSpec((1, B, P), lambda c, k: (c, 0, 0)),
        ),
        compiler_params=pltpu.CompilerParams(
            dimension_semantics=("parallel", "arbitrary")),
    )(x, w1, gb, w2, b2_row)

    if hidden_splits == 1:
        return partials[0]
    # v7x only: tiny 2-way partial sum (b2 already added in-kernel on split 0).
    return jnp.sum(partials, axis=0).astype(x.dtype)


def _reference(x, w1, b1, gamma, beta, w2, b2):
    h = x @ w1 + b1
    mean = jnp.mean(h, axis=0, keepdims=True)
    var = jnp.mean((h - mean) ** 2, axis=0, keepdims=True)
    h = (h - mean) / jnp.sqrt(var + BN_EPS) * gamma + beta
    h = jnp.maximum(h, 0.0)
    return h @ w2 + b2


if __name__ == "__main__":
    key = jax.random.PRNGKey(0)
    k_x, k_w1, k_b1, k_w2, k_b2 = jax.random.split(key, 5)

    B = 8          # small batch
    IN_DIM = 128   # small input feature dim (module arg)
    H = MLP_HIDDEN_SIZE
    P = PROJECTION_SIZE

    # Deterministic parameter init (PyTorch-style uniform bounds).
    lim1 = 1.0 / jnp.sqrt(IN_DIM)
    lim2 = 1.0 / jnp.sqrt(H)
    w1 = jax.random.uniform(k_w1, (IN_DIM, H), jnp.float32, -lim1, lim1)
    b1 = jax.random.uniform(k_b1, (H,), jnp.float32, -lim1, lim1)
    gamma = jnp.ones((H,), jnp.float32)   # BatchNorm1d default weight
    beta = jnp.zeros((H,), jnp.float32)   # BatchNorm1d default bias
    w2 = jax.random.uniform(k_w2, (H, P), jnp.float32, -lim2, lim2)
    b2 = jax.random.uniform(k_b2, (P,), jnp.float32, -lim2, lim2)

    x = jax.random.normal(k_x, (B, IN_DIM), jnp.float32)

    # One-time weight cast to bf16 at parameter-setup time (NOT per call):
    # halves the dominant HBM weight-stream and removes the per-call cast op.
    w1_bf = jax.block_until_ready(w1.astype(jnp.bfloat16))
    w2_bf = jax.block_until_ready(w2.astype(jnp.bfloat16))

    out = mlp_forward(x, w1_bf, b1, gamma, beta, w2_bf, b2)
    out = jax.block_until_ready(out)

    ref = _reference(x, w1, b1, gamma, beta, w2, b2)
    assert out.shape == (B, P)
    # Tolerance sized for bf16 weight streaming (f32 accumulation / f32 BN math).
    assert jnp.allclose(out, ref, atol=2e-2, rtol=2e-2), (
        float(jnp.max(jnp.abs(out - ref))))

    print("KERNEL_OK")
</pallas_src>

<mosaic_0001>
module attributes {stable_mosaic.version = 11 : i64} {
  func.func @_mlp_kernel(%arg0: i32, %arg1: i32, %arg2: memref<8x128xf32, #tpu.memory_space<vmem>>, %arg3: memref<128x4096xbf16, #tpu.memory_space<vmem>>, %arg4: memref<2x4096xf32, #tpu.memory_space<vmem>>, %arg5: memref<4096x256xbf16, #tpu.memory_space<vmem>>, %arg6: memref<1x256xf32, #tpu.memory_space<vmem>>, %arg7: memref<1x8x256xf32, #tpu.memory_space<vmem>>) attributes {dimension_semantics = [#tpu.dimension_semantics<parallel>, #tpu.dimension_semantics<arbitrary>], iteration_bounds = array<i64: 1, 1>, scalar_prefetch = 0 : i64, scratch_operands = 0 : i64, tpu.core_type = #tpu.core_type<tc>, window_params = [{pipeline_mode = #tpu.pipeline_mode<synchronous>, transform_indices = @transform_0, window_bounds = array<i64: 8, 128>}, {transform_indices = @transform_1, window_bounds = array<i64: 128, 4096>}, {transform_indices = @transform_2, window_bounds = array<i64: 2, 4096>}, {transform_indices = @transform_3, window_bounds = array<i64: 4096, 256>}, {pipeline_mode = #tpu.pipeline_mode<synchronous>, transform_indices = @transform_4, window_bounds = array<i64: 1, 256>}, {transform_indices = @transform_5, window_bounds = array<i64: 1, 8, 256>}]} {
    %c0 = arith.constant 0 : index
    %c0_0 = arith.constant 0 : index
    %0 = vector.load %arg2[%c0, %c0_0] : memref<8x128xf32, #tpu.memory_space<vmem>>, vector<8x128xf32>
    %1 = arith.truncf %0 : vector<8x128xf32> to vector<8x128xbf16>
    %c0_1 = arith.constant 0 : index
    %c0_2 = arith.constant 0 : index
    %2 = vector.load %arg3[%c0_1, %c0_2] : memref<128x4096xbf16, #tpu.memory_space<vmem>>, vector<128x4096xbf16>
    %cst = arith.constant dense<0.000000e+00> : vector<8x4096xf32>
    %3 = tpu.matmul %1, %2, %cst {dimension_numbers = #tpu.dot_dimension_numbers<[1], [0], [0], [1], [0, 0, 1, 1], [], []>} : vector<8x128xbf16>, vector<128x4096xbf16>, vector<8x4096xf32> -> vector<8x4096xf32>
    %cst_3 = arith.constant dense<0.000000e+00> : vector<4096xf32>
    %4 = vector.multi_reduction <add>, %3, %cst_3 [0] : vector<8x4096xf32> to vector<4096xf32>
    %5 = vector.shape_cast %4 : vector<4096xf32> to vector<1x4096xf32>
    %cst_4 = arith.constant 8.000000e+00 : f32
    %6 = vector.broadcast %cst_4 : f32 to vector<1x4096xf32>
    %7 = arith.divf %5, %6 : vector<1x4096xf32>
    %8 = arith.mulf %3, %3 : vector<8x4096xf32>
    %cst_5 = arith.constant dense<0.000000e+00> : vector<4096xf32>
    %9 = vector.multi_reduction <add>, %8, %cst_5 [0] : vector<8x4096xf32> to vector<4096xf32>
    %10 = vector.shape_cast %9 : vector<4096xf32> to vector<1x4096xf32>
    %cst_6 = arith.constant 8.000000e+00 : f32
    %11 = vector.broadcast %cst_6 : f32 to vector<1x4096xf32>
    %12 = arith.divf %10, %11 : vector<1x4096xf32>
    %13 = arith.mulf %7, %7 : vector<1x4096xf32>
    %14 = arith.subf %12, %13 : vector<1x4096xf32>
    %c0_7 = arith.constant 0 : index
    %c0_8 = arith.constant 0 : index
    %15 = vector.load %arg4[%c0_7, %c0_8] : memref<2x4096xf32, #tpu.memory_space<vmem>>, vector<1x4096xf32>
    %c1 = arith.constant 1 : index
    %c0_9 = arith.constant 0 : index
    %16 = vector.load %arg4[%c1, %c0_9] : memref<2x4096xf32, #tpu.memory_space<vmem>>, vector<1x4096xf32>
    %cst_10 = arith.constant 9.99999974E-6 : f32
    %17 = vector.broadcast %cst_10 : f32 to vector<1x4096xf32>
    %18 = arith.addf %14, %17 : vector<1x4096xf32>
    %19 = math.rsqrt %18 : vector<1x4096xf32>
    %20 = arith.mulf %15, %19 : vector<1x4096xf32>
    %21 = arith.mulf %7, %20 : vector<1x4096xf32>
    %22 = arith.subf %16, %21 : vector<1x4096xf32>
    %23 = vector.broadcast %20 : vector<1x4096xf32> to vector<8x4096xf32>
    %24 = arith.mulf %3, %23 : vector<8x4096xf32>
    %25 = vector.broadcast %22 : vector<1x4096xf32> to vector<8x4096xf32>
    %26 = arith.addf %24, %25 : vector<8x4096xf32>
    %cst_11 = arith.constant 0.000000e+00 : f32
    %27 = vector.broadcast %cst_11 : f32 to vector<8x4096xf32>
    %28 = arith.maximumf %26, %27 : vector<8x4096xf32>
    %29 = arith.truncf %28 : vector<8x4096xf32> to vector<8x4096xbf16>
    %c0_12 = arith.constant 0 : index
    %c0_13 = arith.constant 0 : index
    %30 = vector.load %arg5[%c0_12, %c0_13] : memref<4096x256xbf16, #tpu.memory_space<vmem>>, vector<4096x256xbf16>
    %cst_14 = arith.constant dense<0.000000e+00> : vector<8x256xf32>
    %31 = tpu.matmul %29, %30, %cst_14 {dimension_numbers = #tpu.dot_dimension_numbers<[1], [0], [0], [1], [0, 0, 1, 1], [], []>} : vector<8x4096xbf16>, vector<4096x256xbf16>, vector<8x256xf32> -> vector<8x256xf32>
    %c0_i32 = arith.constant 0 : i32
    %32 = arith.cmpi eq, %arg1, %c0_i32 : i32
    %33 = arith.extui %32 : i1 to i32
    %c0_i32_15 = arith.constant 0 : i32
    %34 = arith.cmpi ne, %33, %c0_i32_15 : i32
    scf.if %34 {
      %c0_21 = arith.constant 0 : index
      %c0_22 = arith.constant 0 : index
      %c0_23 = arith.constant 0 : index
      %43 = vector.load %arg7[%c0_21, %c0_22, %c0_23] : memref<1x8x256xf32, #tpu.memory_space<vmem>>, vector<1x8x256xf32>
      %44 = vector.shape_cast %43 : vector<1x8x256xf32> to vector<8x256xf32>
      %45 = vector.shape_cast %31 : vector<8x256xf32> to vector<1x8x256xf32>
      tpu.vector_store %arg7[%c0_21, %c0_22, %c0_23], %45 {strides = array<i32>} : memref<1x8x256xf32, #tpu.memory_space<vmem>>, vector<1x8x256xf32>,
    } else {
    }
    %c0_i32_16 = arith.constant 0 : i32
    %35 = arith.cmpi sgt, %arg1, %c0_i32_16 : i32
    %36 = arith.extui %35 : i1 to i32
    %c0_i32_17 = arith.constant 0 : i32
    %37 = arith.cmpi ne, %36, %c0_i32_17 : i32
    scf.if %37 {
      %c0_21 = arith.constant 0 : index
      %c0_22 = arith.constant 0 : index
      %c0_23 = arith.constant 0 : index
      %43 = vector.load %arg7[%c0_21, %c0_22, %c0_23] : memref<1x8x256xf32, #tpu.memory_space<vmem>>, vector<1x8x256xf32>
      %44 = vector.shape_cast %43 : vector<1x8x256xf32> to vector<8x256xf32>
      %45 = arith.addf %44, %31 : vector<8x256xf32>
      %c0_24 = arith.constant 0 : index
      %c0_25 = arith.constant 0 : index
      %c0_26 = arith.constant 0 : index
      %46 = vector.load %arg7[%c0_24, %c0_25, %c0_26] : memref<1x8x256xf32, #tpu.memory_space<vmem>>, vector<1x8x256xf32>
      %47 = vector.shape_cast %46 : vector<1x8x256xf32> to vector<8x256xf32>
      %48 = vector.shape_cast %45 : vector<8x256xf32> to vector<1x8x256xf32>
      tpu.vector_store %arg7[%c0_24, %c0_25, %c0_26], %48 {strides = array<i32>} : memref<1x8x256xf32, #tpu.memory_space<vmem>>, vector<1x8x256xf32>,
    } else {
    }
    %c0_i32_18 = arith.constant 0 : i32
    %38 = arith.cmpi eq, %arg1, %c0_i32_18 : i32
    %c0_i32_19 = arith.constant 0 : i32
    %39 = arith.cmpi eq, %arg0, %c0_i32_19 : i32
    %40 = arith.andi %38, %39 : i1
    %41 = arith.extui %40 : i1 to i32
    %c0_i32_20 = arith.constant 0 : i32
    %42 = arith.cmpi ne, %41, %c0_i32_20 : i32
    scf.if %42 {
      %c0_21 = arith.constant 0 : index
      %c0_22 = arith.constant 0 : index
      %c0_23 = arith.constant 0 : index
      %43 = vector.load %arg7[%c0_21, %c0_22, %c0_23] : memref<1x8x256xf32, #tpu.memory_space<vmem>>, vector<1x8x256xf32>
      %44 = vector.shape_cast %43 : vector<1x8x256xf32> to vector<8x256xf32>
      %c0_24 = arith.constant 0 : index
      %c0_25 = arith.constant 0 : index
      %45 = vector.load %arg6[%c0_24, %c0_25] : memref<1x256xf32, #tpu.memory_space<vmem>>, vector<1x256xf32>
      %46 = vector.broadcast %45 : vector<1x256xf32> to vector<8x256xf32>
      %47 = arith.addf %44, %46 : vector<8x256xf32>
      %c0_26 = arith.constant 0 : index
      %c0_27 = arith.constant 0 : index
      %c0_28 = arith.constant 0 : index
      %48 = vector.load %arg7[%c0_26, %c0_27, %c0_28] : memref<1x8x256xf32, #tpu.memory_space<vmem>>, vector<1x8x256xf32>
      %49 = vector.shape_cast %48 : vector<1x8x256xf32> to vector<8x256xf32>
      %50 = vector.shape_cast %47 : vector<8x256xf32> to vector<1x8x256xf32>
      tpu.vector_store %arg7[%c0_26, %c0_27, %c0_28], %50 {strides = array<i32>} : memref<1x8x256xf32, #tpu.memory_space<vmem>>, vector<1x8x256xf32>,
    } else {
    }
    return
  }
  func.func @transform_0(%arg0: i32, %arg1: i32) -> (i32, i32) {
    %c0_i32 = arith.constant 0 : i32
    %c0_i32_0 = arith.constant 0 : i32
    %c0_i32_1 = arith.constant 0 : i32
    return %c0_i32, %c0_i32_0 : i32, i32
  }
  func.func @transform_1(%arg0: i32, %arg1: i32) -> (i32, i32) {
    %c1_i32 = arith.constant 1 : i32
    %0 = arith.muli %arg0, %c1_i32 : i32
    %1 = arith.addi %0, %arg1 : i32
    %c0_i32 = arith.constant 0 : i32
    %c0_i32_0 = arith.constant 0 : i32
    return %c0_i32, %1 : i32, i32
  }
  func.func @transform_2(%arg0: i32, %arg1: i32) -> (i32, i32) {
    %c1_i32 = arith.constant 1 : i32
    %0 = arith.muli %arg0, %c1_i32 : i32
    %1 = arith.addi %0, %arg1 : i32
    %c0_i32 = arith.constant 0 : i32
    %c0_i32_0 = arith.constant 0 : i32
    return %c0_i32, %1 : i32, i32
  }
  func.func @transform_3(%arg0: i32, %arg1: i32) -> (i32, i32) {
    %c1_i32 = arith.constant 1 : i32
    %0 = arith.muli %arg0, %c1_i32 : i32
    %1 = arith.addi %0, %arg1 : i32
    %c0_i32 = arith.constant 0 : i32
    %c0_i32_0 = arith.constant 0 : i32
    return %1, %c0_i32 : i32, i32
  }
  func.func @transform_4(%arg0: i32, %arg1: i32) -> (i32, i32) {
    %c0_i32 = arith.constant 0 : i32
    %c0_i32_0 = arith.constant 0 : i32
    %c0_i32_1 = arith.constant 0 : i32
    return %c0_i32, %c0_i32_0 : i32, i32
  }
  func.func @transform_5(%arg0: i32, %arg1: i32) -> (i32, i32, i32) {
    %c0_i32 = arith.constant 0 : i32
    %c0_i32_0 = arith.constant 0 : i32
    %c0_i32_1 = arith.constant 0 : i32
    return %arg0, %c0_i32, %c0_i32_0 : i32, i32, i32
  }
}

</mosaic_0001>

<bundles_post_ra>
// kernel: tpu_custom_call.1
= control target key start
LH: loop header
LB: loop body
LE: loop exit
PB: predicated region body
PF: predicated region fallthrough
CT: control target
= control target key end

     0   :  { %10 = vsyncpa [#allocation3], 0  ;;  %s10418_s0 = inlined_call_operand.hbm [shape: f32[8,128], index: 0, kind: input, shape index: {}]   ;;  %s10419_s1 = inlined_call_operand.hbm [shape: bf16[128,4096], index: 1, kind: input, shape index: {}]   ;;  %s10420_s2 = inlined_call_operand.hbm [shape: f32[2,4096], index: 2, kind: input, shape index: {}]   ;;  %s10421_s3 = inlined_call_operand.hbm [shape: bf16[4096,256], index: 3, kind: input, shape index: {}]   ;;  %s10422_s4 = inlined_call_operand.hbm [shape: f32[1,256], index: 4, kind: input, shape index: {}]   ;;  %s10423_s5 = inlined_call_operand.hbm [shape: f32[1,8,256], index: 5, kind: output, shape index: {}]  }
   0x1   :  { %11 = vsyncpa [#allocation6], 0 }
   0x2   :  { %12 = vsyncpa [#allocation9], 0 }
   0x3   :  { %13 = vsyncpa [#allocation4], 0  ;;  %s9416_s18 = smov [#allocation5]   ;;  %s9276_s22 = scalar_lea.hbm %s10419_s1, 32768 }
   0x4   :  { %s33_s19 = sshll.u32 %s9416_s18, 4  ;;  %p9277_p0 = scmp.ne.s32.totalorder %s10419_s1, %s9276_s22  ;;  %s34_s19 = int_to_ptr.vmem [resolvable:$true] %s33_s19 }
   0x5   :  { %p9280_p1 = scmp.lt.u32.totalorder %s9276_s22, %s10419_s1 }
   0x7   :  { %p9282_p2 = pnand %p9280_p1, %p9277_p0 }
   0x9   :  { %9285 = shalt.err (!%p9282_p2)
}
   0xa   :  { %s9286_s27 = scalar_lea.vmem %s34_s19, 32768  ;;  %p9291_p4 = scmp.lt.s32.totalorder %s34_s19, %s34_s19 }
   0xb   :  { %p9287_p3 = scmp.ne.s32.totalorder %s34_s19, %s9286_s27  ;;  %p9292_p5 = scmp.lt.s32.totalorder %s9286_s27, %s9286_s27 }
   0xd   :  { %p9293_p6 = por %p9292_p5, %p9291_p4 }
   0xf   :  { %p9294_p7 = pnand %p9293_p6, %p9287_p3 }
  0x11   :  { %9297 = shalt.err (!%p9294_p7)
}
  0x12   :  { %s9417_s28 = smov 2048   ;;  %s9418_s29 = smov 128  }
  0x13   :  { %39 = dma.hbm_to_vmem [thread:$0]  %s10419_s1, 32768, %s34_s19, [#allocation6], %s9417_s28, %s9417_s28, %s9418_s29  }
  0x14   :  { %s9419_s7 = smov [#allocation8]   ;;  %s9298_s11 = scalar_lea.hbm %s10421_s3, 65536 }
  0x15   :  { %s64_s8 = sshll.u32 %s9419_s7, 4  ;;  %p9299_p8 = scmp.ne.s32.totalorder %s10421_s3, %s9298_s11  ;;  %s65_s8 = int_to_ptr.vmem [resolvable:$true] %s64_s8 }
  0x16   :  { %p9302_p9 = scmp.lt.u32.totalorder %s9298_s11, %s10421_s3 }
  0x18   :  { %p9304_p10 = pnand %p9302_p9, %p9299_p8 }
  0x1a   :  { %9307 = shalt.err (!%p9304_p10)
}
  0x1b   :  { %s9308_s16 = scalar_lea.vmem %s65_s8, 65536  ;;  %p9313_p12 = scmp.lt.s32.totalorder %s65_s8, %s65_s8 }
  0x1c   :  { %p9309_p11 = scmp.ne.s32.totalorder %s65_s8, %s9308_s16  ;;  %p9314_p13 = scmp.lt.s32.totalorder %s9308_s16, %s9308_s16 }
  0x1e   :  { %p9315_p0 = por %p9314_p13, %p9313_p12 }
  0x20   :  { %p9316_p1 = pnand %p9315_p0, %p9309_p11 }
  0x22   :  { %9319 = shalt.err (!%p9316_p1)
}
  0x23   :  { %s9420_s1 = smov 8   ;;  %s9421_s19 = smov [#allocation2]  }
  0x24   :  { %70 = dma.hbm_to_vmem [thread:$0]  %s10421_s3, 65536, %s65_s8, [#allocation9], %s9418_s29, %s9418_s29, %s9420_s1  }
  0x25   :  { %s20_s20 = sshll.u32 %s9421_s19, 4  ;;  %s9422_s21 = smov [#allocation7]   ;;  %s21_s20 = int_to_ptr.vmem [resolvable:$true] %s20_s20 }
  0x26   :  { %s50_s22 = sshll.u32 %s9422_s21, 4  ;;  %s9320_s25 = scalar_lea.hbm %s10418_s0, 128  ;;  %s51_s22 = int_to_ptr.vmem [resolvable:$true] %s50_s22 }
  0x27   :  { %p9321_p2 = scmp.ne.s32.totalorder %s10418_s0, %s9320_s25  ;;  %p9324_p3 = scmp.lt.u32.totalorder %s9320_s25, %s10418_s0 }
  0x29   :  { %p9326_p4 = pnand %p9324_p3, %p9321_p2 }
  0x2b   :  { %9329 = shalt.err (!%p9326_p4)
}
  0x2c   :  { %s9330_s3 = scalar_lea.vmem %s21_s20, 128  ;;  %p9335_p6 = scmp.lt.s32.totalorder %s21_s20, %s21_s20 }
  0x2d   :  { %p9331_p5 = scmp.ne.s32.totalorder %s21_s20, %s9330_s3  ;;  %p9336_p7 = scmp.lt.s32.totalorder %s9330_s3, %s9330_s3 }
  0x2f   :  { %p9337_p8 = por %p9336_p7, %p9335_p6 }
  0x31   :  { %p9338_p9 = pnand %p9337_p8, %p9331_p5 }
  0x33   :  { %9341 = shalt.err (!%p9338_p9)
}
  0x34   :  { %23 = dma.hbm_to_vmem [thread:$0]  %s10418_s0, 128, %s21_s20, [#allocation3]  }
  0x35   :  { %s9342_s9 = scalar_lea.hbm %s10420_s2, 1024 }
  0x36   :  { %p9343_p10 = scmp.ne.s32.totalorder %s10420_s2, %s9342_s9  ;;  %p9346_p11 = scmp.lt.u32.totalorder %s9342_s9, %s10420_s2 }
  0x38   :  { %p9348_p12 = pnand %p9346_p11, %p9343_p10 }
  0x3a   :  { %9351 = shalt.err (!%p9348_p12)
}
  0x3b   :  { %s9352_s14 = scalar_lea.vmem %s51_s22, 1024  ;;  %p9357_p0 = scmp.lt.s32.totalorder %s51_s22, %s51_s22 }
  0x3c   :  { %p9353_p13 = scmp.ne.s32.totalorder %s51_s22, %s9352_s14  ;;  %p9358_p1 = scmp.lt.s32.totalorder %s9352_s14, %s9352_s14 }
  0x3e   :  { %p9359_p2 = por %p9358_p1, %p9357_p0 }
  0x40   :  { %p9360_p3 = pnand %p9359_p2, %p9353_p13 }
  0x42   :  { %9363 = shalt.err (!%p9360_p3)
}
  0x43   :  { %53 = dma.hbm_to_vmem [thread:$0]  %s10420_s2, 1024, %s51_s22, [#allocation6]  }
  0x44   :  { %s9423_s16 = smov [#allocation10]   ;;  %s9364_s19 = scalar_lea.hbm %s10422_s4, 32 }
  0x45   :  { %s77_s1 = sshll.u32 %s9423_s16, 4  ;;  %p9365_p4 = scmp.ne.s32.totalorder %s10422_s4, %s9364_s19  ;;  %s78_s1 = int_to_ptr.vmem [resolvable:$true] %s77_s1 }
  0x46   :  { %p9368_p5 = scmp.lt.u32.totalorder %s9364_s19, %s10422_s4 }
  0x48   :  { %p9370_p6 = pnand %p9368_p5, %p9365_p4 }
  0x4a   :  { %9373 = shalt.err (!%p9370_p6)
}
  0x4b   :  { %s9374_s25 = scalar_lea.vmem %s78_s1, 32  ;;  %p9379_p8 = scmp.lt.s32.totalorder %s78_s1, %s78_s1 }
  0x4c   :  { %p9375_p7 = scmp.ne.s32.totalorder %s78_s1, %s9374_s25  ;;  %p9380_p9 = scmp.lt.s32.totalorder %s9374_s25, %s9374_s25 }
  0x4e   :  { %p9381_p10 = por %p9380_p9, %p9379_p8 }
  0x50   :  { %p9382_p11 = pnand %p9381_p10, %p9375_p7 }
  0x52   :  { %9385 = shalt.err (!%p9382_p11)
}
  0x53   :  { %80 = dma.hbm_to_vmem [thread:$0]  %s10422_s4, 32, %s78_s1, [#allocation9]  }
  0x54   :  { %9408 = dma.done.wait [#allocation3], 128  }
  0x55   :  { %9409 = vsyncadd [#allocation3], 4294967168 }
  0x56   :  { %9410 = dma.done.wait [#allocation6], 33792  }
  0x57   :  { %9411 = vsyncadd [#allocation6], 4294933504 }
  0x58   :  { %9412 = dma.done.wait [#allocation9], 65568  }
  0x59   :  { %9413 = vsyncadd [#allocation9], 4294901728  ;;  %v9424_v0 = vmov 0   ;;  %v105_v1 = vld [vmem:[#allocation5] sm:$0xff]  ;;  %v106_v3 = vld [vmem:[#allocation5 + $0x8] sm:$0xff]  ;;  %s9426_s4 = smov [#allocation11]  }
  0x5a   :  { %1673 = vmatprep.mubr.bf16.mxu0 %v9424_v0  ;;  %1714 = vmatprep.mubr.bf16.mxu1 %v9424_v0  ;;  %v121_v2 = vld [vmem:[#allocation5 + $0x80] sm:$0xff]  ;;  %v122_v5 = vld [vmem:[#allocation5 + $0x88] sm:$0xff]  ;;  %v107_v63 = vld [vmem:[#allocation5 + $0x10] sm:$0xff]  ;;  %s7654_s26 = sshll.u32 %s9426_s4, 4  ;;  %s7655_s26 = int_to_ptr.vmem [resolvable:$true] %s7654_s26 }
  0x5b   :  { %v7666_v4 = vcombine.high %v105_v1, %v121_v2  ;;  %v7665_v6 = vcombine.low %v105_v1, %v121_v2  ;;  %v137_v7 = vld [vmem:[#allocation5 + $0x100] sm:$0xff]  ;;  %v7668_v9 = vcombine.high %v106_v3, %v122_v5  ;;  %v7667_v10 = vcombine.low %v106_v3, %v122_v5  ;;  %v138_v12 = vld [vmem:[#allocation5 + $0x108] sm:$0xff]  ;;  %v123_v1 = vld [vmem:[#allocation5 + $0x90] sm:$0xff]  ;;  %s9386_s27 = scalar_lea.vmem %s7655_s26, 256  ;;  %p9391_p13 = scmp.lt.s32.totalorder %s7655_s26, %s7655_s26 }
  0x5c   :  { %v153_v8 = vld [vmem:[#allocation5 + $0x180] sm:$0xff]  ;;  %v154_v13 = vld [vmem:[#allocation5 + $0x188] sm:$0xff]  ;;  %v108_v2 = vld [vmem:[#allocation5 + $0x18] sm:$0xff]  ;;  %p9387_p12 = scmp.ne.s32.totalorder %s7655_s26, %s9386_s27  ;;  %p9392_p0 = scmp.lt.s32.totalorder %s9386_s27, %s9386_s27 }
  0x5d   :  { %v7698_v11 = vcombine.high %v137_v7, %v153_v8  ;;  %v169_v14 = vld [vmem:[#allocation5 + $0x200] sm:$0xff]  ;;  %1641 = vmatprep.subr.bf16.mxu0 %v7666_v4  ;;  %v7700_v15 = vcombine.high %v138_v12, %v154_v13  ;;  %v170_v17 = vld [vmem:[#allocation5 + $0x208] sm:$0xff]  ;;  %1682 = vmatprep.subr.bf16.mxu1 %v7668_v9  ;;  %v7697_v19 = vcombine.low %v137_v7, %v153_v8  ;;  %v124_v3 = vld [vmem:[#allocation5 + $0x98] sm:$0xff] }
  0x5e   :  { %v185_v16 = vld [vmem:[#allocation5 + $0x280] sm:$0xff]  ;;  %v186_v18 = vld [vmem:[#allocation5 + $0x288] sm:$0xff]  ;;  %1642 = vmatpush1.bf16.msra.mxu0 %v7665_v6  ;;  %1683 = vmatpush1.bf16.msra.mxu1 %v7667_v10  ;;  %v7699_v20 = vcombine.low %v138_v12, %v154_v13  ;;  %v103_v5 = vld [vmem:[#allocation2] sm:$0xff]  ;;  %v7670_v7 = vcombine.high %v107_v63, %v123_v1  ;;  %v7672_v8 = vcombine.high %v108_v2, %v124_v3  ;;  %p9393_p1 = por %p9392_p0, %p9391_p13 }
  0x5f   :  { %1643 = vmatprep.subr.bf16.mxu0 %v7698_v11  ;;  %v7730_v21 = vcombine.high %v169_v14, %v185_v16  ;;  %1684 = vmatprep.subr.bf16.mxu1 %v7700_v15  ;;  %v7732_v22 = vcombine.high %v170_v17, %v186_v18  ;;  %v201_v23 = vld [vmem:[#allocation5 + $0x300] sm:$0xff]  ;;  %v202_v25 = vld [vmem:[#allocation5 + $0x308] sm:$0xff]  ;;  %v7729_v27 = vcombine.low %v169_v14, %v185_v16  ;;  %v139_v9 = vld [vmem:[#allocation5 + $0x110] sm:$0xff] }
  0x60   :  { %v217_v24 = vld [vmem:[#allocation5 + $0x380] sm:$0xff]  ;;  %v218_v26 = vld [vmem:[#allocation5 + $0x388] sm:$0xff]  ;;  %v7731_v28 = vcombine.low %v170_v17, %v186_v18  ;;  %v155_v10 = vld [vmem:[#allocation5 + $0x190] sm:$0xff]  ;;  %v9519_v11 = vpack.c.bf16 %v103_v5, %v103_v5  ;;  %v7669_v14 = vcombine.low %v107_v63, %v123_v1  ;;  %v7671_v15 = vcombine.low %v108_v2, %v124_v3  ;;  %p9394_p2 = pnand %p9393_p1, %p9387_p12 }
  0x61   :  { %v7762_v29 = vcombine.high %v201_v23, %v217_v24  ;;  %v7764_v30 = vcombine.high %v202_v25, %v218_v26  ;;  %v233_v31 = vld [vmem:[#allocation5 + $0x400] sm:$0xff]  ;;  %v234_v33 = vld [vmem:[#allocation5 + $0x408] sm:$0xff]  ;;  %v7761_v35 = vcombine.low %v201_v23, %v217_v24  ;;  %v7763_v36 = vcombine.low %v202_v25, %v218_v26  ;;  %v140_v12 = vld [vmem:[#allocation5 + $0x118] sm:$0xff] }
  0x62   :  { %1644 = vmatpush1.bf16.msra.mxu0 %v7697_v19  ;;  %1685 = vmatpush1.bf16.msra.mxu1 %v7699_v20  ;;  %v249_v32 = vld [vmem:[#allocation5 + $0x480] sm:$0xff]  ;;  %v250_v34 = vld [vmem:[#allocation5 + $0x488] sm:$0xff]  ;;  %v156_v13 = vld [vmem:[#allocation5 + $0x198] sm:$0xff]  ;;  %v7702_v16 = vcombine.high %v139_v9, %v155_v10 }
  0x63   :  { %1645 = vmatprep.subr.bf16.mxu0 %v7730_v21  ;;  %1686 = vmatprep.subr.bf16.mxu1 %v7732_v22  ;;  %v7794_v37 = vcombine.high %v233_v31, %v249_v32  ;;  %v7796_v38 = vcombine.high %v234_v33, %v250_v34  ;;  %v265_v39 = vld [vmem:[#allocation5 + $0x500] sm:$0xff]  ;;  %v266_v41 = vld [vmem:[#allocation5 + $0x508] sm:$0xff]  ;;  %v7793_v43 = vcombine.low %v233_v31, %v249_v32  ;;  %v171_v18 = vld [vmem:[#allocation5 + $0x210] sm:$0xff] }
  0x64   :  { %v281_v40 = vld [vmem:[#allocation5 + $0x580] sm:$0xff]  ;;  %v282_v42 = vld [vmem:[#allocation5 + $0x588] sm:$0xff]  ;;  %v7795_v44 = vcombine.low %v234_v33, %v250_v34  ;;  %v7704_v17 = vcombine.high %v140_v12, %v156_v13  ;;  %v187_v19 = vld [vmem:[#allocation5 + $0x290] sm:$0xff]  ;;  %v7701_v22 = vcombine.low %v139_v9, %v155_v10  ;;  %v7703_v23 = vcombine.low %v140_v12, %v156_v13 }
  0x65   :  { %v7826_v45 = vcombine.high %v265_v39, %v281_v40  ;;  %v7828_v46 = vcombine.high %v266_v41, %v282_v42  ;;  %v297_v47 = vld [vmem:[#allocation5 + $0x600] sm:$0xff]  ;;  %v298_v49 = vld [vmem:[#allocation5 + $0x608] sm:$0xff]  ;;  %v7825_v51 = vcombine.low %v265_v39, %v281_v40  ;;  %v7827_v52 = vcombine.low %v266_v41, %v282_v42  ;;  %v172_v20 = vld [vmem:[#allocation5 + $0x218] sm:$0xff] }
  0x66   :  { %1646 = vmatpush1.bf16.msra.mxu0 %v7729_v27  ;;  %1687 = vmatpush1.bf16.msra.mxu1 %v7731_v28  ;;  %v313_v48 = vld [vmem:[#allocation5 + $0x680] sm:$0xff]  ;;  %v314_v50 = vld [vmem:[#allocation5 + $0x688] sm:$0xff]  ;;  %v188_v21 = vld [vmem:[#allocation5 + $0x298] sm:$0xff]  ;;  %v7734_v24 = vcombine.high %v171_v18, %v187_v19 }
  0x67   :  { %1647 = vmatprep.subr.bf16.mxu0 %v7762_v29  ;;  %1688 = vmatprep.subr.bf16.mxu1 %v7764_v30  ;;  %v7858_v53 = vcombine.high %v297_v47, %v313_v48  ;;  %v7860_v54 = vcombine.high %v298_v49, %v314_v50  ;;  %v329_v55 = vld [vmem:[#allocation5 + $0x700] sm:$0xff]  ;;  %v330_v57 = vld [vmem:[#allocation5 + $0x708] sm:$0xff]  ;;  %v7857_v59 = vcombine.low %v297_v47, %v313_v48  ;;  %v203_v26 = vld [vmem:[#allocation5 + $0x310] sm:$0xff] }
  0x68   :  { %v345_v56 = vld [vmem:[#allocation5 + $0x780] sm:$0xff]  ;;  %v346_v58 = vld [vmem:[#allocation5 + $0x788] sm:$0xff]  ;;  %v7859_v60 = vcombine.low %v298_v49, %v314_v50  ;;  %v7736_v25 = vcombine.high %v172_v20, %v188_v21  ;;  %v219_v27 = vld [vmem:[#allocation5 + $0x390] sm:$0xff]  ;;  %v7733_v30 = vcombine.low %v171_v18, %v187_v19  ;;  %v7735_v31 = vcombine.low %v172_v20, %v188_v21 }
  0x69   :  { %v7890_v61 = vcombine.high %v329_v55, %v345_v56  ;;  %v7892_v62 = vcombine.high %v330_v57, %v346_v58  ;;  %v7889_v4 = vcombine.low %v329_v55, %v345_v56  ;;  %v7891_v6 = vcombine.low %v330_v57, %v346_v58  ;;  %v204_v28 = vld [vmem:[#allocation5 + $0x318] sm:$0xff]  ;;  %v235_v34 = vld [vmem:[#allocation5 + $0x410] sm:$0xff]  ;;  %v109_v3 = vld [vmem:[#allocation5 + $0x20] sm:$0xff] }
  0x6a   :  { %1648 = vmatpush1.bf16.msra.mxu0 %v7761_v35  ;;  %1689 = vmatpush1.bf16.msra.mxu1 %v7763_v36  ;;  %v220_v29 = vld [vmem:[#allocation5 + $0x398] sm:$0xff]  ;;  %v7766_v32 = vcombine.high %v203_v26, %v219_v27  ;;  %v251_v35 = vld [vmem:[#allocation5 + $0x490] sm:$0xff]  ;;  %v110_v5 = vld [vmem:[#allocation5 + $0x28] sm:$0xff] }
  0x6b   :  { %1649 = vmatprep.subr.bf16.mxu0 %v7794_v37  ;;  %1690 = vmatprep.subr.bf16.mxu1 %v7796_v38  ;;  %v7768_v33 = vcombine.high %v204_v28, %v220_v29  ;;  %v236_v36 = vld [vmem:[#allocation5 + $0x418] sm:$0xff]  ;;  %v7765_v38 = vcombine.low %v203_v26, %v219_v27  ;;  %v7767_v39 = vcombine.low %v204_v28, %v220_v29  ;;  %v267_v42 = vld [vmem:[#allocation5 + $0x510] sm:$0xff]  ;;  %v141_v12 = vld [vmem:[#allocation5 + $0x120] sm:$0xff] }
  0x6c   :  { %v252_v37 = vld [vmem:[#allocation5 + $0x498] sm:$0xff]  ;;  %v7798_v40 = vcombine.high %v235_v34, %v251_v35  ;;  %v299_v50 = vld [vmem:[#allocation5 + $0x610] sm:$0xff]  ;;  %v157_v13 = vld [vmem:[#allocation5 + $0x1a0] sm:$0xff] }
  0x6d   :  { %v7800_v41 = vcombine.high %v236_v36, %v252_v37  ;;  %v7799_v47 = vcombine.low %v236_v36, %v252_v37  ;;  %v331_v58 = vld [vmem:[#allocation5 + $0x710] sm:$0xff]  ;;  %v7706_v18 = vcombine.high %v141_v12, %v157_v13  ;;  %v173_v19 = vld [vmem:[#allocation5 + $0x220] sm:$0xff]  ;;  %v174_v21 = vld [vmem:[#allocation5 + $0x228] sm:$0xff] }
  0x6e   :  { %1650 = vmatpush1.bf16.msra.mxu0 %v7793_v43  ;;  %1691 = vmatpush1.bf16.msra.mxu1 %v7795_v44  ;;  %v283_v43 = vld [vmem:[#allocation5 + $0x590] sm:$0xff]  ;;  %v268_v44 = vld [vmem:[#allocation5 + $0x518] sm:$0xff]  ;;  %v189_v20 = vld [vmem:[#allocation5 + $0x2a0] sm:$0xff] }
  0x6f   :  { %1651 = vmatprep.subr.bf16.mxu0 %v7826_v45  ;;  %1692 = vmatprep.subr.bf16.mxu1 %v7828_v46  ;;  %v284_v45 = vld [vmem:[#allocation5 + $0x598] sm:$0xff]  ;;  %v7797_v46 = vcombine.low %v235_v34, %v251_v35  ;;  %v7830_v48 = vcombine.high %v267_v42, %v283_v43  ;;  %v7738_v26 = vcombine.high %v173_v19, %v189_v20  ;;  %v205_v27 = vld [vmem:[#allocation5 + $0x320] sm:$0xff]  ;;  %v206_v29 = vld [vmem:[#allocation5 + $0x328] sm:$0xff] }
  0x70   :  { %v7832_v49 = vcombine.high %v268_v44, %v284_v45  ;;  %v7831_v55 = vcombine.low %v268_v44, %v284_v45  ;;  %v221_v28 = vld [vmem:[#allocation5 + $0x3a0] sm:$0xff]  ;;  %v238_v37 = vld [vmem:[#allocation5 + $0x428] sm:$0xff] }
  0x71   :  { %v7770_v34 = vcombine.high %v205_v27, %v221_v28  ;;  %v237_v35 = vld [vmem:[#allocation5 + $0x420] sm:$0xff]  ;;  %v270_v45 = vld [vmem:[#allocation5 + $0x528] sm:$0xff] }
  0x72   :  { %1652 = vmatpush1.bf16.msra.mxu0 %v7825_v51  ;;  %1693 = vmatpush1.bf16.msra.mxu1 %v7827_v52  ;;  %v315_v51 = vld [vmem:[#allocation5 + $0x690] sm:$0xff]  ;;  %v300_v52 = vld [vmem:[#allocation5 + $0x618] sm:$0xff]  ;;  %v253_v36 = vld [vmem:[#allocation5 + $0x4a0] sm:$0xff] }
  0x73   :  { %1653 = vmatprep.subr.bf16.mxu0 %v7858_v53  ;;  %1694 = vmatprep.subr.bf16.mxu1 %v7860_v54  ;;  %v316_v53 = vld [vmem:[#allocation5 + $0x698] sm:$0xff]  ;;  %v7829_v54 = vcombine.low %v267_v42, %v283_v43  ;;  %v7862_v56 = vcombine.high %v299_v50, %v315_v51  ;;  %v7802_v42 = vcombine.high %v237_v35, %v253_v36  ;;  %v269_v43 = vld [vmem:[#allocation5 + $0x520] sm:$0xff] }
  0x74   :  { %v7864_v57 = vcombine.high %v300_v52, %v316_v53  ;;  %v7863_v63 = vcombine.low %v300_v52, %v316_v53  ;;  %v285_v44 = vld [vmem:[#allocation5 + $0x5a0] sm:$0xff]  ;;  %v302_v53 = vld [vmem:[#allocation5 + $0x628] sm:$0xff] }
  0x75   :  { %v317_v52 = vld [vmem:[#allocation5 + $0x6a0] sm:$0xff] }
  0x76   :  { %1654 = vmatpush1.bf16.msra.mxu0 %v7857_v59  ;;  %1695 = vmatpush1.bf16.msra.mxu1 %v7859_v60  ;;  %v347_v59 = vld [vmem:[#allocation5 + $0x790] sm:$0xff]  ;;  %v332_v60 = vld [vmem:[#allocation5 + $0x718] sm:$0xff] }
  0x77   :  { %1655 = vmatprep.subr.bf16.mxu0 %v7890_v61  ;;  %1696 = vmatprep.subr.bf16.mxu1 %v7892_v62  ;;  %v348_v61 = vld [vmem:[#allocation5 + $0x798] sm:$0xff]  ;;  %v7861_v62 = vcombine.low %v299_v50, %v315_v51  ;;  %v7894_v1 = vcombine.high %v331_v58, %v347_v59  ;;  %v7834_v50 = vcombine.high %v269_v43, %v285_v44  ;;  %v301_v51 = vld [vmem:[#allocation5 + $0x620] sm:$0xff] }
  0x78   :  { %v7896_v2 = vcombine.high %v332_v60, %v348_v61 }
  0x7a   :  { %1656 = vmatpush1.bf16.msra.mxu0 %v7889_v4  ;;  %1697 = vmatpush1.bf16.msra.mxu1 %v7891_v6  ;;  %v125_v4 = vld [vmem:[#allocation5 + $0xa0] sm:$0xff]  ;;  %v126_v6 = vld [vmem:[#allocation5 + $0xa8] sm:$0xff] }
  0x7b   :  { %1723 = vmatprep.subr.bf16.mxu0 %v7670_v7  ;;  %1764 = vmatprep.subr.bf16.mxu1 %v7672_v8  ;;  %v7893_v7 = vcombine.low %v331_v58, %v347_v59  ;;  %v7895_v8 = vcombine.low %v332_v60, %v348_v61  ;;  %v7674_v9 = vcombine.high %v109_v3, %v125_v4  ;;  %v333_v59 = vld [vmem:[#allocation5 + $0x720] sm:$0xff]  ;;  %v334_v61 = vld [vmem:[#allocation5 + $0x728] sm:$0xff] }
  0x7c   :  { %v7676_v10 = vcombine.high %v110_v5, %v126_v6  ;;  %v7866_v58 = vcombine.high %v301_v51, %v317_v52  ;;  %v349_v60 = vld [vmem:[#allocation5 + $0x7a0] sm:$0xff] }
  0x7d   :  { %1674 = vmatmul.mubr.bf16.vlgmr.msra.gmra.mrb[0].mxu0 %v9519_v11  ;;  %1715 = vmatmul.mubr.bf16.vlgmr.msra.gmra.mrb[0].mxu1 %v9519_v11 }
  0x7e   :  { %1724 = vmatpush1.bf16.msra.mxu0 %v7669_v14  ;;  %1765 = vmatpush1.bf16.msra.mxu1 %v7671_v15  ;;  %v142_v14 = vld [vmem:[#allocation5 + $0x128] sm:$0xff] }
  0x7f   :  { %1725 = vmatprep.subr.bf16.mxu0 %v7702_v16  ;;  %1766 = vmatprep.subr.bf16.mxu1 %v7704_v17  ;;  %v158_v15 = vld [vmem:[#allocation5 + $0x1a8] sm:$0xff]  ;;  %v7673_v16 = vcombine.low %v109_v3, %v125_v4  ;;  %v7675_v17 = vcombine.low %v110_v5, %v126_v6  ;;  %v7898_v3 = vcombine.high %v333_v59, %v349_v60  ;;  %v111_v4 = vld [vmem:[#allocation5 + $0x30] sm:$0xff]  ;;  %v112_v6 = vld [vmem:[#allocation5 + $0x38] sm:$0xff] }
  0x80   :  { %1755 = vmatprep.mubr.bf16.mxu0 %v9424_v0  ;;  %1796 = vmatprep.mubr.bf16.mxu1 %v9424_v0  ;;  %v127_v5 = vld [vmem:[#allocation5 + $0xb0] sm:$0xff] }
  0x82   :  { %1726 = vmatpush1.bf16.msra.mxu0 %v7701_v22  ;;  %1767 = vmatpush1.bf16.msra.mxu1 %v7703_v23  ;;  %v7708_v22 = vcombine.high %v142_v14, %v158_v15  ;;  %v190_v23 = vld [vmem:[#allocation5 + $0x2a8] sm:$0xff] }
  0x83   :  { %1727 = vmatprep.subr.bf16.mxu0 %v7734_v24  ;;  %1768 = vmatprep.subr.bf16.mxu1 %v7736_v25  ;;  %v7705_v24 = vcombine.low %v141_v12, %v157_v13  ;;  %v7707_v25 = vcombine.low %v142_v14, %v158_v15  ;;  %v7678_v12 = vcombine.high %v111_v4, %v127_v5  ;;  %v143_v13 = vld [vmem:[#allocation5 + $0x130] sm:$0xff]  ;;  %v144_v15 = vld [vmem:[#allocation5 + $0x138] sm:$0xff] }
  0x84   :  { %v159_v14 = vld [vmem:[#allocation5 + $0x1b0] sm:$0xff] }
  0x86   :  { %1728 = vmatpush1.bf16.msra.mxu0 %v7733_v30  ;;  %1769 = vmatpush1.bf16.msra.mxu1 %v7735_v31  ;;  %v7740_v30 = vcombine.high %v174_v21, %v190_v23  ;;  %v222_v31 = vld [vmem:[#allocation5 + $0x3a8] sm:$0xff] }
  0x87   :  { %1729 = vmatprep.subr.bf16.mxu0 %v7766_v32  ;;  %1770 = vmatprep.subr.bf16.mxu1 %v7768_v33  ;;  %v7737_v32 = vcombine.low %v173_v19, %v189_v20  ;;  %v7739_v33 = vcombine.low %v174_v21, %v190_v23  ;;  %v7710_v20 = vcombine.high %v143_v13, %v159_v14  ;;  %v175_v21 = vld [vmem:[#allocation5 + $0x230] sm:$0xff]  ;;  %v176_v23 = vld [vmem:[#allocation5 + $0x238] sm:$0xff] }
  0x8a   :  { %1730 = vmatpush1.bf16.msra.mxu0 %v7765_v38  ;;  %1771 = vmatpush1.bf16.msra.mxu1 %v7767_v39  ;;  %v7772_v38 = vcombine.high %v206_v29, %v222_v31  ;;  %v254_v39 = vld [vmem:[#allocation5 + $0x4a8] sm:$0xff] }
  0x8b   :  { %1731 = vmatprep.subr.bf16.mxu0 %v7798_v40  ;;  %1772 = vmatprep.subr.bf16.mxu1 %v7800_v41  ;;  %v7769_v40 = vcombine.low %v205_v27, %v221_v28  ;;  %v7771_v41 = vcombine.low %v206_v29, %v222_v31  ;;  %v207_v29 = vld [vmem:[#allocation5 + $0x330] sm:$0xff]  ;;  %v208_v31 = vld [vmem:[#allocation5 + $0x338] sm:$0xff] }
  0x8e   :  { %1732 = vmatpush1.bf16.msra.mxu0 %v7797_v46  ;;  %1773 = vmatpush1.bf16.msra.mxu1 %v7799_v47  ;;  %v7804_v46 = vcombine.high %v238_v37, %v254_v39  ;;  %v286_v47 = vld [vmem:[#allocation5 + $0x5a8] sm:$0xff] }
  0x8f   :  { %1733 = vmatprep.subr.bf16.mxu0 %v7830_v48  ;;  %1774 = vmatprep.subr.bf16.mxu1 %v7832_v49  ;;  %v7801_v48 = vcombine.low %v237_v35, %v253_v36  ;;  %v7803_v49 = vcombine.low %v238_v37, %v254_v39  ;;  %v239_v37 = vld [vmem:[#allocation5 + $0x430] sm:$0xff]  ;;  %v240_v39 = vld [vmem:[#allocation5 + $0x438] sm:$0xff] }
  0x92   :  { %1734 = vmatpush1.bf16.msra.mxu0 %v7829_v54  ;;  %1775 = vmatpush1.bf16.msra.mxu1 %v7831_v55  ;;  %v7836_v54 = vcombine.high %v270_v45, %v286_v47  ;;  %v318_v55 = vld [vmem:[#allocation5 + $0x6a8] sm:$0xff] }
  0x93   :  { %1735 = vmatprep.subr.bf16.mxu0 %v7862_v56  ;;  %1776 = vmatprep.subr.bf16.mxu1 %v7864_v57  ;;  %v7833_v56 = vcombine.low %v269_v43, %v285_v44  ;;  %v7835_v57 = vcombine.low %v270_v45, %v286_v47  ;;  %v271_v45 = vld [vmem:[#allocation5 + $0x530] sm:$0xff]  ;;  %v272_v47 = vld [vmem:[#allocation5 + $0x538] sm:$0xff] }
  0x96   :  { %1736 = vmatpush1.bf16.msra.mxu0 %v7861_v62  ;;  %1777 = vmatpush1.bf16.msra.mxu1 %v7863_v63  ;;  %v7868_v62 = vcombine.high %v302_v53, %v318_v55  ;;  %v350_v63 = vld [vmem:[#allocation5 + $0x7a8] sm:$0xff] }
  0x97   :  { %1737 = vmatprep.subr.bf16.mxu0 %v7894_v1  ;;  %1778 = vmatprep.subr.bf16.mxu1 %v7896_v2  ;;  %v7865_v1 = vcombine.low %v301_v51, %v317_v52  ;;  %v7867_v2 = vcombine.low %v302_v53, %v318_v55  ;;  %v303_v53 = vld [vmem:[#allocation5 + $0x630] sm:$0xff]  ;;  %v304_v55 = vld [vmem:[#allocation5 + $0x638] sm:$0xff] }
  0x9a   :  { %1738 = vmatpush1.bf16.msra.mxu0 %v7893_v7  ;;  %1779 = vmatpush1.bf16.msra.mxu1 %v7895_v8  ;;  %v7900_v7 = vcombine.high %v334_v61, %v350_v63  ;;  %v128_v8 = vld [vmem:[#allocation5 + $0xb8] sm:$0xff] }
  0x9b   :  { %1805 = vmatprep.subr.bf16.mxu0 %v7674_v9  ;;  %1846 = vmatprep.subr.bf16.mxu1 %v7676_v10  ;;  %v7897_v9 = vcombine.low %v333_v59, %v349_v60  ;;  %v7899_v10 = vcombine.low %v334_v61, %v350_v63  ;;  %v7679_v19 = vcombine.low %v112_v6, %v128_v8  ;;  %v351_v63 = vld [vmem:[#allocation5 + $0x7b0] sm:$0xff] }
  0x9d   :  { %1756 = vmatmul.mubr.bf16.vlgmr.msra.gmra.mrb[4].mxu0 %v9519_v11  ;;  %1797 = vmatmul.mubr.bf16.vlgmr.msra.gmra.mrb[4].mxu1 %v9519_v11 }
  0x9e   :  { %1806 = vmatpush1.bf16.msra.mxu0 %v7673_v16  ;;  %1847 = vmatpush1.bf16.msra.mxu1 %v7675_v17  ;;  %v7680_v16 = vcombine.high %v112_v6, %v128_v8  ;;  %v160_v17 = vld [vmem:[#allocation5 + $0x1b8] sm:$0xff]  ;;  %v129_v8 = vld [vmem:[#allocation5 + $0xc0] sm:$0xff] }
  0x9f   :  { %1807 = vmatprep.subr.bf16.mxu0 %v7706_v18  ;;  %1848 = vmatprep.subr.bf16.mxu1 %v7708_v22  ;;  %v7677_v18 = vcombine.low %v111_v4, %v127_v5  ;;  %v191_v22 = vld [vmem:[#allocation5 + $0x2b0] sm:$0xff]  ;;  %v7711_v27 = vcombine.low %v144_v15, %v160_v17 }
  0xa0   :  { %1837 = vmatprep.mubr.bf16.mxu0 %v9424_v0  ;;  %1878 = vmatprep.mubr.bf16.mxu1 %v9424_v0  ;;  %v7742_v28 = vcombine.high %v175_v21, %v191_v22 }
  0xa2   :  { %1808 = vmatpush1.bf16.msra.mxu0 %v7705_v24  ;;  %1849 = vmatpush1.bf16.msra.mxu1 %v7707_v25  ;;  %v7712_v24 = vcombine.high %v144_v15, %v160_v17  ;;  %v192_v25 = vld [vmem:[#allocation5 + $0x2b8] sm:$0xff]  ;;  %v161_v17 = vld [vmem:[#allocation5 + $0x1c0] sm:$0xff] }
  0xa3   :  { %1809 = vmatprep.subr.bf16.mxu0 %v7738_v26  ;;  %1850 = vmatprep.subr.bf16.mxu1 %v7740_v30  ;;  %v7709_v26 = vcombine.low %v143_v13, %v159_v14  ;;  %v223_v30 = vld [vmem:[#allocation5 + $0x3b0] sm:$0xff]  ;;  %v7743_v35 = vcombine.low %v176_v23, %v192_v25 }
  0xa4   :  { %v7774_v36 = vcombine.high %v207_v29, %v223_v30 }
  0xa6   :  { %1810 = vmatpush1.bf16.msra.mxu0 %v7737_v32  ;;  %1851 = vmatpush1.bf16.msra.mxu1 %v7739_v33  ;;  %v7744_v32 = vcombine.high %v176_v23, %v192_v25  ;;  %v224_v33 = vld [vmem:[#allocation5 + $0x3b8] sm:$0xff]  ;;  %v178_v25 = vld [vmem:[#allocation5 + $0x248] sm:$0xff] }
  0xa7   :  { %1811 = vmatprep.subr.bf16.mxu0 %v7770_v34  ;;  %1852 = vmatprep.subr.bf16.mxu1 %v7772_v38  ;;  %v7741_v34 = vcombine.low %v175_v21, %v191_v22  ;;  %v255_v38 = vld [vmem:[#allocation5 + $0x4b0] sm:$0xff]  ;;  %v7775_v43 = vcombine.low %v208_v31, %v224_v33  ;;  %v177_v21 = vld [vmem:[#allocation5 + $0x240] sm:$0xff] }
  0xa8   :  { %v7806_v44 = vcombine.high %v239_v37, %v255_v38  ;;  %v193_v22 = vld [vmem:[#allocation5 + $0x2c0] sm:$0xff] }
  0xaa   :  { %1812 = vmatpush1.bf16.msra.mxu0 %v7769_v40  ;;  %1853 = vmatpush1.bf16.msra.mxu1 %v7771_v41  ;;  %v7776_v40 = vcombine.high %v208_v31, %v224_v33  ;;  %v256_v41 = vld [vmem:[#allocation5 + $0x4b8] sm:$0xff]  ;;  %v210_v33 = vld [vmem:[#allocation5 + $0x348] sm:$0xff] }
  0xab   :  { %1813 = vmatprep.subr.bf16.mxu0 %v7802_v42  ;;  %1854 = vmatprep.subr.bf16.mxu1 %v7804_v46  ;;  %v7773_v42 = vcombine.low %v207_v29, %v223_v30  ;;  %v287_v46 = vld [vmem:[#allocation5 + $0x5b0] sm:$0xff]  ;;  %v7807_v51 = vcombine.low %v240_v39, %v256_v41  ;;  %v209_v29 = vld [vmem:[#allocation5 + $0x340] sm:$0xff] }
  0xac   :  { %v7838_v52 = vcombine.high %v271_v45, %v287_v46  ;;  %v225_v30 = vld [vmem:[#allocation5 + $0x3c0] sm:$0xff] }
  0xae   :  { %1814 = vmatpush1.bf16.msra.mxu0 %v7801_v48  ;;  %1855 = vmatpush1.bf16.msra.mxu1 %v7803_v49  ;;  %v7808_v48 = vcombine.high %v240_v39, %v256_v41  ;;  %v288_v49 = vld [vmem:[#allocation5 + $0x5b8] sm:$0xff]  ;;  %v242_v41 = vld [vmem:[#allocation5 + $0x448] sm:$0xff] }
  0xaf   :  { %1815 = vmatprep.subr.bf16.mxu0 %v7834_v50  ;;  %1856 = vmatprep.subr.bf16.mxu1 %v7836_v54  ;;  %v7805_v50 = vcombine.low %v239_v37, %v255_v38  ;;  %v319_v54 = vld [vmem:[#allocation5 + $0x6b0] sm:$0xff]  ;;  %v7839_v59 = vcombine.low %v272_v47, %v288_v49  ;;  %v241_v37 = vld [vmem:[#allocation5 + $0x440] sm:$0xff] }
  0xb0   :  { %v7870_v60 = vcombine.high %v303_v53, %v319_v54  ;;  %v257_v38 = vld [vmem:[#allocation5 + $0x4c0] sm:$0xff] }
  0xb2   :  { %1816 = vmatpush1.bf16.msra.mxu0 %v7833_v56  ;;  %1857 = vmatpush1.bf16.msra.mxu1 %v7835_v57  ;;  %v7840_v56 = vcombine.high %v272_v47, %v288_v49  ;;  %v320_v57 = vld [vmem:[#allocation5 + $0x6b8] sm:$0xff]  ;;  %v274_v49 = vld [vmem:[#allocation5 + $0x548] sm:$0xff] }
  0xb3   :  { %1817 = vmatprep.subr.bf16.mxu0 %v7866_v58  ;;  %1858 = vmatprep.subr.bf16.mxu1 %v7868_v62  ;;  %v7837_v58 = vcombine.low %v271_v45, %v287_v46  ;;  %v7872_v61 = vcombine.high %v304_v55, %v320_v57  ;;  %v335_v62 = vld [vmem:[#allocation5 + $0x730] sm:$0xff]  ;;  %v7871_v4 = vcombine.low %v304_v55, %v320_v57  ;;  %v273_v45 = vld [vmem:[#allocation5 + $0x540] sm:$0xff]  ;;  %v306_v57 = vld [vmem:[#allocation5 + $0x648] sm:$0xff] }
  0xb4   :  { %v7902_v5 = vcombine.high %v335_v62, %v351_v63  ;;  %v289_v46 = vld [vmem:[#allocation5 + $0x5c0] sm:$0xff] }
  0xb6   :  { %1818 = vmatpush1.bf16.msra.mxu0 %v7865_v1  ;;  %1859 = vmatpush1.bf16.msra.mxu1 %v7867_v2  ;;  %v336_v1 = vld [vmem:[#allocation5 + $0x738] sm:$0xff] }
  0xb7   :  { %1819 = vmatprep.subr.bf16.mxu0 %v7898_v3  ;;  %1860 = vmatprep.subr.bf16.mxu1 %v7900_v7  ;;  %v352_v2 = vld [vmem:[#allocation5 + $0x7b8] sm:$0xff]  ;;  %v7869_v3 = vcombine.low %v303_v53, %v319_v54  ;;  %v113_v7 = vld [vmem:[#allocation5 + $0x40] sm:$0xff] }
  0xb8   :  { %v7904_v6 = vcombine.high %v336_v1, %v352_v2  ;;  %v7903_v13 = vcombine.low %v336_v1, %v352_v2  ;;  %v7682_v14 = vcombine.high %v113_v7, %v129_v8  ;;  %v305_v53 = vld [vmem:[#allocation5 + $0x640] sm:$0xff]  ;;  %v338_v2 = vld [vmem:[#allocation5 + $0x748] sm:$0xff] }
  0xb9   :  { %v321_v54 = vld [vmem:[#allocation5 + $0x6c0] sm:$0xff] }
  0xba   :  { %1820 = vmatpush1.bf16.msra.mxu0 %v7897_v9  ;;  %1861 = vmatpush1.bf16.msra.mxu1 %v7899_v10  ;;  %v114_v9 = vld [vmem:[#allocation5 + $0x48] sm:$0xff]  ;;  %v7874_v1 = vcombine.high %v305_v53, %v321_v54 }
  0xbb   :  { %1887 = vmatprep.subr.bf16.mxu0 %v7678_v12  ;;  %1928 = vmatprep.subr.bf16.mxu1 %v7680_v16  ;;  %v130_v10 = vld [vmem:[#allocation5 + $0xc8] sm:$0xff]  ;;  %v7901_v12 = vcombine.low %v335_v62, %v351_v63  ;;  %v145_v16 = vld [vmem:[#allocation5 + $0x140] sm:$0xff] }
  0xbc   :  { %v7684_v15 = vcombine.high %v114_v9, %v130_v10  ;;  %v7683_v23 = vcombine.low %v114_v9, %v130_v10  ;;  %v353_v62 = vld [vmem:[#allocation5 + $0x7c0] sm:$0xff]  ;;  %v116_v10 = vld [vmem:[#allocation5 + $0x58] sm:$0xff] }
  0xbd   :  { %1838 = vmatmul.mubr.bf16.vlgmr.msra.gmra.mrb[8].mxu0 %v9519_v11  ;;  %1879 = vmatmul.mubr.bf16.vlgmr.msra.gmra.mrb[8].mxu1 %v9519_v11 }
  0xbe   :  { %1888 = vmatpush1.bf16.msra.mxu0 %v7677_v18  ;;  %1929 = vmatpush1.bf16.msra.mxu1 %v7679_v19  ;;  %v146_v18 = vld [vmem:[#allocation5 + $0x148] sm:$0xff] }
  0xbf   :  { %1889 = vmatprep.subr.bf16.mxu0 %v7710_v20  ;;  %1930 = vmatprep.subr.bf16.mxu1 %v7712_v24  ;;  %v162_v19 = vld [vmem:[#allocation5 + $0x1c8] sm:$0xff]  ;;  %v7681_v20 = vcombine.low %v113_v7, %v129_v8  ;;  %v7714_v24 = vcombine.high %v145_v16, %v161_v17  ;;  %v131_v7 = vld [vmem:[#allocation5 + $0xd0] sm:$0xff] }
  0xc0   :  { %1919 = vmatprep.mubr.bf16.mxu0 %v9424_v0  ;;  %1960 = vmatprep.mubr.bf16.mxu1 %v9424_v0  ;;  %v7715_v31 = vcombine.low %v146_v18, %v162_v19 }
  0xc2   :  { %1890 = vmatpush1.bf16.msra.mxu0 %v7709_v26  ;;  %1931 = vmatpush1.bf16.msra.mxu1 %v7711_v27  ;;  %v194_v26 = vld [vmem:[#allocation5 + $0x2c8] sm:$0xff]  ;;  %v7716_v27 = vcombine.high %v146_v18, %v162_v19  ;;  %v148_v19 = vld [vmem:[#allocation5 + $0x158] sm:$0xff] }
  0xc3   :  { %1891 = vmatprep.subr.bf16.mxu0 %v7742_v28  ;;  %1932 = vmatprep.subr.bf16.mxu1 %v7744_v32  ;;  %v7713_v28 = vcombine.low %v145_v16, %v161_v17  ;;  %v7746_v32 = vcombine.high %v177_v21, %v193_v22  ;;  %v7747_v39 = vcombine.low %v178_v25, %v194_v26  ;;  %v163_v16 = vld [vmem:[#allocation5 + $0x1d0] sm:$0xff] }
  0xc6   :  { %1892 = vmatpush1.bf16.msra.mxu0 %v7741_v34  ;;  %1933 = vmatpush1.bf16.msra.mxu1 %v7743_v35  ;;  %v226_v34 = vld [vmem:[#allocation5 + $0x3c8] sm:$0xff]  ;;  %v7748_v35 = vcombine.high %v178_v25, %v194_v26 }
  0xc7   :  { %1893 = vmatprep.subr.bf16.mxu0 %v7774_v36  ;;  %1934 = vmatprep.subr.bf16.mxu1 %v7776_v40  ;;  %v7745_v36 = vcombine.low %v177_v21, %v193_v22  ;;  %v7778_v40 = vcombine.high %v209_v29, %v225_v30  ;;  %v7779_v47 = vcombine.low %v210_v33, %v226_v34 }
  0xca   :  { %1894 = vmatpush1.bf16.msra.mxu0 %v7773_v42  ;;  %1935 = vmatpush1.bf16.msra.mxu1 %v7775_v43  ;;  %v258_v42 = vld [vmem:[#allocation5 + $0x4c8] sm:$0xff]  ;;  %v7780_v43 = vcombine.high %v210_v33, %v226_v34 }
  0xcb   :  { %1895 = vmatprep.subr.bf16.mxu0 %v7806_v44  ;;  %1936 = vmatprep.subr.bf16.mxu1 %v7808_v48  ;;  %v7777_v44 = vcombine.low %v209_v29, %v225_v30  ;;  %v7810_v48 = vcombine.high %v241_v37, %v257_v38  ;;  %v7811_v55 = vcombine.low %v242_v41, %v258_v42  ;;  %v196_v29 = vld [vmem:[#allocation5 + $0x2d8] sm:$0xff] }
  0xce   :  { %1896 = vmatpush1.bf16.msra.mxu0 %v7805_v50  ;;  %1937 = vmatpush1.bf16.msra.mxu1 %v7807_v51  ;;  %v290_v50 = vld [vmem:[#allocation5 + $0x5c8] sm:$0xff]  ;;  %v7812_v51 = vcombine.high %v242_v41, %v258_v42 }
  0xcf   :  { %1897 = vmatprep.subr.bf16.mxu0 %v7838_v52  ;;  %1938 = vmatprep.subr.bf16.mxu1 %v7840_v56  ;;  %v7809_v52 = vcombine.low %v241_v37, %v257_v38  ;;  %v7842_v56 = vcombine.high %v273_v45, %v289_v46  ;;  %v7843_v63 = vcombine.low %v274_v49, %v290_v50  ;;  %v228_v37 = vld [vmem:[#allocation5 + $0x3d8] sm:$0xff] }
  0xd2   :  { %1898 = vmatpush1.bf16.msra.mxu0 %v7837_v58  ;;  %1939 = vmatpush1.bf16.msra.mxu1 %v7839_v59  ;;  %v322_v58 = vld [vmem:[#allocation5 + $0x6c8] sm:$0xff]  ;;  %v7844_v59 = vcombine.high %v274_v49, %v290_v50 }
  0xd3   :  { %1899 = vmatprep.subr.bf16.mxu0 %v7870_v60  ;;  %1940 = vmatprep.subr.bf16.mxu1 %v7872_v61  ;;  %v7841_v60 = vcombine.low %v273_v45, %v289_v46  ;;  %v337_v61 = vld [vmem:[#allocation5 + $0x740] sm:$0xff]  ;;  %v7875_v8 = vcombine.low %v306_v57, %v322_v58  ;;  %v260_v45 = vld [vmem:[#allocation5 + $0x4d8] sm:$0xff] }
  0xd4   :  { %v7906_v9 = vcombine.high %v337_v61, %v353_v62 }
  0xd6   :  { %1900 = vmatpush1.bf16.msra.mxu0 %v7869_v3  ;;  %1941 = vmatpush1.bf16.msra.mxu1 %v7871_v4  ;;  %v354_v3 = vld [vmem:[#allocation5 + $0x7c8] sm:$0xff]  ;;  %v7876_v4 = vcombine.high %v306_v57, %v322_v58 }
  0xd7   :  { %1901 = vmatprep.subr.bf16.mxu0 %v7902_v5  ;;  %1942 = vmatprep.subr.bf16.mxu1 %v7904_v6  ;;  %v7873_v5 = vcombine.low %v305_v53, %v321_v54  ;;  %v115_v6 = vld [vmem:[#allocation5 + $0x50] sm:$0xff]  ;;  %v7907_v17 = vcombine.low %v338_v2, %v354_v3  ;;  %v292_v53 = vld [vmem:[#allocation5 + $0x5d8] sm:$0xff] }
  0xd8   :  { %v7686_v18 = vcombine.high %v115_v6, %v131_v7  ;;  %v7685_v22 = vcombine.low %v115_v6, %v131_v7  ;;  %v356_v6 = vld [vmem:[#allocation5 + $0x7d8] sm:$0xff] }
  0xda   :  { %1902 = vmatpush1.bf16.msra.mxu0 %v7901_v12  ;;  %1943 = vmatpush1.bf16.msra.mxu1 %v7903_v13  ;;  %v132_v12 = vld [vmem:[#allocation5 + $0xd8] sm:$0xff]  ;;  %v7908_v13 = vcombine.high %v338_v2, %v354_v3 }
  0xdb   :  { %1969 = vmatprep.subr.bf16.mxu0 %v7682_v14  ;;  %2010 = vmatprep.subr.bf16.mxu1 %v7684_v15  ;;  %v7905_v14 = vcombine.low %v337_v61, %v353_v62  ;;  %v147_v15 = vld [vmem:[#allocation5 + $0x150] sm:$0xff]  ;;  %v7688_v21 = vcombine.high %v116_v10, %v132_v12  ;;  %v7687_v25 = vcombine.low %v116_v10, %v132_v12  ;;  %v324_v61 = vld [vmem:[#allocation5 + $0x6d8] sm:$0xff] }
  0xdc   :  { %v7718_v26 = vcombine.high %v147_v15, %v163_v16  ;;  %v7717_v30 = vcombine.low %v147_v15, %v163_v16  ;;  %v134_v15 = vld [vmem:[#allocation5 + $0xe8] sm:$0xff] }
  0xdd   :  { %1920 = vmatmul.mubr.bf16.vlgmr.msra.gmra.mrb[12].mxu0 %v9519_v11  ;;  %1961 = vmatmul.mubr.bf16.vlgmr.msra.gmra.mrb[12].mxu1 %v9519_v11 }
  0xde   :  { %1970 = vmatpush1.bf16.msra.mxu0 %v7681_v20  ;;  %2011 = vmatpush1.bf16.msra.mxu1 %v7683_v23  ;;  %v164_v20 = vld [vmem:[#allocation5 + $0x1d8] sm:$0xff]  ;;  %v179_v23 = vld [vmem:[#allocation5 + $0x250] sm:$0xff] }
  0xdf   :  { %1971 = vmatprep.subr.bf16.mxu0 %v7714_v24  ;;  %2012 = vmatprep.subr.bf16.mxu1 %v7716_v27  ;;  %v195_v24 = vld [vmem:[#allocation5 + $0x2d0] sm:$0xff]  ;;  %v7720_v27 = vcombine.high %v148_v19, %v164_v20  ;;  %v7719_v33 = vcombine.low %v148_v19, %v164_v20 }
  0xe0   :  { %2001 = vmatprep.mubr.bf16.mxu0 %v9424_v0  ;;  %2042 = vmatprep.mubr.bf16.mxu1 %v9424_v0  ;;  %v7750_v34 = vcombine.high %v179_v23, %v195_v24  ;;  %v7749_v38 = vcombine.low %v179_v23, %v195_v24  ;;  %v166_v23 = vld [vmem:[#allocation5 + $0x1e8] sm:$0xff] }
  0xe2   :  { %1972 = vmatpush1.bf16.msra.mxu0 %v7713_v28  ;;  %2013 = vmatpush1.bf16.msra.mxu1 %v7715_v31  ;;  %v180_v28 = vld [vmem:[#allocation5 + $0x258] sm:$0xff]  ;;  %v211_v31 = vld [vmem:[#allocation5 + $0x350] sm:$0xff] }
  0xe3   :  { %1973 = vmatprep.subr.bf16.mxu0 %v7746_v32  ;;  %2014 = vmatprep.subr.bf16.mxu1 %v7748_v35  ;;  %v227_v32 = vld [vmem:[#allocation5 + $0x3d0] sm:$0xff]  ;;  %v7752_v35 = vcombine.high %v180_v28, %v196_v29  ;;  %v7751_v41 = vcombine.low %v180_v28, %v196_v29 }
  0xe4   :  { %v7782_v42 = vcombine.high %v211_v31, %v227_v32  ;;  %v7781_v46 = vcombine.low %v211_v31, %v227_v32  ;;  %v198_v31 = vld [vmem:[#allocation5 + $0x2e8] sm:$0xff] }
  0xe6   :  { %1974 = vmatpush1.bf16.msra.mxu0 %v7745_v36  ;;  %2015 = vmatpush1.bf16.msra.mxu1 %v7747_v39  ;;  %v212_v36 = vld [vmem:[#allocation5 + $0x358] sm:$0xff]  ;;  %v243_v39 = vld [vmem:[#allocation5 + $0x450] sm:$0xff] }
  0xe7   :  { %1975 = vmatprep.subr.bf16.mxu0 %v7778_v40  ;;  %2016 = vmatprep.subr.bf16.mxu1 %v7780_v43  ;;  %v259_v40 = vld [vmem:[#allocation5 + $0x4d0] sm:$0xff]  ;;  %v7784_v43 = vcombine.high %v212_v36, %v228_v37  ;;  %v7783_v49 = vcombine.low %v212_v36, %v228_v37 }
  0xe8   :  { %v7814_v50 = vcombine.high %v243_v39, %v259_v40  ;;  %v7813_v54 = vcombine.low %v243_v39, %v259_v40  ;;  %v230_v39 = vld [vmem:[#allocation5 + $0x3e8] sm:$0xff] }
  0xea   :  { %1976 = vmatpush1.bf16.msra.mxu0 %v7777_v44  ;;  %2017 = vmatpush1.bf16.msra.mxu1 %v7779_v47  ;;  %v244_v44 = vld [vmem:[#allocation5 + $0x458] sm:$0xff]  ;;  %v275_v47 = vld [vmem:[#allocation5 + $0x550] sm:$0xff] }
  0xeb   :  { %1977 = vmatprep.subr.bf16.mxu0 %v7810_v48  ;;  %2018 = vmatprep.subr.bf16.mxu1 %v7812_v51  ;;  %v291_v48 = vld [vmem:[#allocation5 + $0x5d0] sm:$0xff]  ;;  %v7816_v51 = vcombine.high %v244_v44, %v260_v45  ;;  %v7815_v57 = vcombine.low %v244_v44, %v260_v45  ;;  %v261_v45 = vld [vmem:[#allocation5 + $0x4e0] sm:$0xff] }
  0xec   :  { %v7846_v58 = vcombine.high %v275_v47, %v291_v48  ;;  %v7845_v62 = vcombine.low %v275_v47, %v291_v48  ;;  %v262_v47 = vld [vmem:[#allocation5 + $0x4e8] sm:$0xff] }
  0xee   :  { %1978 = vmatpush1.bf16.msra.mxu0 %v7809_v52  ;;  %2019 = vmatpush1.bf16.msra.mxu1 %v7811_v55  ;;  %v276_v52 = vld [vmem:[#allocation5 + $0x558] sm:$0xff]  ;;  %v307_v55 = vld [vmem:[#allocation5 + $0x650] sm:$0xff] }
  0xef   :  { %1979 = vmatprep.subr.bf16.mxu0 %v7842_v56  ;;  %2020 = vmatprep.subr.bf16.mxu1 %v7844_v59  ;;  %v323_v56 = vld [vmem:[#allocation5 + $0x6d0] sm:$0xff]  ;;  %v7848_v59 = vcombine.high %v276_v52, %v292_v53  ;;  %v7847_v2 = vcombine.low %v276_v52, %v292_v53 }
  0xf0   :  { %v7878_v3 = vcombine.high %v307_v55, %v323_v56  ;;  %v7877_v7 = vcombine.low %v307_v55, %v323_v56  ;;  %v294_v55 = vld [vmem:[#allocation5 + $0x5e8] sm:$0xff] }
  0xf2   :  { %1980 = vmatpush1.bf16.msra.mxu0 %v7841_v60  ;;  %2021 = vmatpush1.bf16.msra.mxu1 %v7843_v63  ;;  %v308_v60 = vld [vmem:[#allocation5 + $0x658] sm:$0xff]  ;;  %v339_v63 = vld [vmem:[#allocation5 + $0x750] sm:$0xff] }
  0xf3   :  { %1981 = vmatprep.subr.bf16.mxu0 %v7874_v1  ;;  %2022 = vmatprep.subr.bf16.mxu1 %v7876_v4  ;;  %v355_v1 = vld [vmem:[#allocation5 + $0x7d0] sm:$0xff]  ;;  %v7880_v4 = vcombine.high %v308_v60, %v324_v61 }
  0xf4   :  { %v7910_v10 = vcombine.high %v339_v63, %v355_v1  ;;  %v7909_v16 = vcombine.low %v339_v63, %v355_v1  ;;  %v326_v63 = vld [vmem:[#allocation5 + $0x6e8] sm:$0xff] }
  0xf6   :  { %1982 = vmatpush1.bf16.msra.mxu0 %v7873_v5  ;;  %2023 = vmatpush1.bf16.msra.mxu1 %v7875_v8  ;;  %v340_v5 = vld [vmem:[#allocation5 + $0x758] sm:$0xff]  ;;  %v117_v8 = vld [vmem:[#allocation5 + $0x60] sm:$0xff] }
  0xf7   :  { %1983 = vmatprep.subr.bf16.mxu0 %v7906_v9  ;;  %2024 = vmatprep.subr.bf16.mxu1 %v7908_v13  ;;  %v7879_v9 = vcombine.low %v308_v60, %v324_v61  ;;  %v7912_v12 = vcombine.high %v340_v5, %v356_v6  ;;  %v133_v13 = vld [vmem:[#allocation5 + $0xe0] sm:$0xff]  ;;  %v7911_v19 = vcombine.low %v340_v5, %v356_v6 }
  0xf8   :  { %v7690_v20 = vcombine.high %v117_v8, %v133_v13  ;;  %v7689_v24 = vcombine.low %v117_v8, %v133_v13  ;;  %v358_v8 = vld [vmem:[#allocation5 + $0x7e8] sm:$0xff] }
  0xfa   :  { %1984 = vmatpush1.bf16.msra.mxu0 %v7905_v14  ;;  %2025 = vmatpush1.bf16.msra.mxu1 %v7907_v17  ;;  %v118_v14 = vld [vmem:[#allocation5 + $0x68] sm:$0xff]  ;;  %v149_v17 = vld [vmem:[#allocation5 + $0x160] sm:$0xff] }
  0xfb   :  { %2051 = vmatprep.subr.bf16.mxu0 %v7686_v18  ;;  %2092 = vmatprep.subr.bf16.mxu1 %v7688_v21  ;;  %v165_v18 = vld [vmem:[#allocation5 + $0x1e0] sm:$0xff]  ;;  %v7692_v21 = vcombine.high %v118_v14, %v134_v15 }
  0xfc   :  { %v7722_v28 = vcombine.high %v149_v17, %v165_v18  ;;  %v7721_v32 = vcombine.low %v149_v17, %v165_v18  ;;  %v136_v17 = vld [vmem:[#allocation5 + $0xf8] sm:$0xff] }
  0xfd   :  { %2002 = vmatmul.mubr.bf16.vlgmr.msra.gmra.mrb[16].mxu0 %v9519_v11  ;;  %2043 = vmatmul.mubr.bf16.vlgmr.msra.gmra.mrb[16].mxu1 %v9519_v11 }
  0xfe   :  { %2052 = vmatpush1.bf16.msra.mxu0 %v7685_v22  ;;  %2093 = vmatpush1.bf16.msra.mxu1 %v7687_v25  ;;  %v150_v22 = vld [vmem:[#allocation5 + $0x168] sm:$0xff]  ;;  %v181_v25 = vld [vmem:[#allocation5 + $0x260] sm:$0xff] }
  0xff   :  { %2053 = vmatprep.subr.bf16.mxu0 %v7718_v26  ;;  %2094 = vmatprep.subr.bf16.mxu1 %v7720_v27  ;;  %v197_v26 = vld [vmem:[#allocation5 + $0x2e0] sm:$0xff]  ;;  %v7691_v27 = vcombine.low %v118_v14, %v134_v15  ;;  %v7724_v29 = vcombine.high %v150_v22, %v166_v23  ;;  %v135_v15 = vld [vmem:[#allocation5 + $0xf0] sm:$0xff] }
 0x100   :  { %2083 = vmatprep.mubr.bf16.mxu0 %v9424_v0  ;;  %2124 = vmatprep.mubr.bf16.mxu1 %v9424_v0  ;;  %v7754_v36 = vcombine.high %v181_v25, %v197_v26  ;;  %v7753_v40 = vcombine.low %v181_v25, %v197_v26  ;;  %v168_v25 = vld [vmem:[#allocation5 + $0x1f8] sm:$0xff] }
 0x102   :  { %2054 = vmatpush1.bf16.msra.mxu0 %v7717_v30  ;;  %2095 = vmatpush1.bf16.msra.mxu1 %v7719_v33  ;;  %v182_v30 = vld [vmem:[#allocation5 + $0x268] sm:$0xff]  ;;  %v213_v33 = vld [vmem:[#allocation5 + $0x360] sm:$0xff] }
 0x103   :  { %2055 = vmatprep.subr.bf16.mxu0 %v7750_v34  ;;  %2096 = vmatprep.subr.bf16.mxu1 %v7752_v35  ;;  %v229_v34 = vld [vmem:[#allocation5 + $0x3e0] sm:$0xff]  ;;  %v7723_v35 = vcombine.low %v150_v22, %v166_v23  ;;  %v7756_v37 = vcombine.high %v182_v30, %v198_v31 }
 0x104   :  { %v7785_v48 = vcombine.low %v213_v33, %v229_v34 }
 0x106   :  { %2056 = vmatpush1.bf16.msra.mxu0 %v7749_v38  ;;  %2097 = vmatpush1.bf16.msra.mxu1 %v7751_v41  ;;  %v214_v38 = vld [vmem:[#allocation5 + $0x368] sm:$0xff]  ;;  %v245_v41 = vld [vmem:[#allocation5 + $0x460] sm:$0xff] }
 0x107   :  { %2057 = vmatprep.subr.bf16.mxu0 %v7782_v42  ;;  %2098 = vmatprep.subr.bf16.mxu1 %v7784_v43  ;;  %v7755_v42 = vcombine.low %v182_v30, %v198_v31  ;;  %v7786_v43 = vcombine.high %v213_v33, %v229_v34  ;;  %v7788_v44 = vcombine.high %v214_v38, %v230_v39  ;;  %v184_v31 = vld [vmem:[#allocation5 + $0x278] sm:$0xff] }
 0x108   :  { %v7818_v52 = vcombine.high %v245_v41, %v261_v45  ;;  %v7817_v56 = vcombine.low %v245_v41, %v261_v45 }
 0x10a   :  { %2058 = vmatpush1.bf16.msra.mxu0 %v7781_v46  ;;  %2099 = vmatpush1.bf16.msra.mxu1 %v7783_v49  ;;  %v246_v46 = vld [vmem:[#allocation5 + $0x468] sm:$0xff]  ;;  %v277_v49 = vld [vmem:[#allocation5 + $0x560] sm:$0xff] }
 0x10b   :  { %2059 = vmatprep.subr.bf16.mxu0 %v7814_v50  ;;  %2100 = vmatprep.subr.bf16.mxu1 %v7816_v51  ;;  %v293_v50 = vld [vmem:[#allocation5 + $0x5e0] sm:$0xff]  ;;  %v7787_v51 = vcombine.low %v214_v38, %v230_v39  ;;  %v7820_v53 = vcombine.high %v246_v46, %v262_v47  ;;  %v216_v39 = vld [vmem:[#allocation5 + $0x378] sm:$0xff] }
 0x10c   :  { %v7850_v60 = vcombine.high %v277_v49, %v293_v50  ;;  %v7849_v1 = vcombine.low %v277_v49, %v293_v50 }
 0x10e   :  { %2060 = vmatpush1.bf16.msra.mxu0 %v7813_v54  ;;  %2101 = vmatpush1.bf16.msra.mxu1 %v7815_v57  ;;  %v278_v54 = vld [vmem:[#allocation5 + $0x568] sm:$0xff]  ;;  %v309_v57 = vld [vmem:[#allocation5 + $0x660] sm:$0xff] }
 0x10f   :  { %2061 = vmatprep.subr.bf16.mxu0 %v7846_v58  ;;  %2102 = vmatprep.subr.bf16.mxu1 %v7848_v59  ;;  %v325_v58 = vld [vmem:[#allocation5 + $0x6e0] sm:$0xff]  ;;  %v7819_v59 = vcombine.low %v246_v46, %v262_v47  ;;  %v7852_v61 = vcombine.high %v278_v54, %v294_v55  ;;  %v248_v47 = vld [vmem:[#allocation5 + $0x478] sm:$0xff] }
 0x110   :  { %v7882_v5 = vcombine.high %v309_v57, %v325_v58 }
 0x112   :  { %2062 = vmatpush1.bf16.msra.mxu0 %v7845_v62  ;;  %2103 = vmatpush1.bf16.msra.mxu1 %v7847_v2  ;;  %v310_v62 = vld [vmem:[#allocation5 + $0x668] sm:$0xff]  ;;  %v341_v2 = vld [vmem:[#allocation5 + $0x760] sm:$0xff] }
 0x113   :  { %2063 = vmatprep.subr.bf16.mxu0 %v7878_v3  ;;  %2104 = vmatprep.subr.bf16.mxu1 %v7880_v4  ;;  %v357_v3 = vld [vmem:[#allocation5 + $0x7e0] sm:$0xff]  ;;  %v7851_v4 = vcombine.low %v278_v54, %v294_v55  ;;  %v7884_v6 = vcombine.high %v310_v62, %v326_v63  ;;  %v280_v54 = vld [vmem:[#allocation5 + $0x578] sm:$0xff] }
 0x114   :  { %v7914_v13 = vcombine.high %v341_v2, %v357_v3  ;;  %v7913_v18 = vcombine.low %v341_v2, %v357_v3  ;;  %v296_v55 = vld [vmem:[#allocation5 + $0x5f8] sm:$0xff]  ;;  %v9555_v2 = vld [vmem:[#allocation5 + $0x7f0] sm:$0xff] }
 0x115   :  { %v9557_v3 = vld [vmem:[#allocation5 + $0x778] sm:$0xff] }
 0x116   :  { %2064 = vmatpush1.bf16.msra.mxu0 %v7877_v7  ;;  %2105 = vmatpush1.bf16.msra.mxu1 %v7879_v9  ;;  %v342_v7 = vld [vmem:[#allocation5 + $0x768] sm:$0xff]  ;;  %v7881_v9 = vcombine.low %v309_v57, %v325_v58  ;;  %v311_v58 = vld [vmem:[#allocation5 + $0x670] sm:$0xff] }
 0x117   :  { %2065 = vmatprep.subr.bf16.mxu0 %v7910_v10  ;;  %2106 = vmatprep.subr.bf16.mxu1 %v7912_v12  ;;  %v119_v10 = vld [vmem:[#allocation5 + $0x70] sm:$0xff]  ;;  %v7883_v12 = vcombine.low %v310_v62, %v326_v63  ;;  %v7916_v14 = vcombine.high %v342_v7, %v358_v8 }
 0x118   :  { %v7694_v22 = vcombine.high %v119_v10, %v135_v15  ;;  %v7693_v26 = vcombine.low %v119_v10, %v135_v15 }
 0x11a   :  { %2066 = vmatpush1.bf16.msra.mxu0 %v7909_v16  ;;  %2107 = vmatpush1.bf16.msra.mxu1 %v7911_v19  ;;  %v120_v16 = vld [vmem:[#allocation5 + $0x78] sm:$0xff]  ;;  %v151_v19 = vld [vmem:[#allocation5 + $0x170] sm:$0xff] }
 0x11b   :  { %2133 = vmatprep.subr.bf16.mxu0 %v7690_v20  ;;  %2174 = vmatprep.subr.bf16.mxu1 %v7692_v21  ;;  %v167_v20 = vld [vmem:[#allocation5 + $0x1f0] sm:$0xff]  ;;  %v7915_v21 = vcombine.low %v342_v7, %v358_v8  ;;  %v7696_v23 = vcombine.high %v120_v16, %v136_v17  ;;  %v7855_v7 = vcombine.low %v280_v54, %v296_v55 }
 0x11c   :  { %v7726_v30 = vcombine.high %v151_v19, %v167_v20  ;;  %v7725_v34 = vcombine.low %v151_v19, %v167_v20 }
 0x11d   :  { %2084 = vmatmul.mubr.bf16.vlgmr.msra.gmra.mrb[20].mxu0 %v9519_v11  ;;  %2125 = vmatmul.mubr.bf16.vlgmr.msra.gmra.mrb[20].mxu1 %v9519_v11 }
 0x11e   :  { %2134 = vmatpush1.bf16.msra.mxu0 %v7689_v24  ;;  %2175 = vmatpush1.bf16.msra.mxu1 %v7691_v27  ;;  %v152_v24 = vld [vmem:[#allocation5 + $0x178] sm:$0xff]  ;;  %v183_v27 = vld [vmem:[#allocation5 + $0x270] sm:$0xff] }
 0x11f   :  { %2135 = vmatprep.subr.bf16.mxu0 %v7722_v28  ;;  %2176 = vmatprep.subr.bf16.mxu1 %v7724_v29  ;;  %v199_v28 = vld [vmem:[#allocation5 + $0x2f0] sm:$0xff]  ;;  %v7695_v29 = vcombine.low %v120_v16, %v136_v17  ;;  %v7728_v33 = vcombine.high %v152_v24, %v168_v25 }
 0x120   :  { %2165 = vmatprep.mubr.bf16.mxu0 %v9424_v0  ;;  %2206 = vmatprep.mubr.bf16.mxu1 %v9424_v0  ;;  %v7758_v38 = vcombine.high %v183_v27, %v199_v28 }
 0x122   :  { %2136 = vmatpush1.bf16.msra.mxu0 %v7721_v32  ;;  %2177 = vmatpush1.bf16.msra.mxu1 %v7723_v35  ;;  %v200_v32 = vld [vmem:[#allocation5 + $0x2f8] sm:$0xff]  ;;  %v215_v35 = vld [vmem:[#allocation5 + $0x370] sm:$0xff] }
 0x123   :  { %2137 = vmatprep.subr.bf16.mxu0 %v7754_v36  ;;  %2178 = vmatprep.subr.bf16.mxu1 %v7756_v37  ;;  %v231_v36 = vld [vmem:[#allocation5 + $0x3f0] sm:$0xff]  ;;  %v7727_v37 = vcombine.low %v152_v24, %v168_v25  ;;  %v7760_v41 = vcombine.high %v184_v31, %v200_v32  ;;  %v7759_v45 = vcombine.low %v184_v31, %v200_v32 }
 0x124   :  { %v7790_v46 = vcombine.high %v215_v35, %v231_v36  ;;  %v7789_v50 = vcombine.low %v215_v35, %v231_v36 }
 0x126   :  { %2138 = vmatpush1.bf16.msra.mxu0 %v7753_v40  ;;  %2179 = vmatpush1.bf16.msra.mxu1 %v7755_v42  ;;  %v232_v40 = vld [vmem:[#allocation5 + $0x3f8] sm:$0xff]  ;;  %v7757_v42 = vcombine.low %v183_v27, %v199_v28 }
 0x127   :  { %2139 = vmatprep.subr.bf16.mxu0 %v7786_v43  ;;  %2180 = vmatprep.subr.bf16.mxu1 %v7788_v44  ;;  %v247_v43 = vld [vmem:[#allocation5 + $0x470] sm:$0xff]  ;;  %v7792_v49 = vcombine.high %v216_v39, %v232_v40 }
 0x128   :  { %v263_v44 = vld [vmem:[#allocation5 + $0x4f0] sm:$0xff] }
 0x129   :  { %v7821_v57 = vcombine.low %v247_v43, %v263_v44 }
 0x12a   :  { %2140 = vmatpush1.bf16.msra.mxu0 %v7785_v48  ;;  %2181 = vmatpush1.bf16.msra.mxu1 %v7787_v51  ;;  %v264_v48 = vld [vmem:[#allocation5 + $0x4f8] sm:$0xff]  ;;  %v279_v51 = vld [vmem:[#allocation5 + $0x570] sm:$0xff] }
 0x12b   :  { %2141 = vmatprep.subr.bf16.mxu0 %v7818_v52  ;;  %2182 = vmatprep.subr.bf16.mxu1 %v7820_v53  ;;  %v295_v52 = vld [vmem:[#allocation5 + $0x5f0] sm:$0xff]  ;;  %v7791_v53 = vcombine.low %v216_v39, %v232_v40  ;;  %v7823_v62 = vcombine.low %v248_v47, %v264_v48 }
 0x12c   :  { %v7854_v63 = vcombine.high %v279_v51, %v295_v52 }
 0x12e   :  { %2142 = vmatpush1.bf16.msra.mxu0 %v7817_v56  ;;  %2183 = vmatpush1.bf16.msra.mxu1 %v7819_v59  ;;  %v7824_v56 = vcombine.high %v248_v47, %v264_v48  ;;  %v327_v59 = vld [vmem:[#allocation5 + $0x6f0] sm:$0xff]  ;;  %v8446_v47 = vld [vmem:[#allocation8 + $0x4] ss:$8 sps:$4 sm:$0xff]  }
 0x12f   :  { %2143 = vmatprep.subr.bf16.mxu0 %v7850_v60  ;;  %2184 = vmatprep.subr.bf16.mxu1 %v7852_v61  ;;  %v9549_v60 = vld [vmem:[#allocation5 + $0x678] sm:$0xff]  ;;  %v7885_v8 = vcombine.low %v311_v58, %v327_v59  ;;  %v8449_v48 = vld [vmem:[#allocation8 + $0x104] ss:$8 sps:$4 sm:$0xff]  }
 0x130   :  { %v9551_v61 = vld [vmem:[#allocation5 + $0x6f8] sm:$0xff] }
 0x131   :  { %v7887_v10 = vcombine.low %v9549_v60, %v9551_v61 }
 0x132   :  { %2144 = vmatpush1.bf16.msra.mxu0 %v7849_v1  ;;  %2185 = vmatpush1.bf16.msra.mxu1 %v7851_v4  ;;  %v9553_v1 = vld [vmem:[#allocation5 + $0x770] sm:$0xff]  ;;  %v9559_v4 = vld [vmem:[#allocation5 + $0x7f8] sm:$0xff] }
 0x133   :  { %2145 = vmatprep.subr.bf16.mxu0 %v7882_v5  ;;  %2186 = vmatprep.subr.bf16.mxu1 %v7884_v6  ;;  %v7856_v5 = vcombine.high %v280_v54, %v296_v55  ;;  %v7853_v6 = vcombine.low %v279_v51, %v295_v52  ;;  %v7918_v15 = vcombine.high %v9553_v1, %v9555_v2 }
 0x134   :  { %v7919_v16 = vcombine.low %v9557_v3, %v9559_v4 }
 0x136   :  { %2146 = vmatpush1.bf16.msra.mxu0 %v7881_v9  ;;  %2187 = vmatpush1.bf16.msra.mxu1 %v7883_v12  ;;  %v7886_v9 = vcombine.high %v311_v58, %v327_v59 }
 0x137   :  { %2147 = vmatprep.subr.bf16.mxu0 %v7914_v13  ;;  %2188 = vmatprep.subr.bf16.mxu1 %v7916_v14  ;;  %v7888_v13 = vcombine.high %v9549_v60, %v9551_v61  ;;  %v7917_v14 = vcombine.low %v9553_v1, %v9555_v2  ;;  %v8444_v60 = vld [vmem:[#allocation8] ss:$8 sps:$4 sm:$0xff]  }
 0x138   :  { %v8447_v61 = vld [vmem:[#allocation8 + $0x100] ss:$8 sps:$4 sm:$0xff]  }
 0x13a   :  { %2148 = vmatpush1.bf16.msra.mxu0 %v7913_v18  ;;  %2189 = vmatpush1.bf16.msra.mxu1 %v7915_v21  ;;  %v7920_v21 = vcombine.high %v9557_v3, %v9559_v4 }
 0x13b   :  { %2215 = vmatprep.subr.bf16.mxu0 %v7694_v22  ;;  %2256 = vmatprep.subr.bf16.mxu1 %v7696_v23 }
 0x13d   :  { %2166 = vmatmul.mubr.bf16.vlgmr.msra.gmra.mrb[24].mxu0 %v9519_v11  ;;  %2207 = vmatmul.mubr.bf16.vlgmr.msra.gmra.mrb[24].mxu1 %v9519_v11 }
 0x13e   :  { %2216 = vmatpush1.bf16.msra.mxu0 %v7693_v26  ;;  %2257 = vmatpush1.bf16.msra.mxu1 %v7695_v29 }
 0x13f   :  { %2217 = vmatprep.subr.bf16.mxu0 %v7726_v30  ;;  %2258 = vmatprep.subr.bf16.mxu1 %v7728_v33 }
 0x140   :  { %2247 = vmatprep.mubr.bf16.mxu0 %v9424_v0  ;;  %2288 = vmatprep.mubr.bf16.mxu1 %v9424_v0  ;;  %v7822_v0 = vcombine.high %v247_v43, %v263_v44 }
 0x142   :  { %2218 = vmatpush1.bf16.msra.mxu0 %v7725_v34  ;;  %2259 = vmatpush1.bf16.msra.mxu1 %v7727_v37 }
 0x143   :  { %2219 = vmatprep.subr.bf16.mxu0 %v7758_v38  ;;  %2260 = vmatprep.subr.bf16.mxu1 %v7760_v41 }
 0x146   :  { %2220 = vmatpush1.bf16.msra.mxu0 %v7757_v42  ;;  %2261 = vmatpush1.bf16.msra.mxu1 %v7759_v45 }
 0x147   :  { %2221 = vmatprep.subr.bf16.mxu0 %v7790_v46  ;;  %2262 = vmatprep.subr.bf16.mxu1 %v7792_v49 }
 0x14a   :  { %2222 = vmatpush1.bf16.msra.mxu0 %v7789_v50  ;;  %2263 = vmatpush1.bf16.msra.mxu1 %v7791_v53 }
 0x14b   :  { %2223 = vmatprep.subr.bf16.mxu0 %v7822_v0  ;;  %2264 = vmatprep.subr.bf16.mxu1 %v7824_v56 }
 0x14e   :  { %2224 = vmatpush1.bf16.msra.mxu0 %v7821_v57  ;;  %2265 = vmatpush1.bf16.msra.mxu1 %v7823_v62 }
 0x14f   :  { %2225 = vmatprep.subr.bf16.mxu0 %v7854_v63  ;;  %2266 = vmatprep.subr.bf16.mxu1 %v7856_v5  ;;  %v8452_v5 = vld [vmem:[#allocation8 + $0x14] ss:$8 sps:$4 sm:$0xff]  }
 0x150   :  { %v9563_v12 = vpop.f32.mrb[0].mxu0  ;;  %v9576_v19 = vpop.f32.mrb[0].mxu1 }
 0x151   :  { %v2297_v17 = vrot.slane %v9563_v12, 4  ;;  %v2522_v18 = vmul.f32 %v9563_v12, %v9563_v12  ;;  %v9578_v20 = vpop.f32.mrb[1].mxu0  ;;  %v2309_v22 = vrot.slane %v9576_v19, 4  ;;  %v2524_v23 = vmul.f32 %v9576_v19, %v9576_v19  ;;  %v9588_v26 = vpop.f32.mrb[1].mxu1 }
 0x152   :  { %v2303_v24 = vrot.slane %v9578_v20, 4  ;;  %v2523_v25 = vmul.f32 %v9578_v20, %v9578_v20  ;;  %v1679_v27 = vpop.f32.mrb[2].mxu0  ;;  %2226 = vmatpush1.bf16.msra.mxu0 %v7853_v6  ;;  %v2315_v30 = vrot.slane %v9588_v26, 4  ;;  %v2525_v31 = vmul.f32 %v9588_v26, %v9588_v26  ;;  %v1720_v32 = vpop.f32.mrb[2].mxu1  ;;  %2267 = vmatpush1.bf16.msra.mxu1 %v7855_v7  ;;  %v8455_v6 = vld [vmem:[#allocation8 + $0x114] ss:$8 sps:$4 sm:$0xff]  }
 0x153   :  { %v2298_v28 = vadd.f32 %v2297_v17, %v9563_v12  ;;  %v2554_v29 = vrot.slane %v2522_v18, 4  ;;  %v1680_v33 = vpop.f32.mrb[3].mxu0  ;;  %2227 = vmatprep.subr.bf16.mxu0 %v7886_v9  ;;  %v2310_v34 = vadd.f32 %v2309_v22, %v9576_v19  ;;  %v2566_v35 = vrot.slane %v2524_v23, 4  ;;  %v1721_v38 = vpop.f32.mrb[3].mxu1  ;;  %2268 = vmatprep.subr.bf16.mxu1 %v7888_v13 }
 0x154   :  { %v2304_v36 = vadd.f32 %v2303_v24, %v9578_v20  ;;  %v2560_v37 = vrot.slane %v2523_v25, 4  ;;  %v2316_v41 = vadd.f32 %v2315_v30, %v9588_v26  ;;  %v2572_v42 = vrot.slane %v2525_v31, 4  ;;  %v8450_v24 = vld [vmem:[#allocation8 + $0x10] ss:$8 sps:$4 sm:$0xff]  }
 0x155   :  { %v2299_v39 = vrot.slane %v2298_v28, 2  ;;  %v2555_v40 = vadd.f32 %v2554_v29, %v2522_v18  ;;  %v2311_v43 = vrot.slane %v2310_v34, 2  ;;  %v2567_v44 = vadd.f32 %v2566_v35, %v2524_v23  ;;  %v8461_v29 = vld [vmem:[#allocation8 + $0x124] ss:$8 sps:$4 sm:$0xff]  }
 0x156   :  { %v2305_v45 = vrot.slane %v2304_v36, 2  ;;  %v2561_v46 = vadd.f32 %v2560_v37, %v2523_v25  ;;  %2228 = vmatpush1.bf16.msra.mxu0 %v7885_v8  ;;  %v2317_v51 = vrot.slane %v2316_v41, 2  ;;  %v2573_v52 = vadd.f32 %v2572_v42, %v2525_v31  ;;  %2269 = vmatpush1.bf16.msra.mxu1 %v7887_v10  ;;  %v8453_v25 = vld [vmem:[#allocation8 + $0x110] ss:$8 sps:$4 sm:$0xff]  }
 0x157   :  { %v2300_v49 = vadd.f32 %v2299_v39, %v2298_v28  ;;  %v2556_v50 = vrot.slane %v2555_v40, 2  ;;  %2229 = vmatprep.subr.bf16.mxu0 %v7918_v15  ;;  %v2312_v53 = vadd.f32 %v2311_v43, %v2310_v34  ;;  %v2568_v0 = vrot.slane %v2567_v44, 2  ;;  %2270 = vmatprep.subr.bf16.mxu1 %v7920_v21 }
 0x158   :  { %v2306_v54 = vadd.f32 %v2305_v45, %v2304_v36  ;;  %v2562_v55 = vrot.slane %v2561_v46, 2  ;;  %v2318_v58 = vadd.f32 %v2317_v51, %v2316_v41  ;;  %v2574_v59 = vrot.slane %v2573_v52, 2  ;;  %v8459_v41 = vld [vmem:[#allocation8 + $0x120] ss:$8 sps:$4 sm:$0xff]   ;;  %v8467_v45 = vld [vmem:[#allocation8 + $0x134] ss:$8 sps:$4 sm:$0xff]  }
 0x159   :  { %v2301_v56 = vrot.slane %v2300_v49, 1  ;;  %v2557_v57 = vadd.f32 %v2556_v50, %v2555_v40  ;;  %v2313_v62 = vrot.slane %v2312_v53, 1  ;;  %v2569_v63 = vadd.f32 %v2568_v0, %v2567_v44  ;;  %v8456_v40 = vld [vmem:[#allocation8 + $0x20] ss:$8 sps:$4 sm:$0xff]   ;;  %v8464_v44 = vld [vmem:[#allocation8 + $0x34] ss:$8 sps:$4 sm:$0xff]  }
 0x15a   :  { %v2307_v1 = vrot.slane %v2306_v54, 1  ;;  %v2563_v2 = vadd.f32 %v2562_v55, %v2561_v46  ;;  %2230 = vmatpush1.bf16.msra.mxu0 %v7917_v14  ;;  %v2319_v9 = vrot.slane %v2318_v58, 1  ;;  %v2575_v10 = vadd.f32 %v2574_v59, %v2573_v52  ;;  %2271 = vmatpush1.bf16.msra.mxu1 %v7919_v16  ;;  %v8458_v16 = vld [vmem:[#allocation8 + $0x24] ss:$8 sps:$4 sm:$0xff]   ;;  %v8462_v51 = vld [vmem:[#allocation8 + $0x30] ss:$8 sps:$4 sm:$0xff]  }
 0x15b   :  { %v2302_v7 = vadd.f32 %v2301_v56, %v2300_v49  ;;  %v2558_v8 = vrot.slane %v2557_v57, 1  ;;  %6953 = vmatprep.subr.bf16.mxu0 %v8446_v47  ;;  %v2314_v13 = vadd.f32 %v2313_v62, %v2312_v53  ;;  %v2570_v15 = vrot.slane %v2569_v63, 1  ;;  %6994 = vmatprep.subr.bf16.mxu1 %v8449_v48  ;;  %v8465_v52 = vld [vmem:[#allocation8 + $0x130] ss:$8 sps:$4 sm:$0xff]   ;;  %v8470_v53 = vld [vmem:[#allocation8 + $0x44] ss:$8 sps:$4 sm:$0xff]  }
 0x15c   :  { %v2308_v17 = vadd.f32 %v2307_v1, %v2306_v54  ;;  %v2564_v18 = vrot.slane %v2563_v2, 1  ;;  %v2320_v14 = vadd.f32 %v2319_v9, %v2318_v58  ;;  %v2576_v23 = vrot.slane %v2575_v10, 1  ;;  %v8473_v0 = vld [vmem:[#allocation8 + $0x144] ss:$8 sps:$4 sm:$0xff]   ;;  %v8471_v58 = vld [vmem:[#allocation8 + $0x140] ss:$8 sps:$4 sm:$0xff]  }
 0x15d   :  { %v9600_v21 = vmul.f32 0.125, %v2302_v7  ;;  %v2559_v22 = vadd.f32 %v2558_v8, %v2557_v57  ;;  %2248 = vmatmul.mubr.bf16.vlgmr.msra.gmra.mrb[28].mxu0 %v9519_v11  ;;  %v9603_v27 = vmul.f32 0.125, %v2314_v13  ;;  %v2571_v28 = vadd.f32 %v2570_v15, %v2569_v63  ;;  %2289 = vmatmul.mubr.bf16.vlgmr.msra.gmra.mrb[28].mxu1 %v9519_v11  ;;  %v8468_v57 = vld [vmem:[#allocation8 + $0x40] ss:$8 sps:$4 sm:$0xff]   ;;  %v8476_v59 = vld [vmem:[#allocation8 + $0x54] ss:$8 sps:$4 sm:$0xff]  }
 0x15e   :  { %v9605_v3 = vmul.f32 0.125, %v2308_v17  ;;  %v2565_v4 = vadd.f32 %v2564_v18, %v2563_v2  ;;  %6954 = vmatpush1.bf16.msra.mxu0 %v8444_v60  ;;  %v9610_v32 = vmul.f32 0.125, %v2320_v14  ;;  %v2577_v33 = vadd.f32 %v2576_v23, %v2575_v10  ;;  %6995 = vmatpush1.bf16.msra.mxu1 %v8447_v61  ;;  %v8479_v60 = vld [vmem:[#allocation8 + $0x154] ss:$8 sps:$4 sm:$0xff]   ;;  %v8474_v63 = vld [vmem:[#allocation8 + $0x50] ss:$8 sps:$4 sm:$0xff]  }
 0x15f   :  { %v2746_v30 = vmul.f32 0.125, %v2559_v22  ;;  %v2778_v31 = vmul.f32 %v9600_v21, %v9600_v21  ;;  %6955 = vmatprep.subr.bf16.mxu0 %v8452_v5  ;;  %v2748_v34 = vmul.f32 0.125, %v2571_v28  ;;  %v2780_v35 = vmul.f32 %v9603_v27, %v9603_v27  ;;  %6996 = vmatprep.subr.bf16.mxu1 %v8455_v6  ;;  %v8477_v1 = vld [vmem:[#allocation8 + $0x150] ss:$8 sps:$4 sm:$0xff]   ;;  %v8482_v5 = vld [vmem:[#allocation8 + $0x64] ss:$8 sps:$4 sm:$0xff]  }
 0x160   :  { %v2747_v36 = vmul.f32 0.125, %v2565_v4  ;;  %v2779_v11 = vmul.f32 %v9605_v3, %v9605_v3  ;;  %v2749_v38 = vmul.f32 0.125, %v2577_v33  ;;  %v2781_v39 = vmul.f32 %v9610_v32, %v9610_v32  ;;  %v8485_v6 = vld [vmem:[#allocation8 + $0x164] ss:$8 sps:$4 sm:$0xff]   ;;  %v8480_v22 = vld [vmem:[#allocation8 + $0x60] ss:$8 sps:$4 sm:$0xff]  }
 0x161   :  { %v2810_v37 = vsub.f32 %v2746_v30, %v2778_v31  ;;  %v2812_v42 = vsub.f32 %v2748_v34, %v2780_v35  ;;  %v9425_v54 = vmov 1966171168   ;;  %v2960_v56 = vlaneseq }
 0x162   :  { %v2811_v43 = vsub.f32 %v2747_v36, %v2779_v11  ;;  %6956 = vmatpush1.bf16.msra.mxu0 %v8450_v24  ;;  %v2813_v47 = vsub.f32 %v2749_v38, %v2781_v39  ;;  %6997 = vmatpush1.bf16.msra.mxu1 %v8453_v25  ;;  %v2958_v55 = vunpack.c.l.s4 %v9425_v54  ;;  %v8488_v11 = vld [vmem:[#allocation8 + $0x74] ss:$8 sps:$4 sm:$0xff]  }
 0x163   :  { %v2857_v46 = vadd.f32 1e-05, %v2810_v37  ;;  %6957 = vmatprep.subr.bf16.mxu0 %v8458_v16  ;;  %v2859_v48 = vadd.f32 1e-05, %v2812_v42  ;;  %6998 = vmatprep.subr.bf16.mxu1 %v8461_v29  ;;  %v9618_v62 = vshrl.u32 %v2960_v56, 7 }
 0x164   :  { %v2858_v49 = vadd.f32 1e-05, %v2811_v43  ;;  %v2860_v50 = vadd.f32 1e-05, %v2813_v47  ;;  %v2959_v61 = vunpack.c.0.s8 %v2958_v55  ;;  %v8483_v29 = vld [vmem:[#allocation8 + $0x160] ss:$8 sps:$4 sm:$0xff]  }
 0x165   :  { %9212 = vrsqrt.f32 %v2857_v46  ;;  %v8491_v42 = vld [vmem:[#allocation8 + $0x174] ss:$8 sps:$4 sm:$0xff]   ;;  %v8486_v47 = vld [vmem:[#allocation8 + $0x70] ss:$8 sps:$4 sm:$0xff]  }
 0x166   :  { %9214 = vrsqrt.f32 %v2859_v48  ;;  %6958 = vmatpush1.bf16.msra.mxu0 %v8456_v40  ;;  %6999 = vmatpush1.bf16.msra.mxu1 %v8459_v41  ;;  %v9621_v8 = vsub.s32 %v2959_v61, %v9618_v62  ;;  %v8489_v48 = vld [vmem:[#allocation8 + $0x170] ss:$8 sps:$4 sm:$0xff]  }
 0x167   :  { %9216 = vrsqrt.f32 %v2858_v49  ;;  %6959 = vmatprep.subr.bf16.mxu0 %v8464_v44  ;;  %7000 = vmatprep.subr.bf16.mxu1 %v8467_v45 }
 0x168   :  { %9218 = vrsqrt.f32 %v2860_v50 }
 0x16a   :  { %6960 = vmatpush1.bf16.msra.mxu0 %v8462_v51  ;;  %7001 = vmatpush1.bf16.msra.mxu1 %v8465_v52 }
 0x16b   :  { %6961 = vmatprep.subr.bf16.mxu0 %v8470_v53  ;;  %7002 = vmatprep.subr.bf16.mxu1 %v8473_v0  ;;  %v8494_v53 = vld [vmem:[#allocation8 + $0x84] ss:$8 sps:$4 sm:$0xff]  }
 0x16e   :  { %6962 = vmatpush1.bf16.msra.mxu0 %v8468_v57  ;;  %7003 = vmatpush1.bf16.msra.mxu1 %v8471_v58  ;;  %v8497_v57 = vld [vmem:[#allocation8 + $0x184] ss:$8 sps:$4 sm:$0xff]  }
 0x16f   :  { %v9213_v2 = vpop.eup %9212  ;;  %6963 = vmatprep.subr.bf16.mxu0 %v8476_v59  ;;  %7004 = vmatprep.subr.bf16.mxu1 %v8479_v60 }
 0x170   :  { %v9215_v7 = vpop.eup %9214  ;;  %v9623_v9 = vpop.f32.mrb[4].mxu0 }
 0x171   :  { %v9217_v10 = vpop.eup %9216  ;;  %v2321_v13 = vrot.slane %v9623_v9, 4  ;;  %v2526_v15 = vmul.f32 %v9623_v9, %v9623_v9  ;;  %v9628_v17 = vpop.f32.mrb[4].mxu1 }
 0x172   :  { %v9630_v18 = vpop.f32.mrb[5].mxu0  ;;  %v9219_v14 = vpop.eup %9218  ;;  %v2953_v23 = vcombine.low %v9213_v2, %v9217_v10  ;;  %v2333_v24 = vrot.slane %v9628_v17, 4  ;;  %v2528_v25 = vmul.f32 %v9628_v17, %v9628_v17  ;;  %6964 = vmatpush1.bf16.msra.mxu0 %v8474_v63  ;;  %7005 = vmatpush1.bf16.msra.mxu1 %v8477_v1 }
 0x173   :  { %v2327_v28 = vrot.slane %v9630_v18, 4  ;;  %v9636_v4 = vpop.f32.mrb[5].mxu1  ;;  %v1761_v16 = vpop.f32.mrb[6].mxu0  ;;  %v2954_v30 = vcombine.low %v9215_v7, %v9219_v14  ;;  %v2322_v31 = vadd.f32 %v2321_v13, %v9623_v9  ;;  %v2578_v33 = vrot.slane %v2526_v15, 4  ;;  %6965 = vmatprep.subr.bf16.mxu0 %v8482_v5  ;;  %7006 = vmatprep.subr.bf16.mxu1 %v8485_v6  ;;  %v8492_v5 = vld [vmem:[#allocation8 + $0x80] ss:$8 sps:$4 sm:$0xff]  }
 0x174   :  { %v2527_v34 = vmul.f32 %v9630_v18, %v9630_v18  ;;  %v1802_v35 = vpop.f32.mrb[6].mxu1  ;;  %v1762_v36 = vpop.f32.mrb[7].mxu0  ;;  %v9642_v37 = vrot.slane %v2953_v23, %v9621_v8  ;;  %v2334_v38 = vadd.f32 %v2333_v24, %v9628_v17  ;;  %v2590_v39 = vrot.slane %v2528_v25, 4  ;;  %v8495_v6 = vld [vmem:[#allocation8 + $0x180] ss:$8 sps:$4 sm:$0xff]  }
 0x175   :  { %v2328_v40 = vadd.f32 %v2327_v28, %v9630_v18  ;;  %v1803_v41 = vpop.f32.mrb[7].mxu1  ;;  %v9647_v43 = vrot.slane %v2954_v30, %v9621_v8  ;;  %v2323_v44 = vrot.slane %v2322_v31, 2  ;;  %v2579_v45 = vadd.f32 %v2578_v33, %v2526_v15  ;;  %v8503_v28 = vld [vmem:[#allocation8 + $0x194] ss:$8 sps:$4 sm:$0xff]  }
 0x176   :  { %v2584_v46 = vrot.slane %v2527_v34, 4  ;;  %v2335_v49 = vrot.slane %v2334_v38, 2  ;;  %v2591_v50 = vadd.f32 %v2590_v39, %v2528_v25  ;;  %v2339_v52 = vrot.slane %v9636_v4, 4  ;;  %6966 = vmatpush1.bf16.msra.mxu0 %v8480_v22  ;;  %7007 = vmatpush1.bf16.msra.mxu1 %v8483_v29  ;;  %v8500_v22 = vld [vmem:[#allocation8 + $0x94] ss:$8 sps:$4 sm:$0xff]  }
 0x177   :  { %v2329_v51 = vrot.slane %v2328_v40, 2  ;;  %v2985_v0 = vcombine.low %v9642_v37, %v9647_v43  ;;  %v2324_v54 = vadd.f32 %v2323_v44, %v2322_v31  ;;  %v2580_v55 = vrot.slane %v2579_v45, 2  ;;  %6967 = vmatprep.subr.bf16.mxu0 %v8488_v11  ;;  %7008 = vmatprep.subr.bf16.mxu1 %v8491_v42  ;;  %v8498_v11 = vld [vmem:[#allocation8 + $0x90] ss:$8 sps:$4 sm:$0xff]  }
 0x178   :  { %v2585_v56 = vadd.f32 %v2584_v46, %v2527_v34  ;;  %v2336_v58 = vadd.f32 %v2335_v49, %v2334_v38  ;;  %v2592_v59 = vrot.slane %v2591_v50, 2  ;;  %v2340_v61 = vadd.f32 %v2339_v52, %v9636_v4  ;;  %v8501_v42 = vld [vmem:[#allocation8 + $0x190] ss:$8 sps:$4 sm:$0xff]   ;;  %v8509_v49 = vld [vmem:[#allocation8 + $0x1a4] ss:$8 sps:$4 sm:$0xff]  }
 0x179   :  { %v2330_v60 = vadd.f32 %v2329_v51, %v2328_v40  ;;  %v2325_v63 = vrot.slane %v2324_v54, 1  ;;  %v2581_v1 = vadd.f32 %v2580_v55, %v2579_v45  ;;  %v2529_v25 = vmul.f32 %v9636_v4, %v9636_v4 }
 0x17a   :  { %v2586_v2 = vrot.slane %v2585_v56, 2  ;;  %v2337_v7 = vrot.slane %v2336_v58, 1  ;;  %v2593_v10 = vadd.f32 %v2592_v59, %v2591_v50  ;;  %v2341_v15 = vrot.slane %v2340_v61, 2  ;;  %6968 = vmatpush1.bf16.msra.mxu0 %v8486_v47  ;;  %7009 = vmatpush1.bf16.msra.mxu1 %v8489_v48  ;;  %v8506_v48 = vld [vmem:[#allocation8 + $0xa4] ss:$8 sps:$4 sm:$0xff]  }
 0x17b   :  { %v2331_v13 = vrot.slane %v2330_v60, 1  ;;  %v2326_v14 = vadd.f32 %v2325_v63, %v2324_v54  ;;  %v2582_v23 = vrot.slane %v2581_v1, 1  ;;  %6969 = vmatprep.subr.bf16.mxu0 %v8494_v53  ;;  %7010 = vmatprep.subr.bf16.mxu1 %v8497_v57  ;;  %v2596_v36 = vrot.slane %v2529_v25, 4  ;;  %v8504_v53 = vld [vmem:[#allocation8 + $0xa0] ss:$8 sps:$4 sm:$0xff]  }
 0x17c   :  { %v2587_v24 = vadd.f32 %v2586_v2, %v2585_v56  ;;  %v2338_v16 = vadd.f32 %v2337_v7, %v2336_v58  ;;  %v2594_v29 = vrot.slane %v2593_v10, 1  ;;  %v2342_v31 = vadd.f32 %v2341_v15, %v2340_v61  ;;  %v8507_v58 = vld [vmem:[#allocation8 + $0x1a0] ss:$8 sps:$4 sm:$0xff]   ;;  %v8512_v59 = vld [vmem:[#allocation8 + $0xb4] ss:$8 sps:$4 sm:$0xff]  }
 0x17d   :  { %v2332_v30 = vadd.f32 %v2331_v13, %v2330_v60  ;;  %v9655_v33 = vmul.f32 0.125, %v2326_v14  ;;  %v2583_v34 = vadd.f32 %v2582_v23, %v2581_v1  ;;  %v2597_v47 = vadd.f32 %v2596_v36, %v2529_v25  ;;  %v8515_v2 = vld [vmem:[#allocation8 + $0x1b4] ss:$8 sps:$4 sm:$0xff]   ;;  %v8513_v13 = vld [vmem:[#allocation8 + $0x1b0] ss:$8 sps:$4 sm:$0xff]  }
 0x17e   :  { %v2588_v35 = vrot.slane %v2587_v24, 1  ;;  %v9657_v38 = vmul.f32 0.125, %v2338_v16  ;;  %v2595_v39 = vadd.f32 %v2594_v29, %v2593_v10  ;;  %v2343_v41 = vrot.slane %v2342_v31, 1  ;;  %6970 = vmatpush1.bf16.msra.mxu0 %v8492_v5  ;;  %7011 = vmatpush1.bf16.msra.mxu1 %v8495_v6  ;;  %v8510_v10 = vld [vmem:[#allocation8 + $0xb0] ss:$8 sps:$4 sm:$0xff]  }
 0x17f   :  { %v9659_v40 = vmul.f32 0.125, %v2332_v30  ;;  %v2750_v44 = vmul.f32 0.125, %v2583_v34  ;;  %v2782_v45 = vmul.f32 %v9655_v33, %v9655_v33  ;;  %6971 = vmatprep.subr.bf16.mxu0 %v8500_v22  ;;  %7012 = vmatprep.subr.bf16.mxu1 %v8503_v28  ;;  %v2598_v57 = vrot.slane %v2597_v47, 2  ;;  %v8518_v15 = vld [vmem:[#allocation8 + $0xc4] ss:$8 sps:$4 sm:$0xff]  }
 0x180   :  { %v2589_v46 = vadd.f32 %v2588_v35, %v2587_v24  ;;  %v2752_v50 = vmul.f32 0.125, %v2595_v39  ;;  %v2344_v52 = vadd.f32 %v2343_v41, %v2342_v31  ;;  %v2784_v55 = vmul.f32 %v9657_v38, %v9657_v38  ;;  %v8521_v22 = vld [vmem:[#allocation8 + $0x1c4] ss:$8 sps:$4 sm:$0xff]   ;;  %v8516_v24 = vld [vmem:[#allocation8 + $0xc0] ss:$8 sps:$4 sm:$0xff]  }
 0x181   :  { %v2783_v51 = vmul.f32 %v9659_v40, %v9659_v40  ;;  %v2814_v54 = vsub.f32 %v2750_v44, %v2782_v45  ;;  %v2599_v1 = vadd.f32 %v2598_v57, %v2597_v47  ;;  %v8519_v16 = vld [vmem:[#allocation8 + $0x1c0] ss:$8 sps:$4 sm:$0xff]   ;;  %v8524_v29 = vld [vmem:[#allocation8 + $0xd4] ss:$8 sps:$4 sm:$0xff]   ;;  %v8522_v35 = vld [vmem:[#allocation8 + $0xd0] ss:$8 sps:$4 sm:$0xff]  }
 0x182   :  { %v2751_v56 = vmul.f32 0.125, %v2589_v46  ;;  %6972 = vmatpush1.bf16.msra.mxu0 %v8498_v11  ;;  %v9667_v63 = vmul.f32 0.125, %v2344_v52  ;;  %7013 = vmatpush1.bf16.msra.mxu1 %v8501_v42  ;;  %v2816_v5 = vsub.f32 %v2752_v50, %v2784_v55  ;;  %v8527_v30 = vld [vmem:[#allocation8 + $0x1d4] ss:$8 sps:$4 sm:$0xff]   ;;  %v8525_v11 = vld [vmem:[#allocation8 + $0x1d0] ss:$8 sps:$4 sm:$0xff]  }
 0x183   :  { %v2861_v60 = vadd.f32 1e-05, %v2814_v54  ;;  %6973 = vmatprep.subr.bf16.mxu0 %v8506_v48  ;;  %7014 = vmatprep.subr.bf16.mxu1 %v8509_v49  ;;  %v2600_v7 = vrot.slane %v2599_v1, 1  ;;  %v8530_v39 = vld [vmem:[#allocation8 + $0xe4] ss:$8 sps:$4 sm:$0xff]   ;;  %v9672_v41 = vsub.s32 4, %v9618_v62 }
 0x184   :  { %v2815_v61 = vsub.f32 %v2751_v56, %v2783_v51  ;;  %v2785_v23 = vmul.f32 %v9667_v63, %v9667_v63  ;;  %v2863_v25 = vadd.f32 1e-05, %v2816_v5  ;;  %v9675_v42 = vsub.s32 5, %v9618_v62  ;;  %v8533_v45 = vld [vmem:[#allocation8 + $0x1e4] ss:$8 sps:$4 sm:$0xff]  }
 0x185   :  { %9220 = vrsqrt.f32 %v2861_v60  ;;  %v2601_v14 = vadd.f32 %v2600_v7, %v2599_v1  ;;  %v9680_v47 = vsub.s32 6, %v9618_v62  ;;  %v8528_v52 = vld [vmem:[#allocation8 + $0xe0] ss:$8 sps:$4 sm:$0xff]   ;;  %v8536_v7 = vld [vmem:[#allocation8 + $0xf4] ss:$8 sps:$4 sm:$0xff]  }
 0x186   :  { %v2862_v6 = vadd.f32 1e-05, %v2815_v61  ;;  %6974 = vmatpush1.bf16.msra.mxu0 %v8504_v53  ;;  %7015 = vmatpush1.bf16.msra.mxu1 %v8507_v58 }
 0x187   :  { %6975 = vmatprep.subr.bf16.mxu0 %v8512_v59  ;;  %7016 = vmatprep.subr.bf16.mxu1 %v8515_v2  ;;  %v2753_v28 = vmul.f32 0.125, %v2601_v14  ;;  %v8531_v59 = vld [vmem:[#allocation8 + $0x1e0] ss:$8 sps:$4 sm:$0xff]  }
 0x188   :  { %9222 = vrsqrt.f32 %v2862_v6 }
 0x189   :  { %v2817_v31 = vsub.f32 %v2753_v28, %v2785_v23  ;;  %9224 = vrsqrt.f32 %v2863_v25  ;;  %v8539_v23 = vld [vmem:[#allocation8 + $0x1f4] ss:$8 sps:$4 sm:$0xff]  }
 0x18a   :  { %6976 = vmatpush1.bf16.msra.mxu0 %v8510_v10  ;;  %7017 = vmatpush1.bf16.msra.mxu1 %v8513_v13 }
 0x18b   :  { %6977 = vmatprep.subr.bf16.mxu0 %v8518_v15  ;;  %7018 = vmatprep.subr.bf16.mxu1 %v8521_v22  ;;  %v2864_v34 = vadd.f32 1e-05, %v2817_v31 }
 0x18d   :  { %9226 = vrsqrt.f32 %v2864_v34 }
 0x18e   :  { %6978 = vmatpush1.bf16.msra.mxu0 %v8516_v24  ;;  %7019 = vmatpush1.bf16.msra.mxu1 %v8519_v16 }
 0x18f   :  { %v9221_v36 = vpop.eup %9220  ;;  %6979 = vmatprep.subr.bf16.mxu0 %v8524_v29  ;;  %7020 = vmatprep.subr.bf16.mxu1 %v8527_v30 }
 0x190   :  { %v9677_v44 = vpop.f32.mrb[8].mxu0  ;;  %v9685_v50 = vpop.f32.mrb[8].mxu1 }
 0x191   :  { %v2345_v48 = vrot.slane %v9677_v44, 4  ;;  %v2530_v49 = vmul.f32 %v9677_v44, %v9677_v44  ;;  %v9687_v51 = vpop.f32.mrb[9].mxu0  ;;  %v2357_v54 = vrot.slane %v9685_v50, 4  ;;  %v2532_v55 = vmul.f32 %v9685_v50, %v9685_v50  ;;  %v9693_v57 = vpop.f32.mrb[9].mxu1 }
 0x192   :  { %v9223_v46 = vpop.eup %9222  ;;  %v2351_v56 = vrot.slane %v9687_v51, 4  ;;  %v1843_v58 = vpop.f32.mrb[10].mxu0  ;;  %6980 = vmatpush1.bf16.msra.mxu0 %v8522_v35  ;;  %v2531_v1 = vmul.f32 %v9687_v51, %v9687_v51  ;;  %v2363_v2 = vrot.slane %v9693_v57, 4  ;;  %7021 = vmatpush1.bf16.msra.mxu1 %v8525_v11  ;;  %v2533_v34 = vmul.f32 %v9693_v57, %v9693_v57  ;;  %v8534_v35 = vld [vmem:[#allocation8 + $0xf0] ss:$8 sps:$4 sm:$0xff]  }
 0x193   :  { %v2955_v53 = vcombine.low %v9221_v36, %v9223_v46  ;;  %v2346_v60 = vadd.f32 %v2345_v48, %v9677_v44  ;;  %v2602_v61 = vrot.slane %v2530_v49, 4  ;;  %v1844_v5 = vpop.f32.mrb[11].mxu0  ;;  %v1884_v6 = vpop.f32.mrb[10].mxu1  ;;  %6981 = vmatprep.subr.bf16.mxu0 %v8530_v39  ;;  %v2358_v13 = vadd.f32 %v2357_v54, %v9685_v50  ;;  %7022 = vmatprep.subr.bf16.mxu1 %v8533_v45  ;;  %v8537_v45 = vld [vmem:[#allocation8 + $0x1f0] ss:$8 sps:$4 sm:$0xff]  }
 0x194   :  { %v2614_v15 = vrot.slane %v2532_v55, 4  ;;  %v2352_v22 = vadd.f32 %v2351_v56, %v9687_v51  ;;  %v1885_v14 = vpop.f32.mrb[11].mxu1  ;;  %v2608_v28 = vrot.slane %v2531_v1, 4  ;;  %v2364_v16 = vadd.f32 %v2363_v2, %v9693_v57  ;;  %v9225_v36 = vpop.eup %9224 }
 0x195   :  { %v9700_v10 = vrot.slane %v2955_v53, %v9621_v8  ;;  %v2347_v24 = vrot.slane %v2346_v60, 2  ;;  %v2603_v25 = vadd.f32 %v2602_v61, %v2530_v49  ;;  %v2359_v29 = vrot.slane %v2358_v13, 2  ;;  %v8542_v49 = vld [vmem:[#allocation8 + $0x204] ss:$8 sps:$4 sm:$0xff]  }
 0x196   :  { %v2615_v30 = vadd.f32 %v2614_v15, %v2532_v55  ;;  %v2353_v31 = vrot.slane %v2352_v22, 2  ;;  %6982 = vmatpush1.bf16.msra.mxu0 %v8528_v52  ;;  %v2609_v46 = vadd.f32 %v2608_v28, %v2531_v1  ;;  %v2365_v48 = vrot.slane %v2364_v16, 2  ;;  %7023 = vmatpush1.bf16.msra.mxu1 %v8531_v59  ;;  %v8545_v55 = vld [vmem:[#allocation8 + $0x304] ss:$8 sps:$4 sm:$0xff]  }
 0x197   :  { %v2348_v11 = vadd.f32 %v2347_v24, %v2346_v60  ;;  %v2604_v39 = vrot.slane %v2603_v25, 2  ;;  %6983 = vmatprep.subr.bf16.mxu0 %v8536_v7  ;;  %v2360_v53 = vadd.f32 %v2359_v29, %v2358_v13  ;;  %v2620_v58 = vrot.slane %v2533_v34, 4  ;;  %7024 = vmatprep.subr.bf16.mxu1 %v8539_v23  ;;  %v9227_v61 = vpop.eup %9226 }
 0x198   :  { %v2616_v54 = vrot.slane %v2615_v30, 2  ;;  %v2354_v56 = vadd.f32 %v2353_v31, %v2352_v22  ;;  %v2610_v52 = vrot.slane %v2609_v46, 2  ;;  %v2366_v6 = vadd.f32 %v2365_v48, %v2364_v16 }
 0x199   :  { %v2349_v2 = vrot.slane %v2348_v11, 1  ;;  %v2605_v5 = vadd.f32 %v2604_v39, %v2603_v25  ;;  %v2956_v15 = vcombine.low %v9225_v36, %v9227_v61  ;;  %v2361_v60 = vrot.slane %v2360_v53, 1 }
 0x19a   :  { %v2617_v14 = vadd.f32 %v2616_v54, %v2615_v30  ;;  %v2355_v1 = vrot.slane %v2354_v56, 1  ;;  %6984 = vmatpush1.bf16.msra.mxu0 %v8534_v35  ;;  %v2611_v24 = vadd.f32 %v2610_v52, %v2609_v46  ;;  %v2367_v28 = vrot.slane %v2366_v6, 1  ;;  %7025 = vmatpush1.bf16.msra.mxu1 %v8537_v45 }
 0x19b   :  { %v2350_v59 = vadd.f32 %v2349_v2, %v2348_v11  ;;  %v2606_v7 = vrot.slane %v2605_v5, 1  ;;  %7035 = vmatprep.subr.bf16.mxu0 %v8542_v49  ;;  %v2984_v13 = vrot.slane %v2956_v15, %v9621_v8  ;;  %v2362_v22 = vadd.f32 %v2361_v60, %v2360_v53  ;;  %7076 = vmatprep.subr.bf16.mxu1 %v8545_v55  ;;  %v2842_v55 = vld [vmem:[#allocation7] ss:$2 sm:$0xff] }
 0x19c   :  { %v2618_v23 = vrot.slane %v2617_v14, 1  ;;  %v2356_v29 = vadd.f32 %v2355_v1, %v2354_v56  ;;  %v2612_v31 = vrot.slane %v2611_v24, 1  ;;  %v2368_v36 = vadd.f32 %v2367_v28, %v2366_v6 }
 0x19d   :  { %v9708_v25 = vmul.f32 0.125, %v2350_v59  ;;  %v2607_v16 = vadd.f32 %v2606_v7, %v2605_v5  ;;  %v2986_v30 = vcombine.low %v9700_v10, %v2984_v13  ;;  %v9711_v35 = vmul.f32 0.125, %v2362_v22 }
 0x19e   :  { %v2619_v11 = vadd.f32 %v2618_v23, %v2617_v14  ;;  %v9713_v39 = vmul.f32 0.125, %v2356_v29  ;;  %v2993_v46 = vrot.slane %v2985_v0, %v9621_v8  ;;  %v2613_v49 = vadd.f32 %v2612_v31, %v2611_v24 }
 0x19f   :  { %v2754_v48 = vmul.f32 0.125, %v2607_v16  ;;  %v2786_v45 = vmul.f32 %v9708_v25, %v9708_v25  ;;  %v3000_v53 = vrot.slane %v2986_v30, %v9621_v8  ;;  %v2788_v10 = vmul.f32 %v9711_v35, %v9711_v35 }
 0x1a0   :  { %v2756_v54 = vmul.f32 0.125, %v2619_v11  ;;  %v2787_v56 = vmul.f32 %v9713_v39, %v9713_v39  ;;  %v2755_v2 = vmul.f32 0.125, %v2613_v49  ;;  %v9726_v5 = vmul.f32 0.125, %v2368_v36 }
 0x1a1   :  { %v2818_v61 = vsub.f32 %v2754_v48, %v2786_v45  ;;  %v2621_v37 = vadd.f32 %v2620_v58, %v2533_v34  ;;  %v3001_v43 = vcombine.low %v2993_v46, %v3000_v53  ;;  %v9729_v0 = vsub.s32 7, %v9618_v62 }
 0x1a2   :  { %v2820_v52 = vsub.f32 %v2756_v54, %v2788_v10  ;;  %v9732_v6 = vsub.s32 0, %v9618_v62  ;;  %v2819_v60 = vsub.f32 %v2755_v2, %v2787_v56  ;;  %v9735_v1 = vsub.s32 1, %v9618_v62 }
 0x1a3   :  { %v2865_v15 = vadd.f32 1e-05, %v2818_v61  ;;  %v2622_v14 = vrot.slane %v2621_v37, 2  ;;  %v3153_v59 = vmul.f32 %v3001_v43, %v2842_v55  ;;  %v9738_v7 = vsub.s32 2, %v9618_v62 }
 0x1a4   :  { %v9741_v34 = vsub.s32 3, %v9618_v62  ;;  %v2867_v58 = vadd.f32 1e-05, %v2820_v52  ;;  %v2866_v24 = vadd.f32 1e-05, %v2819_v60  ;;  %v2789_v13 = vmul.f32 %v9726_v5, %v9726_v5 }
 0x1a5   :  { %v2623_v28 = vadd.f32 %v2622_v14, %v2621_v37  ;;  %v3180_v22 = vrot.slane %v3153_v59, %v9672_v41  ;;  %v3184_v23 = vrot.slane %v3153_v59, %v9675_v42  ;;  %v3188_v29 = vrot.slane %v3153_v59, %v9680_v47 }
 0x1a6   :  { %v3192_v16 = vrot.slane %v3153_v59, %v9729_v0  ;;  %9228 = vrsqrt.f32 %v2865_v15  ;;  %v3164_v36 = vrot.slane %v3153_v59, %v9732_v6  ;;  %v3168_v62 = vrot.slane %v3153_v59, %v9735_v1 }
 0x1a7   :  { %v2624_v31 = vrot.slane %v2623_v28, 1  ;;  %v3325_v30 = vmul.f32 %v3180_v22, %v9655_v33  ;;  %v3326_v11 = vmul.f32 %v3184_v23, %v9659_v40  ;;  %v3327_v46 = vmul.f32 %v3188_v29, %v9657_v38 }
 0x1a8   :  { %v3328_v48 = vmul.f32 %v3192_v16, %v9667_v63  ;;  %v9756_v45 = vmul.f32 %v3192_v16, %v9636_v4  ;;  %9230 = vrsqrt.f32 %v2866_v24  ;;  %v3172_v53 = vrot.slane %v3153_v59, %v9738_v7 }
 0x1a9   :  { %v2625_v49 = vadd.f32 %v2624_v31, %v2623_v28  ;;  %v3387_v54 = vcombine.low %v3325_v30, %v3326_v11  ;;  %v3176_v56 = vrot.slane %v3153_v59, %v9741_v34  ;;  %v3321_v55 = vmul.f32 %v3164_v36, %v9600_v21 }
 0x1aa   :  { %v3388_v10 = vcombine.low %v3327_v46, %v3328_v48  ;;  %v3322_v40 = vmul.f32 %v3168_v62, %v9605_v3  ;;  %v3323_v38 = vmul.f32 %v3172_v53, %v9603_v27  ;;  %v9764_v63 = vmul.f32 %v3168_v62, %v9578_v20 }
 0x1ab   :  { %v2757_v33 = vmul.f32 0.125, %v2625_v49  ;;  %v9767_v4 = vrot.slane %v3387_v54, %v9621_v8  ;;  %v3324_v2 = vmul.f32 %v3176_v56, %v9610_v32  ;;  %v9774_v37 = vmul.f32 %v3176_v56, %v9588_v26 }
 0x1ac   :  { %v9770_v61 = vrot.slane %v3388_v10, %v9621_v8  ;;  %v3385_v43 = vcombine.low %v3321_v55, %v3322_v40  ;;  %v9777_v3 = vmul.f32 %v3164_v36, %v9563_v12  ;;  %v9780_v27 = vmul.f32 %v3172_v53, %v9576_v19 }
 0x1ad   :  { %v2821_v21 = vsub.f32 %v2757_v33, %v2789_v13  ;;  %v3386_v52 = vcombine.low %v3323_v38, %v3324_v2  ;;  %v9785_v15 = vmul.f32 %v3184_v23, %v9630_v18  ;;  %v9788_v32 = vmul.f32 %v3180_v22, %v9623_v9 }
 0x1ae   :  { %9232 = vrsqrt.f32 %v2867_v58  ;;  %v9791_v60 = vmul.f32 %v3188_v29, %v9628_v17  ;;  %v9803_v9 = vrot.slane %v3385_v43, %v9621_v8 }
 0x1af   :  { %v2868_v26 = vadd.f32 1e-05, %v2821_v21  ;;  %v3402_v21 = vrot.slane %v3386_v52, %v9621_v8 }
 0x1b0   :  { %v9793_v12 = vpop.f32.mrb[12].mxu0  ;;  %v9229_v14 = vpop.eup %9228 }
 0x1b1   :  { %9234 = vrsqrt.f32 %v2868_v26  ;;  %v2369_v19 = vrot.slane %v9793_v12, 4  ;;  %v2534_v59 = vmul.f32 %v9793_v12, %v9793_v12  ;;  %v9798_v24 = vpop.f32.mrb[12].mxu1  ;;  %v9800_v18 = vpop.f32.mrb[13].mxu0 }
 0x1b2   :  { %10438 = vst [vmem:[#allocation16_spill] sm:$0xff] %v9798_v24  ;;  %v2381_v58 = vrot.slane %v9798_v24, 4  ;;  %v2536_v17 = vmul.f32 %v9798_v24, %v9798_v24  ;;  %v2375_v28 = vrot.slane %v9800_v18, 4  ;;  %v2535_v13 = vmul.f32 %v9800_v18, %v9800_v18  ;;  %v9811_v22 = vpop.f32.mrb[13].mxu1  ;;  %v1925_v23 = vpop.f32.mrb[14].mxu0 }
 0x1b3   :  { %v9231_v29 = vpop.eup %9230  ;;  %v2370_v16 = vadd.f32 %v2369_v19, %v9793_v12  ;;  %v2626_v31 = vrot.slane %v2534_v59, 4  ;;  %v2387_v36 = vrot.slane %v9811_v22, 4  ;;  %v2537_v62 = vmul.f32 %v9811_v22, %v9811_v22  ;;  %v1926_v30 = vpop.f32.mrb[15].mxu0 }
 0x1b4   :  { %v1966_v11 = vpop.f32.mrb[14].mxu1  ;;  %v3002_v46 = vcombine.low %v9229_v14, %v9231_v29  ;;  %v2382_v48 = vadd.f32 %v2381_v58, %v9798_v24  ;;  %v2638_v49 = vrot.slane %v2536_v17, 4  ;;  %v2376_v53 = vadd.f32 %v2375_v28, %v9800_v18 }
 0x1b5   :  { %v1967_v54 = vpop.f32.mrb[15].mxu1  ;;  %v2371_v10 = vrot.slane %v2370_v16, 2  ;;  %v2627_v56 = vadd.f32 %v2626_v31, %v2534_v59  ;;  %v2632_v55 = vrot.slane %v2535_v13, 4  ;;  %v2388_v33 = vadd.f32 %v2387_v36, %v9811_v22 }
 0x1b6   :  { %v2383_v40 = vrot.slane %v2382_v48, 2  ;;  %v2639_v38 = vadd.f32 %v2638_v49, %v2536_v17  ;;  %v2377_v2 = vrot.slane %v2376_v53, 2  ;;  %v2644_v30 = vrot.slane %v2537_v62, 4 }
 0x1b7   :  { %v2372_v43 = vadd.f32 %v2371_v10, %v2370_v16  ;;  %v2628_v26 = vrot.slane %v2627_v56, 2  ;;  %v2633_v19 = vadd.f32 %v2632_v55, %v2535_v13  ;;  %v2389_v14 = vrot.slane %v2388_v33, 2 }
 0x1b8   :  { %v2384_v23 = vadd.f32 %v2383_v40, %v2382_v48  ;;  %v2640_v58 = vrot.slane %v2639_v38, 2  ;;  %v2378_v29 = vadd.f32 %v2377_v2, %v2376_v53  ;;  %v9233_v28 = vpop.eup %9232  ;;  %v9822_v36 = vrot.slane %v3002_v46, %v9621_v8 }
 0x1b9   :  { %v2373_v11 = vrot.slane %v2372_v43, 1  ;;  %v2629_v54 = vadd.f32 %v2628_v26, %v2627_v56  ;;  %v2634_v59 = vrot.slane %v2633_v19, 2  ;;  %v2390_v31 = vadd.f32 %v2389_v14, %v2388_v33 }
 0x1ba   :  { %v2385_v17 = vrot.slane %v2384_v23, 1  ;;  %v2641_v49 = vadd.f32 %v2640_v58, %v2639_v38  ;;  %v2379_v20 = vrot.slane %v2378_v29, 1  ;;  %v2645_v33 = vadd.f32 %v2644_v30, %v2537_v62 }
 0x1bb   :  { %v9235_v52 = vpop.eup %9234  ;;  %v2374_v16 = vadd.f32 %v2373_v11, %v2372_v43  ;;  %v2630_v10 = vrot.slane %v2629_v54, 1  ;;  %v2635_v13 = vadd.f32 %v2634_v59, %v2633_v19  ;;  %v2391_v55 = vrot.slane %v2390_v31, 1 }
 0x1bc   :  { %v3003_v48 = vcombine.low %v9233_v28, %v9235_v52  ;;  %v2386_v40 = vadd.f32 %v2385_v17, %v2384_v23  ;;  %v2642_v53 = vrot.slane %v2641_v49, 1  ;;  %v2380_v2 = vadd.f32 %v2379_v20, %v2378_v29 }
 0x1bd   :  { %v9824_v24 = vmul.f32 0.125, %v2374_v16  ;;  %v2631_v56 = vadd.f32 %v2630_v10, %v2629_v54  ;;  %v2636_v26 = vrot.slane %v2635_v13, 1  ;;  %v2392_v28 = vadd.f32 %v2391_v55, %v2390_v31 }
 0x1be   :  { %v9827_v46 = vrot.slane %v3003_v48, %v9621_v8  ;;  %v9829_v14 = vmul.f32 0.125, %v2386_v40  ;;  %v2643_v38 = vadd.f32 %v2642_v53, %v2641_v49  ;;  %v9831_v58 = vmul.f32 0.125, %v2380_v2  ;;  %v2850_v48 = vld [vmem:[#allocation7 + $0x1] ss:$2 sm:$0xff] }
 0x1bf   :  { %v2758_v43 = vmul.f32 0.125, %v2631_v56  ;;  %v2790_v19 = vmul.f32 %v9824_v24, %v9824_v24  ;;  %v2637_v23 = vadd.f32 %v2636_v26, %v2635_v13  ;;  %v2646_v59 = vrot.slane %v2645_v33, 2 }
 0x1c0   :  { %v2760_v29 = vmul.f32 0.125, %v2643_v38  ;;  %v2792_v62 = vmul.f32 %v9829_v14, %v9829_v14  ;;  %v2791_v30 = vmul.f32 %v9831_v58, %v9831_v58  ;;  %v10439_v17 = vcombine.low %v9767_v4, %v9770_v61 }
 0x1c1   :  { %v2822_v11 = vsub.f32 %v2758_v43, %v2790_v19  ;;  %v2759_v54 = vmul.f32 0.125, %v2637_v23  ;;  %v3417_v31 = vcombine.low %v9803_v9, %v3402_v21  ;;  %v9846_v13 = vmul.f32 0.125, %v2392_v28 }
 0x1c2   :  { %v3432_v49 = vrot.slane %v10439_v17, %v9621_v8  ;;  %v2824_v52 = vsub.f32 %v2760_v29, %v2792_v62  ;;  %v2647_v55 = vadd.f32 %v2646_v59, %v2645_v33 }
 0x1c3   :  { %v2869_v16 = vadd.f32 1e-05, %v2822_v11  ;;  %v2823_v10 = vsub.f32 %v2759_v54, %v2791_v30  ;;  %v3425_v40 = vrot.slane %v3417_v31, %v9621_v8  ;;  %v2793_v4 = vmul.f32 %v9846_v13, %v9846_v13 }
 0x1c4   :  { %v2871_v53 = vadd.f32 1e-05, %v2824_v52  ;;  %v2648_v56 = vrot.slane %v2647_v55, 1 }
 0x1c5   :  { %9236 = vrsqrt.f32 %v2869_v16  ;;  %v2870_v2 = vadd.f32 1e-05, %v2823_v10  ;;  %v3433_v26 = vcombine.low %v3425_v40, %v3432_v49 }
 0x1c6   :  { %v2649_v38 = vadd.f32 %v2648_v56, %v2647_v55 }
 0x1c7   :  { %9238 = vrsqrt.f32 %v2870_v2  ;;  %v9851_v61 = vsub.f32 %v2850_v48, %v3433_v26  ;;  %v8540_v2 = vld [vmem:[#allocation8 + $0x200] ss:$8 sps:$4 sm:$0xff]  }
 0x1c8   :  { %9240 = vrsqrt.f32 %v2871_v53  ;;  %v2761_v9 = vmul.f32 0.125, %v2649_v38 }
 0x1c9   :  { %v3632_v21 = vrot.slane %v9851_v61, %v9735_v1  ;;  %v3640_v33 = vrot.slane %v9851_v61, %v9741_v34  ;;  %v3628_v43 = vrot.slane %v9851_v61, %v9732_v6  ;;  %v3636_v19 = vrot.slane %v9851_v61, %v9738_v7 }
 0x1ca   :  { %v2825_v23 = vsub.f32 %v2761_v9, %v2793_v4  ;;  %v3648_v28 = vrot.slane %v9851_v61, %v9675_v42  ;;  %v3656_v29 = vrot.slane %v9851_v61, %v9729_v0  ;;  %v3644_v62 = vrot.slane %v9851_v61, %v9672_v41  ;;  %v8548_v4 = vld [vmem:[#allocation8 + $0x214] ss:$8 sps:$4 sm:$0xff]  }
 0x1cb   :  { %v3786_v30 = vadd.f32 %v3632_v21, %v9764_v63  ;;  %v3788_v11 = vadd.f32 %v3640_v33, %v9774_v37  ;;  %v3785_v54 = vadd.f32 %v3628_v43, %v9777_v3  ;;  %v3787_v59 = vadd.f32 %v3636_v19, %v9780_v27  ;;  %v8543_v27 = vld [vmem:[#allocation8 + $0x300] ss:$8 sps:$4 sm:$0xff]  }
 0x1cc   :  { %v2872_v17 = vadd.f32 1e-05, %v2825_v23  ;;  %v3790_v49 = vadd.f32 %v3648_v28, %v9785_v15  ;;  %v3792_v52 = vadd.f32 %v3656_v29, %v9756_v45  ;;  %v9874_v31 = vadd.f32 %v3644_v62, %v9788_v32  ;;  %v8551_v23 = vld [vmem:[#allocation8 + $0x314] ss:$8 sps:$4 sm:$0xff]  }
 0x1cd   :  { %v3818_v16 = vmax.f32 %v3786_v30, 0.0  ;;  %v3820_v10 = vmax.f32 %v3788_v11, 0.0  ;;  %v3817_v55 = vmax.f32 %v3785_v54, 0.0  ;;  %v3819_v48 = vmax.f32 %v3787_v59, 0.0 }
 0x1ce   :  { %10440 = vst [vmem:[#allocation17_spill] sm:$0xff] %v9874_v31  ;;  %9242 = vrsqrt.f32 %v2872_v17  ;;  %v3822_v63 = vmax.f32 %v3790_v49, 0.0  ;;  %v3824_v37 = vmax.f32 %v3792_v52, 0.0 }
 0x1cf   :  { %v9237_v40 = vpop.eup %9236  ;;  %v3850_v53 = vpack.c.bf16 %v3818_v16, %v3818_v16  ;;  %v3852_v3 = vpack.c.bf16 %v3820_v10, %v3820_v10  ;;  %v3849_v56 = vpack.c.bf16 %v3817_v55, %v3817_v55  ;;  %v3851_v26 = vpack.c.bf16 %v3819_v48, %v3819_v48  ;;  %v8546_v55 = vld [vmem:[#allocation8 + $0x210] ss:$8 sps:$4 sm:$0xff]  }
 0x1d0   :  { %v9876_v15 = vpop.f32.mrb[16].mxu0  ;;  %v3854_v38 = vpack.c.bf16 %v3822_v63, %v3822_v63  ;;  %v3856_v32 = vpack.c.bf16 %v3824_v37, %v3824_v37  ;;  %v9881_v33 = vpop.f32.mrb[16].mxu1  ;;  %v8549_v48 = vld [vmem:[#allocation8 + $0x310] ss:$8 sps:$4 sm:$0xff]  }
 0x1d1   :  { %10441 = vst [vmem:[#allocation18_spill] sm:$0xff] %v9876_v15  ;;  %v9239_v45 = vpop.eup %9238  ;;  %v2393_v9 = vrot.slane %v9876_v15, 4  ;;  %v2538_v21 = vmul.f32 %v9876_v15, %v9876_v15  ;;  %10442 = vst [vmem:[#allocation19_spill] sm:$0xff] %v9881_v33  ;;  %v9883_v43 = vpop.f32.mrb[17].mxu0  ;;  %6985 = vmatprep.mubr.bf16.mxu0 %v3850_v53  ;;  %7026 = vmatprep.mubr.bf16.mxu1 %v3852_v3  ;;  %v2405_v28 = vrot.slane %v9881_v33, 4 }
 0x1d2   :  { %10443 = vst [vmem:[#allocation20_spill] sm:$0xff] %v9883_v43  ;;  %v3004_v19 = vcombine.low %v9237_v40, %v9239_v45  ;;  %v2540_v29 = vmul.f32 %v9881_v33, %v9881_v33  ;;  %v2399_v62 = vrot.slane %v9883_v43, 4  ;;  %v9889_v30 = vpop.f32.mrb[17].mxu1  ;;  %v2007_v11 = vpop.f32.mrb[18].mxu0  ;;  %6986 = vmatmul.mubr.bf16.vlgmr.msra.gmra.mrb[32].mxu0 %v3849_v56  ;;  %7027 = vmatmul.mubr.bf16.vlgmr.msra.gmra.mrb[32].mxu1 %v3851_v26  ;;  %v8554_v3 = vld [vmem:[#allocation8 + $0x224] ss:$8 sps:$4 sm:$0xff]  }
 0x1d3   :  { %10444 = vst [vmem:[#allocation21_spill] sm:$0xff] %v9889_v30  ;;  %v9241_v54 = vpop.eup %9240  ;;  %v2394_v59 = vadd.f32 %v2393_v9, %v9876_v15  ;;  %v2650_v17 = vrot.slane %v2538_v21, 4  ;;  %v2539_v49 = vmul.f32 %v9883_v43, %v9883_v43  ;;  %v2411_v52 = vrot.slane %v9889_v30, 4  ;;  %v2008_v16 = vpop.f32.mrb[19].mxu0  ;;  %7036 = vmatpush1.bf16.msra.mxu0 %v8540_v2  ;;  %7077 = vmatpush1.bf16.msra.mxu1 %v8543_v27  ;;  %v8557_v56 = vld [vmem:[#allocation8 + $0x324] ss:$8 sps:$4 sm:$0xff]  }
 0x1d4   :  { %v2048_v10 = vpop.f32.mrb[18].mxu1  ;;  %v2406_v40 = vadd.f32 %v2405_v28, %v9881_v33  ;;  %v2662_v63 = vrot.slane %v2540_v29, 4  ;;  %v2400_v37 = vadd.f32 %v2399_v62, %v9883_v43  ;;  %7067 = vmatprep.mubr.bf16.mxu0 %v3854_v38  ;;  %7108 = vmatprep.mubr.bf16.mxu1 %v3856_v32  ;;  %v3026_v2 = vrot.slane %v3004_v19, %v9621_v8  ;;  %v8552_v38 = vld [vmem:[#allocation8 + $0x220] ss:$8 sps:$4 sm:$0xff]   ;;  %v8558_v43 = vld [vmem:[#allocation8 + $0x230] ss:$8 sps:$4 sm:$0xff]  }
 0x1d5   :  { %v2049_v53 = vpop.f32.mrb[19].mxu1  ;;  %v2395_v26 = vrot.slane %v2394_v59, 2  ;;  %v2651_v45 = vadd.f32 %v2650_v17, %v2538_v21  ;;  %v2656_v9 = vrot.slane %v2539_v49, 4  ;;  %v2412_v11 = vadd.f32 %v2411_v52, %v9889_v30  ;;  %7037 = vmatprep.subr.bf16.mxu0 %v8548_v4  ;;  %7078 = vmatprep.subr.bf16.mxu1 %v8551_v23  ;;  %v8555_v32 = vld [vmem:[#allocation8 + $0x320] ss:$8 sps:$4 sm:$0xff]  }
 0x1d6   :  { %v2407_v27 = vrot.slane %v2406_v40, 2  ;;  %v2663_v16 = vadd.f32 %v2662_v63, %v2540_v29  ;;  %v2401_v28 = vrot.slane %v2400_v37, 2  ;;  %v2541_v52 = vmul.f32 %v9889_v30, %v9889_v30  ;;  %v8560_v4 = vld [vmem:[#allocation8 + $0x234] ss:$8 sps:$4 sm:$0xff]  }
 0x1d7   :  { %v2396_v10 = vadd.f32 %v2395_v26, %v2394_v59  ;;  %v2652_v20 = vrot.slane %v2651_v45, 2  ;;  %v2657_v62 = vadd.f32 %v2656_v9, %v2539_v49  ;;  %v2413_v53 = vrot.slane %v2412_v11, 2  ;;  %7038 = vmatpush1.bf16.msra.mxu0 %v8546_v55  ;;  %7079 = vmatpush1.bf16.msra.mxu1 %v8549_v48  ;;  %v8563_v23 = vld [vmem:[#allocation8 + $0x334] ss:$8 sps:$4 sm:$0xff]  }
 0x1d8   :  { %v2408_v33 = vadd.f32 %v2407_v27, %v2406_v40  ;;  %v2664_v21 = vrot.slane %v2663_v16, 2  ;;  %v2402_v17 = vadd.f32 %v2401_v28, %v2400_v37  ;;  %v9243_v19 = vpop.eup %9242  ;;  %7039 = vmatprep.subr.bf16.mxu0 %v8554_v3  ;;  %7080 = vmatprep.subr.bf16.mxu1 %v8557_v56  ;;  %v8561_v3 = vld [vmem:[#allocation8 + $0x330] ss:$8 sps:$4 sm:$0xff]   ;;  %v8566_v56 = vld [vmem:[#allocation8 + $0x244] ss:$8 sps:$4 sm:$0xff]  }
 0x1d9   :  { %v2397_v29 = vrot.slane %v2396_v10, 1  ;;  %v2653_v59 = vadd.f32 %v2652_v20, %v2651_v45  ;;  %v2658_v63 = vrot.slane %v2657_v62, 2  ;;  %v2414_v49 = vadd.f32 %v2413_v53, %v2412_v11 }
 0x1da   :  { %v3005_v26 = vcombine.low %v9241_v54, %v9243_v19  ;;  %v2409_v55 = vrot.slane %v2408_v33, 1  ;;  %v2665_v48 = vadd.f32 %v2664_v21, %v2663_v16  ;;  %v2403_v9 = vrot.slane %v2402_v17, 1  ;;  %v8569_v54 = vld [vmem:[#allocation8 + $0x344] ss:$8 sps:$4 sm:$0xff]  }
 0x1db   :  { %v2398_v40 = vadd.f32 %v2397_v29, %v2396_v10  ;;  %v2654_v27 = vrot.slane %v2653_v59, 1  ;;  %v2659_v37 = vadd.f32 %v2658_v63, %v2657_v62  ;;  %v2415_v28 = vrot.slane %v2414_v49, 1  ;;  %7040 = vmatpush1.bf16.msra.mxu0 %v8552_v38  ;;  %7081 = vmatpush1.bf16.msra.mxu1 %v8555_v32  ;;  %v2844_v38 = vld [vmem:[#allocation7 + $0x10] ss:$2 sm:$0xff] }
 0x1dc   :  { %v3033_v30 = vrot.slane %v3005_v26, %v9621_v8  ;;  %v2410_v15 = vadd.f32 %v2409_v55, %v2408_v33  ;;  %v2666_v31 = vrot.slane %v2665_v48, 1  ;;  %v2404_v20 = vadd.f32 %v2403_v9, %v2402_v17  ;;  %7041 = vmatprep.subr.bf16.mxu0 %v8560_v4  ;;  %7082 = vmatprep.subr.bf16.mxu1 %v8563_v23  ;;  %v8572_v63 = vld [vmem:[#allocation8 + $0x254] ss:$8 sps:$4 sm:$0xff]  }
 0x1dd   :  { %v9902_v45 = vmul.f32 0.125, %v2398_v40  ;;  %v2655_v11 = vadd.f32 %v2654_v27, %v2653_v59  ;;  %v2660_v16 = vrot.slane %v2659_v37, 1  ;;  %v2668_v10 = vrot.slane %v2541_v52, 4  ;;  %v8575_v26 = vld [vmem:[#allocation8 + $0x354] ss:$8 sps:$4 sm:$0xff]  }
 0x1de   :  { %v3035_v53 = vcombine.low %v3026_v2, %v3033_v30  ;;  %v9904_v62 = vmul.f32 0.125, %v2410_v15  ;;  %v2667_v21 = vadd.f32 %v2666_v31, %v2665_v48  ;;  %v9906_v19 = vmul.f32 0.125, %v2404_v20  ;;  %v8564_v15 = vld [vmem:[#allocation8 + $0x240] ss:$8 sps:$4 sm:$0xff]   ;;  %v8573_v20 = vld [vmem:[#allocation8 + $0x350] ss:$8 sps:$4 sm:$0xff]  }
 0x1df   :  { %v2762_v32 = vmul.f32 0.125, %v2655_v11  ;;  %v2794_v33 = vmul.f32 %v9902_v45, %v9902_v45  ;;  %v2661_v17 = vadd.f32 %v2660_v16, %v2659_v37  ;;  %v2416_v4 = vadd.f32 %v2415_v28, %v2414_v49  ;;  %7042 = vmatpush1.bf16.msra.mxu0 %v8558_v43  ;;  %7083 = vmatpush1.bf16.msra.mxu1 %v8561_v3  ;;  %v8567_v31 = vld [vmem:[#allocation8 + $0x340] ss:$8 sps:$4 sm:$0xff]   ;;  %v8570_v3 = vld [vmem:[#allocation8 + $0x250] ss:$8 sps:$4 sm:$0xff]  }
 0x1e0   :  { %v10445_v23 = vcombine.low %v9822_v36, %v9827_v46  ;;  %v3049_v59 = vrot.slane %v3035_v53, %v9621_v8  ;;  %v2764_v30 = vmul.f32 0.125, %v2667_v21  ;;  %v2795_v2 = vmul.f32 %v9906_v19, %v9906_v19  ;;  %7043 = vmatprep.subr.bf16.mxu0 %v8566_v56  ;;  %7084 = vmatprep.subr.bf16.mxu1 %v8569_v54 }
 0x1e1   :  { %v2826_v49 = vsub.f32 %v2762_v32, %v2794_v33  ;;  %v2796_v55 = vmul.f32 %v9904_v62, %v9904_v62  ;;  %v2763_v36 = vmul.f32 0.125, %v2661_v17  ;;  %v2669_v46 = vadd.f32 %v2668_v10, %v2541_v52  ;;  %v8578_v52 = vld [vmem:[#allocation8 + $0x264] ss:$8 sps:$4 sm:$0xff]  }
 0x1e2   :  { %v3042_v29 = vrot.slane %v10445_v23, %v9621_v8  ;;  %v3652_v43 = vrot.slane %v9851_v61, %v9680_v47  ;;  %v9921_v27 = vmul.f32 0.125, %v2416_v4 }
 0x1e3   :  { %v2873_v9 = vadd.f32 1e-05, %v2826_v49  ;;  %v2827_v40 = vsub.f32 %v2763_v36, %v2795_v2  ;;  %v2670_v37 = vrot.slane %v2669_v46, 2  ;;  %7044 = vmatpush1.bf16.msra.mxu0 %v8564_v15  ;;  %7085 = vmatpush1.bf16.msra.mxu1 %v8567_v31  ;;  %v2828_v54 = vsub.f32 %v2764_v30, %v2796_v55  ;;  %v8579_v31 = vld [vmem:[#allocation8 + $0x360] ss:$8 sps:$4 sm:$0xff]  }
 0x1e4   :  { %v3050_v48 = vcombine.low %v3042_v29, %v3049_v59  ;;  %v9924_v56 = vadd.f32 %v3652_v43, %v9791_v60  ;;  %7045 = vmatprep.subr.bf16.mxu0 %v8572_v63  ;;  %7086 = vmatprep.subr.bf16.mxu1 %v8575_v26  ;;  %v2797_v60 = vmul.f32 %v9921_v27, %v9921_v27  ;;  %v8576_v59 = vld [vmem:[#allocation8 + $0x260] ss:$8 sps:$4 sm:$0xff]   ;;  %v8584_v30 = vld [vmem:[#allocation8 + $0x274] ss:$8 sps:$4 sm:$0xff]   ;;  %v8582_v43 = vld [vmem:[#allocation8 + $0x270] ss:$8 sps:$4 sm:$0xff]  }
 0x1e5   :  { %v2874_v11 = vadd.f32 1e-05, %v2827_v40  ;;  %v2671_v16 = vadd.f32 %v2670_v37, %v2669_v46  ;;  %9244 = vrsqrt.f32 %v2873_v9  ;;  %v2875_v2 = vadd.f32 1e-05, %v2828_v54  ;;  %v8585_v37 = vld [vmem:[#allocation8 + $0x370] ss:$8 sps:$4 sm:$0xff]  }
 0x1e6   :  { %v3154_v28 = vmul.f32 %v3050_v48, %v2844_v38  ;;  %v8581_v38 = vld [vmem:[#allocation8 + $0x364] ss:$8 sps:$4 sm:$0xff]  }
 0x1e7   :  { %v2672_v32 = vrot.slane %v2671_v16, 1  ;;  %7046 = vmatpush1.bf16.msra.mxu0 %v8570_v3  ;;  %7087 = vmatpush1.bf16.msra.mxu1 %v8573_v20  ;;  %9246 = vrsqrt.f32 %v2874_v11 }
 0x1e8   :  { %v3212_v61 = vrot.slane %v3154_v28, %v9672_v41  ;;  %v3216_v10 = vrot.slane %v3154_v28, %v9675_v42  ;;  %v3220_v53 = vrot.slane %v3154_v28, %v9680_v47  ;;  %v3224_v21 = vrot.slane %v3154_v28, %v9729_v0  ;;  %7047 = vmatprep.subr.bf16.mxu0 %v8578_v52 }
 0x1e9   :  { %v3196_v33 = vrot.slane %v3154_v28, %v9732_v6  ;;  %v2673_v63 = vadd.f32 %v2672_v32, %v2671_v16  ;;  %7088 = vmatprep.subr.bf16.mxu1 %v8581_v38  ;;  %v3208_v55 = vrot.slane %v3154_v28, %v9741_v34  ;;  %9248 = vrsqrt.f32 %v2875_v2  ;;  %v8591_v38 = vld [vmem:[#allocation8 + $0x380] ss:$8 sps:$4 sm:$0xff]  }
 0x1ea   :  { %v3333_v17 = vmul.f32 %v3212_v61, %v9824_v24  ;;  %v3334_v4 = vmul.f32 %v3216_v10, %v9831_v58  ;;  %v3335_v23 = vmul.f32 %v3220_v53, %v9829_v14  ;;  %v3336_v29 = vmul.f32 %v3224_v21, %v9846_v13  ;;  %v8587_v58 = vld [vmem:[#allocation8 + $0x374] ss:$8 sps:$4 sm:$0xff]  }
 0x1eb   :  { %v9938_v15 = vmul.f32 %v3224_v21, %v9811_v22  ;;  %v3200_v14 = vrot.slane %v3154_v28, %v9735_v1  ;;  %v3204_v13 = vrot.slane %v3154_v28, %v9738_v7  ;;  %v2765_v49 = vmul.f32 0.125, %v2673_v63  ;;  %7048 = vmatpush1.bf16.msra.mxu0 %v8576_v59  ;;  %7089 = vmatpush1.bf16.msra.mxu1 %v8579_v31  ;;  %v8588_v21 = vld [vmem:[#allocation8 + $0x280] ss:$8 sps:$4 sm:$0xff]  }
 0x1ec   :  { %v3436_v26 = vcombine.low %v3333_v17, %v3334_v4  ;;  %v3437_v24 = vcombine.low %v3335_v23, %v3336_v29  ;;  %v3329_v22 = vmul.f32 %v3196_v33, %v9708_v25  ;;  %v9945_v36 = vmul.f32 %v3196_v33, %v9677_v44  ;;  %7049 = vmatprep.subr.bf16.mxu0 %v8584_v30  ;;  %v8590_v25 = vld [vmem:[#allocation8 + $0x284] ss:$8 sps:$4 sm:$0xff]   ;;  %v8596_v33 = vld [vmem:[#allocation8 + $0x294] ss:$8 sps:$4 sm:$0xff]  }
 0x1ed   :  { %v3330_v9 = vmul.f32 %v3200_v14, %v9713_v39  ;;  %v9955_v40 = vmul.f32 %v3204_v13, %v9711_v35  ;;  %v2829_v44 = vsub.f32 %v2765_v49, %v2797_v60  ;;  %v9958_v28 = vmul.f32 %v3208_v55, %v9726_v5  ;;  %7090 = vmatprep.subr.bf16.mxu1 %v8587_v58  ;;  %v8593_v39 = vld [vmem:[#allocation8 + $0x384] ss:$8 sps:$4 sm:$0xff]   ;;  %v8594_v49 = vld [vmem:[#allocation8 + $0x290] ss:$8 sps:$4 sm:$0xff]  }
 0x1ee   :  { %v9948_v46 = vrot.slane %v3436_v26, %v9621_v8  ;;  %v9951_v48 = vrot.slane %v3437_v24, %v9621_v8  ;;  %v9961_v3 = vmul.f32 %v3200_v14, %v9687_v51  ;;  %v9966_v35 = vmul.f32 %v3208_v55, %v9693_v57  ;;  %v10446_v57 = vld [vmem:[#allocation16_spill] sm:$0xff] }
 0x1ef   :  { %v3434_v52 = vcombine.low %v3329_v22, %v3330_v9  ;;  %v9969_v54 = vmul.f32 %v3204_v13, %v9685_v50  ;;  %v2876_v11 = vadd.f32 1e-05, %v2829_v44  ;;  %v3435_v5 = vcombine.low %v9955_v40, %v9958_v28  ;;  %7050 = vmatpush1.bf16.msra.mxu0 %v8582_v43  ;;  %v9984_v50 = vpop.eup %9244  ;;  %7091 = vmatpush1.bf16.msra.mxu1 %v8585_v37  ;;  %v8597_v37 = vld [vmem:[#allocation8 + $0x390] ss:$8 sps:$4 sm:$0xff]  }
 0x1f0   :  { %v9974_v16 = vmul.f32 %v3216_v10, %v9800_v18  ;;  %v9977_v51 = vmul.f32 %v3212_v61, %v9793_v12  ;;  %v9979_v32 = vpop.f32.mrb[20].mxu0  ;;  %v9982_v60 = vmul.f32 %v3220_v53, %v10446_v57  ;;  %7051 = vmatprep.subr.bf16.mxu0 %v8590_v25  ;;  %v9989_v61 = vpop.f32.mrb[20].mxu1  ;;  %7092 = vmatprep.subr.bf16.mxu1 %v8593_v39  ;;  %v8599_v53 = vld [vmem:[#allocation8 + $0x394] ss:$8 sps:$4 sm:$0xff]   ;;  %v8602_v25 = vld [vmem:[#allocation8 + $0x2a4] ss:$8 sps:$4 sm:$0xff]  }
 0x1f1   :  { %9250 = vrsqrt.f32 %v2876_v11  ;;  %v2417_v18 = vrot.slane %v9979_v32, 4  ;;  %v2542_v12 = vmul.f32 %v9979_v32, %v9979_v32  ;;  %10447 = vst [vmem:[#allocation16_spill] sm:$0xff] %v9989_v61  ;;  %v9991_v10 = vpop.f32.mrb[21].mxu0  ;;  %v9994_v17 = vrot.slane %v3434_v52, %v9621_v8  ;;  %v10002_v31 = vpop.f32.mrb[21].mxu1  ;;  %v8605_v11 = vld [vmem:[#allocation8 + $0x3a4] ss:$8 sps:$4 sm:$0xff]  }
 0x1f2   :  { %v2429_v4 = vrot.slane %v9989_v61, 4  ;;  %v2544_v23 = vmul.f32 %v9989_v61, %v9989_v61  ;;  %v2423_v29 = vrot.slane %v9991_v10, 4  ;;  %v2543_v59 = vmul.f32 %v9991_v10, %v9991_v10  ;;  %v2089_v30 = vpop.f32.mrb[22].mxu0  ;;  %v9247_v2 = vpop.eup %9246 }
 0x1f3   :  { %v2418_v63 = vadd.f32 %v2417_v18, %v9979_v32  ;;  %v2674_v26 = vrot.slane %v2542_v12, 4  ;;  %v2435_v24 = vrot.slane %v10002_v31, 4  ;;  %v10008_v58 = vmul.f32 %v10002_v31, %v10002_v31  ;;  %v2090_v14 = vpop.f32.mrb[23].mxu0  ;;  %v2130_v13 = vpop.f32.mrb[22].mxu1  ;;  %7052 = vmatpush1.bf16.msra.mxu0 %v8588_v21  ;;  %7093 = vmatpush1.bf16.msra.mxu1 %v8591_v38 }
 0x1f4   :  { %v3051_v55 = vcombine.low %v9984_v50, %v9247_v2  ;;  %v2430_v22 = vadd.f32 %v2429_v4, %v9989_v61  ;;  %v2686_v43 = vrot.slane %v2544_v23, 4  ;;  %v2424_v9 = vadd.f32 %v2423_v29, %v9991_v10  ;;  %v2131_v40 = vpop.f32.mrb[23].mxu1  ;;  %7053 = vmatprep.subr.bf16.mxu0 %v8596_v33  ;;  %7094 = vmatprep.subr.bf16.mxu1 %v8599_v53  ;;  %v9249_v4 = vpop.eup %9248  ;;  %v8600_v2 = vld [vmem:[#allocation8 + $0x2a0] ss:$8 sps:$4 sm:$0xff]  }
 0x1f5   :  { %v2419_v44 = vrot.slane %v2418_v63, 2  ;;  %v2675_v28 = vadd.f32 %v2674_v26, %v2542_v12  ;;  %v2680_v39 = vrot.slane %v2543_v59, 4  ;;  %v2436_v52 = vadd.f32 %v2435_v24, %v10002_v31  ;;  %v8603_v53 = vld [vmem:[#allocation8 + $0x3a0] ss:$8 sps:$4 sm:$0xff]  }
 0x1f6   :  { %v2431_v21 = vrot.slane %v2430_v22, 2  ;;  %v2687_v57 = vadd.f32 %v2686_v43, %v2544_v23  ;;  %v2425_v50 = vrot.slane %v2424_v9, 2  ;;  %v10015_v18 = vrot.slane %v3435_v5, %v9621_v8  ;;  %v8608_v23 = vld [vmem:[#allocation8 + $0x2b4] ss:$8 sps:$4 sm:$0xff]  }
 0x1f7   :  { %v2420_v29 = vadd.f32 %v2419_v44, %v2418_v63  ;;  %v2676_v30 = vrot.slane %v2675_v28, 2  ;;  %v2681_v38 = vadd.f32 %v2680_v39, %v2543_v59  ;;  %v2437_v33 = vrot.slane %v2436_v52, 2  ;;  %7054 = vmatpush1.bf16.msra.mxu0 %v8594_v49  ;;  %7095 = vmatpush1.bf16.msra.mxu1 %v8597_v37  ;;  %v8611_v63 = vld [vmem:[#allocation8 + $0x3b4] ss:$8 sps:$4 sm:$0xff]  }
 0x1f8   :  { %v2432_v14 = vadd.f32 %v2431_v21, %v2430_v22  ;;  %v2688_v12 = vrot.slane %v2687_v57, 2  ;;  %v2426_v26 = vadd.f32 %v2425_v50, %v2424_v9  ;;  %v2692_v24 = vrot.slane %v10008_v58, 4  ;;  %7055 = vmatprep.subr.bf16.mxu0 %v8602_v25  ;;  %7096 = vmatprep.subr.bf16.mxu1 %v8605_v11  ;;  %v8606_v25 = vld [vmem:[#allocation8 + $0x2b0] ss:$8 sps:$4 sm:$0xff]   ;;  %v8614_v11 = vld [vmem:[#allocation8 + $0x2c4] ss:$8 sps:$4 sm:$0xff]  }
 0x1f9   :  { %v2421_v13 = vrot.slane %v2420_v29, 1  ;;  %v2677_v43 = vadd.f32 %v2676_v30, %v2675_v28  ;;  %v2682_v5 = vrot.slane %v2681_v38, 2  ;;  %v2438_v40 = vadd.f32 %v2437_v33, %v2436_v52  ;;  %v8609_v52 = vld [vmem:[#allocation8 + $0x3b0] ss:$8 sps:$4 sm:$0xff]  }
 0x1fa   :  { %v10019_v59 = vrot.slane %v3051_v55, %v9621_v8  ;;  %v2433_v49 = vrot.slane %v2432_v14, 1  ;;  %v2689_v44 = vadd.f32 %v2688_v12, %v2687_v57  ;;  %v2427_v22 = vrot.slane %v2426_v26, 1 }
 0x1fb   :  { %v9251_v39 = vpop.eup %9250  ;;  %v2422_v9 = vadd.f32 %v2421_v13, %v2420_v29  ;;  %v2678_v21 = vrot.slane %v2677_v43, 1  ;;  %v2683_v50 = vadd.f32 %v2682_v5, %v2681_v38  ;;  %v2439_v37 = vrot.slane %v2438_v40, 1  ;;  %7056 = vmatpush1.bf16.msra.mxu0 %v8600_v2  ;;  %7097 = vmatpush1.bf16.msra.mxu1 %v8603_v53  ;;  %v8617_v38 = vld [vmem:[#allocation8 + $0x3c4] ss:$8 sps:$4 sm:$0xff]   ;;  %v8615_v5 = vld [vmem:[#allocation8 + $0x3c0] ss:$8 sps:$4 sm:$0xff]  }
 0x1fc   :  { %v3052_v20 = vcombine.low %v9249_v4, %v9251_v39  ;;  %v2434_v61 = vadd.f32 %v2433_v49, %v2432_v14  ;;  %v2690_v28 = vrot.slane %v2689_v44, 1  ;;  %v2428_v30 = vadd.f32 %v2427_v22, %v2426_v26  ;;  %7057 = vmatprep.subr.bf16.mxu0 %v8608_v23  ;;  %7098 = vmatprep.subr.bf16.mxu1 %v8611_v63  ;;  %v8620_v63 = vld [vmem:[#allocation8 + $0x2d4] ss:$8 sps:$4 sm:$0xff]  }
 0x1fd   :  { %v10021_v55 = vmul.f32 0.125, %v2422_v9  ;;  %v2679_v33 = vadd.f32 %v2678_v21, %v2677_v43  ;;  %v2684_v57 = vrot.slane %v2683_v50, 1  ;;  %v2693_v12 = vadd.f32 %v2692_v24, %v10008_v58  ;;  %v8612_v24 = vld [vmem:[#allocation8 + $0x2c0] ss:$8 sps:$4 sm:$0xff]   ;;  %v8623_v9 = vld [vmem:[#allocation8 + $0x3d4] ss:$8 sps:$4 sm:$0xff]  }
 0x1fe   :  { %v10025_v29 = vrot.slane %v3052_v20, %v9621_v8  ;;  %v10027_v2 = vmul.f32 0.125, %v2434_v61  ;;  %v2691_v4 = vadd.f32 %v2690_v28, %v2689_v44  ;;  %v10029_v14 = vmul.f32 0.125, %v2428_v30  ;;  %v8648_v58 = vld [vmem:[#allocation8 + $0x420] ss:$8 sps:$4 sm:$0xff]  }
 0x1ff   :  { %v2766_v26 = vmul.f32 0.125, %v2679_v33  ;;  %v2798_v53 = vmul.f32 %v10021_v55, %v10021_v55  ;;  %v2685_v23 = vadd.f32 %v2684_v57, %v2683_v50  ;;  %v2440_v13 = vadd.f32 %v2439_v37, %v2438_v40  ;;  %7058 = vmatpush1.bf16.msra.mxu0 %v8606_v25  ;;  %7099 = vmatpush1.bf16.msra.mxu1 %v8609_v52  ;;  %v8618_v37 = vld [vmem:[#allocation8 + $0x2d0] ss:$8 sps:$4 sm:$0xff]   ;;  %v8626_v33 = vld [vmem:[#allocation8 + $0x2e4] ss:$8 sps:$4 sm:$0xff]  }
 0x200   :  { %v2768_v43 = vmul.f32 0.125, %v2691_v4  ;;  %v2800_v20 = vmul.f32 %v10027_v2, %v10027_v2  ;;  %v2799_v61 = vmul.f32 %v10029_v14, %v10029_v14  ;;  %7059 = vmatprep.subr.bf16.mxu0 %v8614_v11  ;;  %v2694_v22 = vrot.slane %v2693_v12, 2  ;;  %7100 = vmatprep.subr.bf16.mxu1 %v8617_v38  ;;  %v8621_v11 = vld [vmem:[#allocation8 + $0x3d0] ss:$8 sps:$4 sm:$0xff]  }
 0x201   :  { %v2830_v49 = vsub.f32 %v2766_v26, %v2798_v53  ;;  %v2767_v44 = vmul.f32 0.125, %v2685_v23  ;;  %v10448_v40 = vcombine.low %v9948_v46, %v9951_v48  ;;  %v3466_v50 = vcombine.low %v9994_v17, %v10015_v18  ;;  %v2852_v57 = vld [vmem:[#allocation7 + $0x11] ss:$2 sm:$0xff]  ;;  %v8629_v17 = vld [vmem:[#allocation8 + $0x3e4] ss:$8 sps:$4 sm:$0xff]  }
 0x202   :  { %v2832_v21 = vsub.f32 %v2768_v43, %v2800_v20  ;;  %v10045_v30 = vmul.f32 0.125, %v2440_v13  ;;  %v2695_v52 = vadd.f32 %v2694_v22, %v2693_v12  ;;  %v8624_v53 = vld [vmem:[#allocation8 + $0x2e0] ss:$8 sps:$4 sm:$0xff]   ;;  %v8632_v43 = vld [vmem:[#allocation8 + $0x2f4] ss:$8 sps:$4 sm:$0xff]  }
 0x203   :  { %v3481_v39 = vrot.slane %v10448_v40, %v9621_v8  ;;  %v2877_v25 = vadd.f32 1e-05, %v2830_v49  ;;  %v2831_v28 = vsub.f32 %v2767_v44, %v2799_v61  ;;  %7060 = vmatpush1.bf16.msra.mxu0 %v8612_v24  ;;  %v3474_v4 = vrot.slane %v3466_v50, %v9621_v8  ;;  %7101 = vmatpush1.bf16.msra.mxu1 %v8615_v5  ;;  %v8627_v23 = vld [vmem:[#allocation8 + $0x3e0] ss:$8 sps:$4 sm:$0xff]   ;;  %v8630_v50 = vld [vmem:[#allocation8 + $0x2f0] ss:$8 sps:$4 sm:$0xff]  }
 0x204   :  { %7061 = vmatprep.subr.bf16.mxu0 %v8620_v63  ;;  %v2879_v46 = vadd.f32 1e-05, %v2832_v21  ;;  %v2696_v38 = vrot.slane %v2695_v52, 1  ;;  %7102 = vmatprep.subr.bf16.mxu1 %v8623_v9  ;;  %v2801_v12 = vmul.f32 %v10045_v30, %v10045_v30  ;;  %v10449_v20 = vld [vmem:[#allocation17_spill] sm:$0xff]  ;;  %v3823_v5 = vmax.f32 %v9924_v56, 0.0 }
 0x205   :  { %9252 = vrsqrt.f32 %v2877_v25  ;;  %v2878_v48 = vadd.f32 1e-05, %v2831_v28  ;;  %v3482_v18 = vcombine.low %v3474_v4, %v3481_v39  ;;  %v3821_v61 = vmax.f32 %v10449_v20, 0.0  ;;  %v8635_v63 = vld [vmem:[#allocation8 + $0x3f4] ss:$8 sps:$4 sm:$0xff]  }
 0x206   :  { %v2697_v26 = vadd.f32 %v2696_v38, %v2695_v52 }
 0x207   :  { %9254 = vrsqrt.f32 %v2878_v48  ;;  %7062 = vmatpush1.bf16.msra.mxu0 %v8618_v37  ;;  %v10050_v13 = vsub.f32 %v2852_v57, %v3482_v18  ;;  %7103 = vmatpush1.bf16.msra.mxu1 %v8621_v11  ;;  %v8638_v57 = vld [vmem:[#allocation8 + $0x404] ss:$8 sps:$4 sm:$0xff]   ;;  %v3853_v38 = vpack.c.bf16 %v3821_v61, %v3821_v61  ;;  %v8636_v18 = vld [vmem:[#allocation8 + $0x400] ss:$8 sps:$4 sm:$0xff]   ;;  %v8644_v61 = vld [vmem:[#allocation8 + $0x414] ss:$8 sps:$4 sm:$0xff]  }
 0x208   :  { %7063 = vmatprep.subr.bf16.mxu0 %v8626_v33  ;;  %9256 = vrsqrt.f32 %v2879_v46  ;;  %v2769_v24 = vmul.f32 0.125, %v2697_v26  ;;  %7104 = vmatprep.subr.bf16.mxu1 %v8629_v17  ;;  %v8633_v33 = vld [vmem:[#allocation8 + $0x3f0] ss:$8 sps:$4 sm:$0xff]   ;;  %v3855_v17 = vpack.c.bf16 %v3823_v5, %v3823_v5 }
 0x209   :  { %v3664_v49 = vrot.slane %v10050_v13, %v9735_v1  ;;  %v3672_v44 = vrot.slane %v10050_v13, %v9741_v34  ;;  %v3660_v22 = vrot.slane %v10050_v13, %v9732_v6  ;;  %v3668_v40 = vrot.slane %v10050_v13, %v9738_v7 }
 0x20a   :  { %v2833_v39 = vsub.f32 %v2769_v24, %v2801_v12  ;;  %v3680_v9 = vrot.slane %v10050_v13, %v9675_v42  ;;  %v3688_v56 = vrot.slane %v10050_v13, %v9729_v0  ;;  %v3676_v21 = vrot.slane %v10050_v13, %v9672_v41 }
 0x20b   :  { %7064 = vmatpush1.bf16.msra.mxu0 %v8624_v53  ;;  %v3794_v37 = vadd.f32 %v3664_v49, %v9961_v3  ;;  %v3796_v25 = vadd.f32 %v3672_v44, %v9966_v35  ;;  %v10071_v28 = vadd.f32 %v3660_v22, %v9945_v36  ;;  %v10074_v52 = vadd.f32 %v3668_v40, %v9969_v54  ;;  %v8641_v36 = vld [vmem:[#allocation8 + $0x504] ss:$8 sps:$4 sm:$0xff]  }
 0x20c   :  { %7105 = vmatpush1.bf16.msra.mxu1 %v8627_v23  ;;  %v2880_v11 = vadd.f32 1e-05, %v2833_v39  ;;  %7065 = vmatprep.subr.bf16.mxu0 %v8632_v43  ;;  %v10077_v4 = vadd.f32 %v3680_v9, %v9974_v16  ;;  %v10080_v46 = vadd.f32 %v3688_v56, %v9938_v15  ;;  %v10083_v3 = vadd.f32 %v3676_v21, %v9977_v51  ;;  %v8639_v15 = vld [vmem:[#allocation8 + $0x500] ss:$8 sps:$4 sm:$0xff]   ;;  %v8647_v39 = vld [vmem:[#allocation8 + $0x514] ss:$8 sps:$4 sm:$0xff]  }
 0x20d   :  { %7106 = vmatprep.subr.bf16.mxu1 %v8635_v63  ;;  %v3826_v35 = vmax.f32 %v3794_v37, 0.0  ;;  %v3828_v48 = vmax.f32 %v3796_v25, 0.0 }
 0x20e   :  { %10450 = vst [vmem:[#allocation17_spill] sm:$0xff] %v10083_v3  ;;  %9258 = vrsqrt.f32 %v2880_v11  ;;  %v8642_v11 = vld [vmem:[#allocation8 + $0x410] ss:$8 sps:$4 sm:$0xff]  }
 0x20f   :  { %v9253_v54 = vpop.eup %9252  ;;  %7066 = vmatpush1.bf16.msra.mxu0 %v8630_v50  ;;  %v3858_v12 = vpack.c.bf16 %v3826_v35, %v3826_v35  ;;  %v3860_v53 = vpack.c.bf16 %v3828_v48, %v3828_v48  ;;  %v8645_v48 = vld [vmem:[#allocation8 + $0x510] ss:$8 sps:$4 sm:$0xff]  }
 0x210   :  { %v10085_v26 = vpop.f32.mrb[24].mxu0  ;;  %7107 = vmatpush1.bf16.msra.mxu1 %v8633_v33  ;;  %7117 = vmatprep.subr.bf16.mxu0 %v8638_v57  ;;  %v10090_v24 = vpop.f32.mrb[24].mxu1 }
 0x211   :  { %10451 = vst [vmem:[#allocation22_spill] sm:$0xff] %v10085_v26  ;;  %v9255_v16 = vpop.eup %9254  ;;  %v2441_v51 = vrot.slane %v10085_v26, 4  ;;  %v2546_v23 = vmul.f32 %v10085_v26, %v10085_v26  ;;  %10452 = vst [vmem:[#allocation23_spill] sm:$0xff] %v10090_v24  ;;  %v10092_v43 = vpop.f32.mrb[25].mxu0  ;;  %7158 = vmatprep.subr.bf16.mxu1 %v8641_v36  ;;  %v2453_v5 = vrot.slane %v10090_v24, 4  ;;  %v2548_v63 = vmul.f32 %v10090_v24, %v10090_v24 }
 0x212   :  { %10453 = vst [vmem:[#allocation24_spill] sm:$0xff] %v10092_v43  ;;  %v3053_v20 = vcombine.low %v9253_v54, %v9255_v16  ;;  %v2447_v49 = vrot.slane %v10092_v43, 4  ;;  %v10098_v44 = vpop.f32.mrb[25].mxu1  ;;  %v2171_v22 = vpop.f32.mrb[26].mxu0  ;;  %7068 = vmatmul.mubr.bf16.vlgmr.msra.gmra.mrb[36].mxu0 %v3853_v38  ;;  %v2547_v21 = vmul.f32 %v10092_v43, %v10092_v43  ;;  %v8650_v54 = vld [vmem:[#allocation8 + $0x424] ss:$8 sps:$4 sm:$0xff]  }
 0x213   :  { %10454 = vst [vmem:[#allocation25_spill] sm:$0xff] %v10098_v44  ;;  %v9257_v40 = vpop.eup %9256  ;;  %v2442_v9 = vadd.f32 %v2441_v51, %v10085_v26  ;;  %v2698_v56 = vrot.slane %v2546_v23, 4  ;;  %v2459_v50 = vrot.slane %v10098_v44, 4  ;;  %v2172_v37 = vpop.f32.mrb[27].mxu0  ;;  %7109 = vmatmul.mubr.bf16.vlgmr.msra.gmra.mrb[36].mxu1 %v3855_v17  ;;  %7118 = vmatpush1.bf16.msra.mxu0 %v8636_v18  ;;  %v2454_v33 = vadd.f32 %v2453_v5, %v10090_v24  ;;  %v8653_v17 = vld [vmem:[#allocation8 + $0x524] ss:$8 sps:$4 sm:$0xff]  }
 0x214   :  { %v2212_v25 = vpop.f32.mrb[26].mxu1  ;;  %v2710_v57 = vrot.slane %v2548_v63, 4  ;;  %v2448_v36 = vadd.f32 %v2447_v49, %v10092_v43  ;;  %7149 = vmatprep.mubr.bf16.mxu0 %v3858_v12  ;;  %7159 = vmatpush1.bf16.msra.mxu1 %v8639_v15  ;;  %v2704_v51 = vrot.slane %v2547_v21, 4  ;;  %v10108_v37 = vrot.slane %v3053_v20, %v9621_v8 }
 0x215   :  { %v2213_v35 = vpop.f32.mrb[27].mxu1  ;;  %v2443_v38 = vrot.slane %v2442_v9, 2  ;;  %v2699_v16 = vadd.f32 %v2698_v56, %v2546_v23  ;;  %v2460_v22 = vadd.f32 %v2459_v50, %v10098_v44  ;;  %7190 = vmatprep.mubr.bf16.mxu1 %v3860_v53  ;;  %7119 = vmatprep.subr.bf16.mxu0 %v8644_v61  ;;  %v2455_v18 = vrot.slane %v2454_v33, 2  ;;  %v8651_v53 = vld [vmem:[#allocation8 + $0x520] ss:$8 sps:$4 sm:$0xff]  }
 0x216   :  { %v2711_v5 = vadd.f32 %v2710_v57, %v2548_v63  ;;  %v2449_v25 = vrot.slane %v2448_v36, 2  ;;  %7160 = vmatprep.subr.bf16.mxu1 %v8647_v39  ;;  %v2705_v15 = vadd.f32 %v2704_v51, %v2547_v21  ;;  %v2549_v20 = vmul.f32 %v10098_v44, %v10098_v44  ;;  %v8656_v61 = vld [vmem:[#allocation8 + $0x434] ss:$8 sps:$4 sm:$0xff]  }
 0x217   :  { %v2444_v49 = vadd.f32 %v2443_v38, %v2442_v9  ;;  %v2700_v12 = vrot.slane %v2699_v16, 2  ;;  %v2461_v35 = vrot.slane %v2460_v22, 2  ;;  %7120 = vmatpush1.bf16.msra.mxu0 %v8642_v11  ;;  %v2456_v23 = vadd.f32 %v2455_v18, %v2454_v33  ;;  %v8659_v21 = vld [vmem:[#allocation8 + $0x534] ss:$8 sps:$4 sm:$0xff]  }
 0x218   :  { %v2712_v56 = vrot.slane %v2711_v5, 2  ;;  %v2450_v3 = vadd.f32 %v2449_v25, %v2448_v36  ;;  %v9259_v50 = vpop.eup %9258  ;;  %7161 = vmatpush1.bf16.msra.mxu1 %v8645_v48  ;;  %7121 = vmatprep.subr.bf16.mxu0 %v8650_v54  ;;  %v2706_v39 = vrot.slane %v2705_v15, 2  ;;  %v8654_v48 = vld [vmem:[#allocation8 + $0x430] ss:$8 sps:$4 sm:$0xff]  }
 0x219   :  { %v2445_v63 = vrot.slane %v2444_v49, 1  ;;  %v2701_v57 = vadd.f32 %v2700_v12, %v2699_v16  ;;  %v2462_v9 = vadd.f32 %v2461_v35, %v2460_v22  ;;  %v3054_v38 = vcombine.low %v9257_v40, %v9259_v50  ;;  %7162 = vmatprep.subr.bf16.mxu1 %v8653_v17  ;;  %v8657_v54 = vld [vmem:[#allocation8 + $0x530] ss:$8 sps:$4 sm:$0xff]   ;;  %v8662_v40 = vld [vmem:[#allocation8 + $0x444] ss:$8 sps:$4 sm:$0xff]  }
 0x21a   :  { %v2457_v11 = vrot.slane %v2456_v23, 1  ;;  %v2713_v51 = vadd.f32 %v2712_v56, %v2711_v5  ;;  %v2451_v33 = vrot.slane %v2450_v3, 1  ;;  %v2707_v25 = vadd.f32 %v2706_v39, %v2705_v15  ;;  %v8665_v15 = vld [vmem:[#allocation8 + $0x544] ss:$8 sps:$4 sm:$0xff]   ;;  %v8663_v39 = vld [vmem:[#allocation8 + $0x540] ss:$8 sps:$4 sm:$0xff]  }
 0x21b   :  { %v2446_v18 = vadd.f32 %v2445_v63, %v2444_v49  ;;  %v2702_v36 = vrot.slane %v2701_v57, 1  ;;  %v2463_v24 = vrot.slane %v2462_v9, 1  ;;  %v3082_v26 = vrot.slane %v3054_v38, %v9621_v8  ;;  %7122 = vmatpush1.bf16.msra.mxu0 %v8648_v58  ;;  %v8668_v38 = vld [vmem:[#allocation8 + $0x454] ss:$8 sps:$4 sm:$0xff]  }
 0x21c   :  { %v2458_v44 = vadd.f32 %v2457_v11, %v2456_v23  ;;  %v2714_v43 = vrot.slane %v2713_v51, 1  ;;  %v2452_v16 = vadd.f32 %v2451_v33, %v2450_v3  ;;  %7163 = vmatpush1.bf16.msra.mxu1 %v8651_v53  ;;  %7123 = vmatprep.subr.bf16.mxu0 %v8656_v61  ;;  %v2708_v5 = vrot.slane %v2707_v25, 1  ;;  %v8671_v11 = vld [vmem:[#allocation8 + $0x554] ss:$8 sps:$4 sm:$0xff]  }
 0x21d   :  { %v10113_v22 = vmul.f32 0.125, %v2446_v18  ;;  %v2703_v17 = vadd.f32 %v2702_v36, %v2701_v57  ;;  %v2716_v12 = vrot.slane %v2549_v20, 4  ;;  %v3084_v49 = vcombine.low %v10108_v37, %v3082_v26  ;;  %7164 = vmatprep.subr.bf16.mxu1 %v8659_v21  ;;  %v2846_v57 = vld [vmem:[#allocation7 + $0x20] ss:$2 sm:$0xff] }
 0x21e   :  { %v10116_v35 = vmul.f32 0.125, %v2458_v44  ;;  %v2715_v58 = vadd.f32 %v2714_v43, %v2713_v51  ;;  %v10118_v56 = vmul.f32 0.125, %v2452_v16  ;;  %v2709_v50 = vadd.f32 %v2708_v5, %v2707_v25  ;;  %v8660_v44 = vld [vmem:[#allocation8 + $0x440] ss:$8 sps:$4 sm:$0xff]  }
 0x21f   :  { %v2770_v23 = vmul.f32 0.125, %v2703_v17  ;;  %v2802_v3 = vmul.f32 %v10113_v22, %v10113_v22  ;;  %v2464_v53 = vadd.f32 %v2463_v24, %v2462_v9  ;;  %v10455_v61 = vcombine.low %v10019_v59, %v10025_v29  ;;  %7124 = vmatpush1.bf16.msra.mxu0 %v8654_v48 }
 0x220   :  { %v3098_v26 = vrot.slane %v3084_v49, %v9621_v8  ;;  %v2772_v37 = vmul.f32 0.125, %v2715_v58  ;;  %v2803_v43 = vmul.f32 %v10118_v56, %v10118_v56  ;;  %7165 = vmatpush1.bf16.msra.mxu1 %v8657_v54  ;;  %7125 = vmatprep.subr.bf16.mxu0 %v8662_v40  ;;  %v2804_v24 = vmul.f32 %v10116_v35, %v10116_v35  ;;  %v8666_v54 = vld [vmem:[#allocation8 + $0x450] ss:$8 sps:$4 sm:$0xff]   ;;  %v8674_v40 = vld [vmem:[#allocation8 + $0x464] ss:$8 sps:$4 sm:$0xff]  }
 0x221   :  { %v3091_v63 = vrot.slane %v10455_v61, %v9621_v8  ;;  %v2834_v21 = vsub.f32 %v2770_v23, %v2802_v3  ;;  %v2771_v9 = vmul.f32 0.125, %v2709_v50  ;;  %v2717_v59 = vadd.f32 %v2716_v12, %v2549_v20  ;;  %7166 = vmatprep.subr.bf16.mxu1 %v8665_v15  ;;  %v8669_v20 = vld [vmem:[#allocation8 + $0x550] ss:$8 sps:$4 sm:$0xff]   ;;  %v8677_v23 = vld [vmem:[#allocation8 + $0x564] ss:$8 sps:$4 sm:$0xff]  }
 0x222   :  { %v3684_v51 = vrot.slane %v10050_v13, %v9680_v47  ;;  %v10133_v36 = vmul.f32 0.125, %v2464_v53  ;;  %v2836_v17 = vsub.f32 %v2772_v37, %v2804_v24  ;;  %v8675_v37 = vld [vmem:[#allocation8 + $0x560] ss:$8 sps:$4 sm:$0xff]  }
 0x223   :  { %v3099_v29 = vcombine.low %v3091_v63, %v3098_v26  ;;  %v2881_v33 = vadd.f32 1e-05, %v2834_v21  ;;  %v2835_v18 = vsub.f32 %v2771_v9, %v2803_v43  ;;  %v2718_v25 = vrot.slane %v2717_v59, 2  ;;  %7126 = vmatpush1.bf16.msra.mxu0 %v8660_v44  ;;  %v8672_v26 = vld [vmem:[#allocation8 + $0x460] ss:$8 sps:$4 sm:$0xff]  }
 0x224   :  { %10456 = vst [vmem:[#allocation26_spill] sm:$0xff] %v10133_v36  ;;  %v10136_v16 = vadd.f32 %v3684_v51, %v9982_v60  ;;  %7167 = vmatpush1.bf16.msra.mxu1 %v8663_v39  ;;  %7127 = vmatprep.subr.bf16.mxu0 %v8668_v38  ;;  %v2805_v3 = vmul.f32 %v10133_v36, %v10133_v36  ;;  %v8680_v43 = vld [vmem:[#allocation8 + $0x474] ss:$8 sps:$4 sm:$0xff]   ;;  %v2883_v39 = vadd.f32 1e-05, %v2836_v17 }
 0x225   :  { %v3155_v48 = vmul.f32 %v3099_v29, %v2846_v57  ;;  %v2882_v5 = vadd.f32 1e-05, %v2835_v18  ;;  %v2719_v12 = vadd.f32 %v2718_v25, %v2717_v59  ;;  %7168 = vmatprep.subr.bf16.mxu1 %v8671_v11  ;;  %9260 = vrsqrt.f32 %v2881_v33  ;;  %v10458_v59 = vld [vmem:[#allocation18_spill] sm:$0xff]  ;;  %v8678_v33 = vld [vmem:[#allocation8 + $0x470] ss:$8 sps:$4 sm:$0xff]  }
 0x226   :  { %10457 = vst [vmem:[#allocation27_spill] sm:$0xff] %v10136_v16 }
 0x227   :  { %v3244_v13 = vrot.slane %v3155_v48, %v9672_v41  ;;  %v3248_v49 = vrot.slane %v3155_v48, %v9675_v42  ;;  %v3252_v15 = vrot.slane %v3155_v48, %v9680_v47  ;;  %v3256_v58 = vrot.slane %v3155_v48, %v9729_v0  ;;  %7128 = vmatpush1.bf16.msra.mxu0 %v8666_v54 }
 0x228   :  { %v2720_v60 = vrot.slane %v2719_v12, 1  ;;  %v3228_v50 = vrot.slane %v3155_v48, %v9732_v6  ;;  %7169 = vmatpush1.bf16.msra.mxu1 %v8669_v20  ;;  %7129 = vmatprep.subr.bf16.mxu0 %v8674_v40  ;;  %9262 = vrsqrt.f32 %v2882_v5  ;;  %v3240_v9 = vrot.slane %v3155_v48, %v9741_v34  ;;  %v10459_v40 = vld [vmem:[#allocation20_spill] sm:$0xff]  ;;  %v8696_v5 = vld [vmem:[#allocation8 + $0x4a0] ss:$8 sps:$4 sm:$0xff]  }
 0x229   :  { %v3341_v53 = vmul.f32 %v3244_v13, %v10021_v55  ;;  %v3342_v61 = vmul.f32 %v3248_v49, %v10029_v14  ;;  %v3343_v63 = vmul.f32 %v3252_v15, %v10027_v2  ;;  %v3344_v57 = vmul.f32 %v3256_v58, %v10045_v30  ;;  %7170 = vmatprep.subr.bf16.mxu1 %v8677_v23  ;;  %v8683_v14 = vld [vmem:[#allocation8 + $0x574] ss:$8 sps:$4 sm:$0xff]   ;;  %v10461_v23 = vld [vmem:[#allocation19_spill] sm:$0xff] }
 0x22a   :  { %v10150_v44 = vmul.f32 %v3256_v58, %v10002_v31  ;;  %v2721_v38 = vadd.f32 %v2720_v60, %v2719_v12  ;;  %v3232_v2 = vrot.slane %v3155_v48, %v9735_v1  ;;  %v3236_v30 = vrot.slane %v3155_v48, %v9738_v7  ;;  %v8681_v48 = vld [vmem:[#allocation8 + $0x570] ss:$8 sps:$4 sm:$0xff]  }
 0x22b   :  { %v3485_v21 = vcombine.low %v3341_v53, %v3342_v61  ;;  %v3486_v55 = vcombine.low %v3343_v63, %v3344_v57  ;;  %v3337_v31 = vmul.f32 %v3228_v50, %v9902_v45  ;;  %v10157_v29 = vmul.f32 %v3228_v50, %v10458_v59  ;;  %7130 = vmatpush1.bf16.msra.mxu0 %v8672_v26  ;;  %v8686_v45 = vld [vmem:[#allocation8 + $0x484] ss:$8 sps:$4 sm:$0xff]   ;;  %v8684_v61 = vld [vmem:[#allocation8 + $0x480] ss:$8 sps:$4 sm:$0xff]   ;;  %v10463_v26 = vld [vmem:[#allocation16_spill] sm:$0xff] }
 0x22c   :  { %v2773_v24 = vmul.f32 0.125, %v2721_v38  ;;  %v3338_v18 = vmul.f32 %v3232_v2, %v9906_v19  ;;  %v10167_v25 = vmul.f32 %v3236_v30, %v9904_v62  ;;  %7171 = vmatpush1.bf16.msra.mxu1 %v8675_v37  ;;  %7131 = vmatprep.subr.bf16.mxu0 %v8680_v43  ;;  %9264 = vrsqrt.f32 %v2883_v39  ;;  %v8689_v19 = vld [vmem:[#allocation8 + $0x584] ss:$8 sps:$4 sm:$0xff]   ;;  %v10460_v62 = vld [vmem:[#allocation21_spill] sm:$0xff] }
 0x22d   :  { %v10160_v11 = vrot.slane %v3485_v21, %v9621_v8  ;;  %v10163_v51 = vrot.slane %v3486_v55, %v9621_v8  ;;  %v10170_v20 = vmul.f32 %v3240_v9, %v9921_v27  ;;  %v10173_v17 = vmul.f32 %v3232_v2, %v10459_v40  ;;  %7172 = vmatprep.subr.bf16.mxu1 %v8683_v14  ;;  %v8687_v63 = vld [vmem:[#allocation8 + $0x580] ss:$8 sps:$4 sm:$0xff]   ;;  %v8692_v39 = vld [vmem:[#allocation8 + $0x494] ss:$8 sps:$4 sm:$0xff]  }
 0x22e   :  { %v2837_v54 = vsub.f32 %v2773_v24, %v2805_v3  ;;  %v3483_v12 = vcombine.low %v3337_v31, %v3338_v18  ;;  %v10178_v58 = vmul.f32 %v3240_v9, %v10460_v62  ;;  %v10181_v60 = vmul.f32 %v3236_v30, %v10461_v23  ;;  %v8693_v62 = vld [vmem:[#allocation8 + $0x590] ss:$8 sps:$4 sm:$0xff]   ;;  %v8698_v23 = vld [vmem:[#allocation8 + $0x4a4] ss:$8 sps:$4 sm:$0xff]  }
 0x22f   :  { %v3484_v27 = vcombine.low %v10167_v25, %v10170_v20  ;;  %v10186_v3 = vmul.f32 %v3248_v49, %v9991_v10  ;;  %v10189_v53 = vmul.f32 %v3244_v13, %v9979_v32  ;;  %7132 = vmatpush1.bf16.msra.mxu0 %v8678_v33  ;;  %v10194_v37 = vmul.f32 %v3252_v15, %v10463_v26  ;;  %v10196_v43 = vpop.eup %9260  ;;  %v8695_v15 = vld [vmem:[#allocation8 + $0x594] ss:$8 sps:$4 sm:$0xff]  }
 0x230   :  { %v2884_v50 = vadd.f32 1e-05, %v2837_v54  ;;  %v10191_v57 = vpop.f32.mrb[28].mxu0  ;;  %7173 = vmatpush1.bf16.msra.mxu1 %v8681_v48  ;;  %7133 = vmatprep.subr.bf16.mxu0 %v8686_v45  ;;  %v10201_v13 = vpop.f32.mrb[28].mxu1  ;;  %v10206_v38 = vrot.slane %v3483_v12, %v9621_v8  ;;  %v8690_v45 = vld [vmem:[#allocation8 + $0x490] ss:$8 sps:$4 sm:$0xff]  }
 0x231   :  { %10462 = vst [vmem:[#allocation18_spill] sm:$0xff] %v10191_v57  ;;  %v2465_v10 = vrot.slane %v10191_v57, 4  ;;  %v2550_v32 = vmul.f32 %v10191_v57, %v10191_v57  ;;  %10464 = vst [vmem:[#allocation20_spill] sm:$0xff] %v10201_v13  ;;  %v10203_v49 = vpop.f32.mrb[29].mxu0  ;;  %7174 = vmatprep.subr.bf16.mxu1 %v8689_v19  ;;  %v2477_v21 = vrot.slane %v10201_v13, 4  ;;  %v2552_v55 = vmul.f32 %v10201_v13, %v10201_v13  ;;  %v10214_v30 = vpop.f32.mrb[29].mxu1 }
 0x232   :  { %9266 = vrsqrt.f32 %v2884_v50  ;;  %10465 = vst [vmem:[#allocation21_spill] sm:$0xff] %v10203_v49  ;;  %v2471_v14 = vrot.slane %v10203_v49, 4  ;;  %v2551_v2 = vmul.f32 %v10203_v49, %v10203_v49  ;;  %v2253_v24 = vpop.f32.mrb[30].mxu0  ;;  %v9263_v9 = vpop.eup %9262  ;;  %v2483_v33 = vrot.slane %v10214_v30, 4 }
 0x233   :  { %v2466_v31 = vadd.f32 %v2465_v10, %v10191_v57  ;;  %v2722_v59 = vrot.slane %v2550_v32, 4  ;;  %v10220_v18 = vmul.f32 %v10214_v30, %v10214_v30  ;;  %v2254_v25 = vpop.f32.mrb[31].mxu0  ;;  %v2294_v48 = vpop.f32.mrb[30].mxu1  ;;  %7134 = vmatpush1.bf16.msra.mxu0 %v8684_v61  ;;  %v3100_v54 = vcombine.low %v10196_v43, %v9263_v9  ;;  %v8701_v61 = vld [vmem:[#allocation8 + $0x5a4] ss:$8 sps:$4 sm:$0xff]  }
 0x234   :  { %v2478_v20 = vadd.f32 %v2477_v21, %v10201_v13  ;;  %v2734_v40 = vrot.slane %v2552_v55, 4  ;;  %v2472_v19 = vadd.f32 %v2471_v14, %v10203_v49  ;;  %v2295_v12 = vpop.f32.mrb[31].mxu1  ;;  %7175 = vmatpush1.bf16.msra.mxu1 %v8687_v63  ;;  %7135 = vmatprep.subr.bf16.mxu0 %v8692_v39  ;;  %v2728_v10 = vrot.slane %v2551_v2, 4 }
 0x235   :  { %v2467_v50 = vrot.slane %v2466_v31, 2  ;;  %v2723_v26 = vadd.f32 %v2722_v59, %v2550_v32  ;;  %v2484_v24 = vadd.f32 %v2483_v33, %v10214_v30  ;;  %7176 = vmatprep.subr.bf16.mxu1 %v8695_v15  ;;  %v10227_v21 = vrot.slane %v3484_v27, %v9621_v8  ;;  %v8699_v15 = vld [vmem:[#allocation8 + $0x5a0] ss:$8 sps:$4 sm:$0xff]  }
 0x236   :  { %v2479_v25 = vrot.slane %v2478_v20, 2  ;;  %v2735_v48 = vadd.f32 %v2734_v40, %v2552_v55  ;;  %v2473_v43 = vrot.slane %v2472_v19, 2  ;;  %v9265_v9 = vpop.eup %9264  ;;  %v2729_v63 = vadd.f32 %v2728_v10, %v2551_v2  ;;  %v8704_v55 = vld [vmem:[#allocation8 + $0x4b4] ss:$8 sps:$4 sm:$0xff]  }
 0x237   :  { %v2468_v14 = vadd.f32 %v2467_v50, %v2466_v31  ;;  %v2724_v12 = vrot.slane %v2723_v26, 2  ;;  %v2485_v39 = vrot.slane %v2484_v24, 2  ;;  %7136 = vmatpush1.bf16.msra.mxu0 %v8690_v45  ;;  %v2740_v33 = vrot.slane %v10220_v18, 4  ;;  %v8707_v31 = vld [vmem:[#allocation8 + $0x5b4] ss:$8 sps:$4 sm:$0xff]  }
 0x238   :  { %v2480_v16 = vadd.f32 %v2479_v25, %v2478_v20  ;;  %v2736_v32 = vrot.slane %v2735_v48, 2  ;;  %v2474_v59 = vadd.f32 %v2473_v43, %v2472_v19  ;;  %7177 = vmatpush1.bf16.msra.mxu1 %v8693_v62  ;;  %7137 = vmatprep.subr.bf16.mxu0 %v8698_v23  ;;  %v2730_v27 = vrot.slane %v2729_v63, 2  ;;  %v8702_v23 = vld [vmem:[#allocation8 + $0x4b0] ss:$8 sps:$4 sm:$0xff]  }
 0x239   :  { %v2469_v40 = vrot.slane %v2468_v14, 1  ;;  %v2725_v13 = vadd.f32 %v2724_v12, %v2723_v26  ;;  %v2486_v57 = vadd.f32 %v2485_v39, %v2484_v24  ;;  %7178 = vmatprep.subr.bf16.mxu1 %v8701_v61  ;;  %v10231_v2 = vrot.slane %v3100_v54, %v9621_v8  ;;  %v8705_v24 = vld [vmem:[#allocation8 + $0x5b0] ss:$8 sps:$4 sm:$0xff]   ;;  %v8710_v61 = vld [vmem:[#allocation8 + $0x4c4] ss:$8 sps:$4 sm:$0xff]  }
 0x23a   :  { %v2481_v45 = vrot.slane %v2480_v16, 1  ;;  %v2737_v50 = vadd.f32 %v2736_v32, %v2735_v48  ;;  %v2475_v20 = vrot.slane %v2474_v59, 1  ;;  %v2731_v43 = vadd.f32 %v2730_v27, %v2729_v63  ;;  %v8711_v27 = vld [vmem:[#allocation8 + $0x5c0] ss:$8 sps:$4 sm:$0xff]  }
 0x23b   :  { %v2470_v19 = vadd.f32 %v2469_v40, %v2468_v14  ;;  %v2726_v25 = vrot.slane %v2725_v13, 1  ;;  %v2487_v62 = vrot.slane %v2486_v57, 1  ;;  %7138 = vmatpush1.bf16.msra.mxu0 %v8696_v5  ;;  %v2741_v32 = vadd.f32 %v2740_v33, %v10220_v18  ;;  %v8713_v5 = vld [vmem:[#allocation8 + $0x5c4] ss:$8 sps:$4 sm:$0xff]   ;;  %v8708_v18 = vld [vmem:[#allocation8 + $0x4c0] ss:$8 sps:$4 sm:$0xff]  }
 0x23c   :  { %v9267_v10 = vpop.eup %9266  ;;  %v2482_v36 = vadd.f32 %v2481_v45, %v2480_v16  ;;  %v2738_v26 = vrot.slane %v2737_v50, 1  ;;  %v2476_v12 = vadd.f32 %v2475_v20, %v2474_v59  ;;  %7179 = vmatpush1.bf16.msra.mxu1 %v8699_v15  ;;  %7139 = vmatprep.subr.bf16.mxu0 %v8704_v55  ;;  %v2732_v48 = vrot.slane %v2731_v43, 1 }
 0x23d   :  { %v3101_v49 = vcombine.low %v9265_v9, %v9267_v10  ;;  %v10233_v54 = vmul.f32 0.125, %v2470_v19  ;;  %v2727_v39 = vadd.f32 %v2726_v25, %v2725_v13  ;;  %7180 = vmatprep.subr.bf16.mxu1 %v8707_v31  ;;  %v2488_v40 = vadd.f32 %v2487_v62, %v2486_v57  ;;  %v8716_v31 = vld [vmem:[#allocation8 + $0x4d4] ss:$8 sps:$4 sm:$0xff]   ;;  %v8714_v62 = vld [vmem:[#allocation8 + $0x4d0] ss:$8 sps:$4 sm:$0xff]  }
 0x23e   :  { %v10239_v63 = vmul.f32 0.125, %v2482_v36  ;;  %v2739_v16 = vadd.f32 %v2738_v26, %v2737_v50  ;;  %v10241_v9 = vmul.f32 0.125, %v2476_v12  ;;  %v2733_v55 = vadd.f32 %v2732_v48, %v2731_v43  ;;  %v8719_v19 = vld [vmem:[#allocation8 + $0x5d4] ss:$8 sps:$4 sm:$0xff]   ;;  %v2854_v48 = vld [vmem:[#allocation7 + $0x21] ss:$2 sm:$0xff] }
 0x23f   :  { %v10237_v14 = vrot.slane %v3101_v49, %v9621_v8  ;;  %v2774_v59 = vmul.f32 0.125, %v2727_v39  ;;  %v2806_v15 = vmul.f32 %v10233_v54, %v10233_v54  ;;  %7140 = vmatpush1.bf16.msra.mxu0 %v8702_v23  ;;  %v2742_v20 = vrot.slane %v2741_v32, 2  ;;  %v8722_v39 = vld [vmem:[#allocation8 + $0x4e4] ss:$8 sps:$4 sm:$0xff]  }
 0x240   :  { %v2776_v33 = vmul.f32 0.125, %v2739_v16  ;;  %v2808_v49 = vmul.f32 %v10239_v63, %v10239_v63  ;;  %v2807_v36 = vmul.f32 %v10241_v9, %v10241_v9  ;;  %7181 = vmatpush1.bf16.msra.mxu1 %v8705_v24  ;;  %7141 = vmatprep.subr.bf16.mxu0 %v8710_v61  ;;  %v2775_v50 = vmul.f32 0.125, %v2733_v55  ;;  %v8717_v61 = vld [vmem:[#allocation8 + $0x5d0] ss:$8 sps:$4 sm:$0xff]  }
 0x241   :  { %v3132_v13 = vcombine.low %v10231_v2, %v10237_v14  ;;  %v2838_v45 = vsub.f32 %v2774_v59, %v2806_v15  ;;  %v10466_v57 = vcombine.low %v10160_v11, %v10163_v51  ;;  %7182 = vmatprep.subr.bf16.mxu1 %v8713_v5  ;;  %v3515_v43 = vcombine.low %v10206_v38, %v10227_v21  ;;  %v8725_v38 = vld [vmem:[#allocation8 + $0x5e4] ss:$8 sps:$4 sm:$0xff]   ;;  %v8720_v15 = vld [vmem:[#allocation8 + $0x4e0] ss:$8 sps:$4 sm:$0xff]  }
 0x242   :  { %v2840_v25 = vsub.f32 %v2776_v33, %v2808_v49  ;;  %v2839_v26 = vsub.f32 %v2775_v50, %v2807_v36  ;;  %v10257_v12 = vmul.f32 0.125, %v2488_v40  ;;  %v2743_v24 = vadd.f32 %v2742_v20, %v2741_v32  ;;  %v8723_v40 = vld [vmem:[#allocation8 + $0x5e0] ss:$8 sps:$4 sm:$0xff]   ;;  %v8728_v33 = vld [vmem:[#allocation8 + $0x4f4] ss:$8 sps:$4 sm:$0xff]  }
 0x243   :  { %v3530_v10 = vrot.slane %v10466_v57, %v9621_v8  ;;  %v2885_v23 = vadd.f32 1e-05, %v2838_v45  ;;  %7142 = vmatpush1.bf16.msra.mxu0 %v8708_v18  ;;  %v3523_v16 = vrot.slane %v3515_v43, %v9621_v8  ;;  %v3825_v49 = vmax.f32 %v10071_v28, 0.0  ;;  %v8731_v36 = vld [vmem:[#allocation8 + $0x5f4] ss:$8 sps:$4 sm:$0xff]  }
 0x244   :  { %7183 = vmatpush1.bf16.msra.mxu1 %v8711_v27  ;;  %7143 = vmatprep.subr.bf16.mxu0 %v8716_v31  ;;  %v2887_v11 = vadd.f32 1e-05, %v2840_v25  ;;  %v2886_v51 = vadd.f32 1e-05, %v2839_v26  ;;  %v2744_v5 = vrot.slane %v2743_v24, 1  ;;  %v2809_v32 = vmul.f32 %v10257_v12, %v10257_v12 }
 0x245   :  { %9268 = vrsqrt.f32 %v2885_v23  ;;  %7184 = vmatprep.subr.bf16.mxu1 %v8719_v19  ;;  %v3531_v21 = vcombine.low %v3523_v16, %v3530_v10  ;;  %v8726_v25 = vld [vmem:[#allocation8 + $0x4f0] ss:$8 sps:$4 sm:$0xff]   ;;  %v8770_v2 = vld [vmem:[#allocation8 + $0x664] ss:$8 sps:$4 sm:$0xff]  }
 0x246   :  { %9270 = vrsqrt.f32 %v2886_v51  ;;  %v2745_v59 = vadd.f32 %v2744_v5, %v2743_v24  ;;  %v8729_v24 = vld [vmem:[#allocation8 + $0x5f0] ss:$8 sps:$4 sm:$0xff]   ;;  %v8732_v51 = vld [vmem:[#allocation8 + $0x600] ss:$8 sps:$4 sm:$0xff]  }
 0x247   :  { %7144 = vmatpush1.bf16.msra.mxu0 %v8714_v62  ;;  %v3587_v55 = vsub.f32 %v2854_v48, %v3531_v21  ;;  %9272 = vrsqrt.f32 %v2887_v11  ;;  %v8737_v48 = vld [vmem:[#allocation8 + $0x704] ss:$8 sps:$4 sm:$0xff]   ;;  %v3830_v11 = vmax.f32 %v10077_v4, 0.0  ;;  %v8743_v4 = vld [vmem:[#allocation8 + $0x714] ss:$8 sps:$4 sm:$0xff]  }
 0x248   :  { %7185 = vmatpush1.bf16.msra.mxu1 %v8717_v61  ;;  %7145 = vmatprep.subr.bf16.mxu0 %v8722_v39  ;;  %v2777_v18 = vmul.f32 0.125, %v2745_v59  ;;  %v8734_v61 = vld [vmem:[#allocation8 + $0x604] ss:$8 sps:$4 sm:$0xff]  }
 0x249   :  { %7186 = vmatprep.subr.bf16.mxu1 %v8725_v38  ;;  %v3696_v27 = vrot.slane %v3587_v55, %v9735_v1  ;;  %v3704_v31 = vrot.slane %v3587_v55, %v9741_v34  ;;  %v3692_v45 = vrot.slane %v3587_v55, %v9732_v6  ;;  %v3700_v50 = vrot.slane %v3587_v55, %v9738_v7 }
 0x24a   :  { %v2841_v20 = vsub.f32 %v2777_v18, %v2809_v32  ;;  %v3712_v57 = vrot.slane %v3587_v55, %v9675_v42  ;;  %v3720_v10 = vrot.slane %v3587_v55, %v9729_v0  ;;  %v3708_v19 = vrot.slane %v3587_v55, %v9672_v41  ;;  %v8746_v18 = vld [vmem:[#allocation8 + $0x624] ss:$8 sps:$4 sm:$0xff]  }
 0x24b   :  { %7146 = vmatpush1.bf16.msra.mxu0 %v8720_v15  ;;  %v10271_v28 = vadd.f32 %v3696_v27, %v10173_v17  ;;  %v10274_v43 = vadd.f32 %v3704_v31, %v10178_v58  ;;  %v10277_v62 = vadd.f32 %v3692_v45, %v10157_v29  ;;  %v10280_v23 = vadd.f32 %v3700_v50, %v10181_v60  ;;  %v8752_v27 = vld [vmem:[#allocation8 + $0x634] ss:$8 sps:$4 sm:$0xff]  }
 0x24c   :  { %7187 = vmatpush1.bf16.msra.mxu1 %v8723_v40  ;;  %v2888_v26 = vadd.f32 1e-05, %v2841_v20  ;;  %7147 = vmatprep.subr.bf16.mxu0 %v8728_v33  ;;  %v10283_v39 = vadd.f32 %v3712_v57, %v10186_v3  ;;  %v10286_v17 = vadd.f32 %v3720_v10, %v10150_v44  ;;  %v10289_v58 = vadd.f32 %v3708_v19, %v10189_v53  ;;  %v8735_v53 = vld [vmem:[#allocation8 + $0x700] ss:$8 sps:$4 sm:$0xff]   ;;  %v8741_v40 = vld [vmem:[#allocation8 + $0x710] ss:$8 sps:$4 sm:$0xff]  }
 0x24d   :  { %7188 = vmatprep.subr.bf16.mxu1 %v8731_v36  ;;  %v3827_v29 = vmax.f32 %v10074_v52, 0.0  ;;  %v3716_v60 = vrot.slane %v3587_v55, %v9680_v47  ;;  %v3832_v3 = vmax.f32 %v10080_v46, 0.0  ;;  %v3857_v44 = vpack.c.bf16 %v3825_v49, %v3825_v49  ;;  %v8740_v52 = vld [vmem:[#allocation8 + $0x614] ss:$8 sps:$4 sm:$0xff]   ;;  %v8738_v46 = vld [vmem:[#allocation8 + $0x610] ss:$8 sps:$4 sm:$0xff]  }
 0x24e   :  { %9274 = vrsqrt.f32 %v2888_v26  ;;  %v3862_v15 = vpack.c.bf16 %v3830_v11, %v3830_v11  ;;  %v8749_v33 = vld [vmem:[#allocation8 + $0x724] ss:$8 sps:$4 sm:$0xff]   ;;  %v8744_v49 = vld [vmem:[#allocation8 + $0x620] ss:$8 sps:$4 sm:$0xff]   ;;  %v8755_v50 = vld [vmem:[#allocation8 + $0x734] ss:$8 sps:$4 sm:$0xff]  }
 0x24f   :  { %v9269_v16 = vpop.eup %9268  ;;  %7148 = vmatpush1.bf16.msra.mxu0 %v8726_v25  ;;  %v3859_v21 = vpack.c.bf16 %v3827_v29, %v3827_v29  ;;  %v10296_v59 = vadd.f32 %v3716_v60, %v10194_v37  ;;  %v3864_v55 = vpack.c.bf16 %v3832_v3, %v3832_v3  ;;  %v8747_v36 = vld [vmem:[#allocation8 + $0x720] ss:$8 sps:$4 sm:$0xff]   ;;  %v8750_v57 = vld [vmem:[#allocation8 + $0x630] ss:$8 sps:$4 sm:$0xff]   ;;  %v8758_v19 = vld [vmem:[#allocation8 + $0x644] ss:$8 sps:$4 sm:$0xff]  }
 0x250   :  { %v9271_v5 = vpop.eup %9270  ;;  %7189 = vmatpush1.bf16.msra.mxu1 %v8729_v24  ;;  %7199 = vmatprep.subr.bf16.mxu0 %v8734_v61  ;;  %v8753_v10 = vld [vmem:[#allocation8 + $0x730] ss:$8 sps:$4 sm:$0xff]   ;;  %v8761_v26 = vld [vmem:[#allocation8 + $0x744] ss:$8 sps:$4 sm:$0xff]   ;;  %v3140_v24 = vrot.slane %v3132_v13, %v9621_v8  ;;  %v8756_v29 = vld [vmem:[#allocation8 + $0x640] ss:$8 sps:$4 sm:$0xff]  }
 0x251   :  { %v3102_v38 = vcombine.low %v9269_v16, %v9271_v5  ;;  %7240 = vmatprep.subr.bf16.mxu1 %v8737_v48  ;;  %v9273_v32 = vpop.eup %9272  ;;  %v2848_v48 = vld [vmem:[#allocation7 + $0x30] ss:$2 sm:$0xff]  ;;  %v8759_v60 = vld [vmem:[#allocation8 + $0x740] ss:$8 sps:$4 sm:$0xff]  }
 0x252   :  { %7150 = vmatmul.mubr.bf16.vlgmr.msra.gmra.mrb[40].mxu0 %v3857_v44  ;;  %v8764_v16 = vld [vmem:[#allocation8 + $0x654] ss:$8 sps:$4 sm:$0xff]   ;;  %v8762_v5 = vld [vmem:[#allocation8 + $0x650] ss:$8 sps:$4 sm:$0xff]  }
 0x253   :  { %7191 = vmatmul.mubr.bf16.vlgmr.msra.gmra.mrb[40].mxu1 %v3859_v21  ;;  %7200 = vmatpush1.bf16.msra.mxu0 %v8732_v51  ;;  %v3124_v31 = vrot.slane %v3102_v38, %v9621_v8  ;;  %v8767_v51 = vld [vmem:[#allocation8 + $0x754] ss:$8 sps:$4 sm:$0xff]   ;;  %v8765_v44 = vld [vmem:[#allocation8 + $0x750] ss:$8 sps:$4 sm:$0xff]   ;;  %v8773_v21 = vld [vmem:[#allocation8 + $0x764] ss:$8 sps:$4 sm:$0xff]  }
 0x254   :  { %7231 = vmatprep.mubr.bf16.mxu0 %v3862_v15  ;;  %7241 = vmatpush1.bf16.msra.mxu1 %v8735_v53 }
 0x255   :  { %7272 = vmatprep.mubr.bf16.mxu1 %v3864_v55  ;;  %7201 = vmatprep.subr.bf16.mxu0 %v8740_v52 }
 0x256   :  { %7242 = vmatprep.subr.bf16.mxu1 %v8743_v4 }
 0x257   :  { %7202 = vmatpush1.bf16.msra.mxu0 %v8738_v46 }
 0x258   :  { %v9275_v37 = vpop.eup %9274  ;;  %7243 = vmatpush1.bf16.msra.mxu1 %v8741_v40  ;;  %7203 = vmatprep.subr.bf16.mxu0 %v8746_v18 }
 0x259   :  { %v3103_v45 = vcombine.low %v9273_v32, %v9275_v37  ;;  %7244 = vmatprep.subr.bf16.mxu1 %v8749_v33  ;;  %v8768_v33 = vld [vmem:[#allocation8 + $0x660] ss:$8 sps:$4 sm:$0xff]  }
 0x25a   :  { %v8771_v37 = vld [vmem:[#allocation8 + $0x760] ss:$8 sps:$4 sm:$0xff]  }
 0x25b   :  { %v3131_v20 = vrot.slane %v3103_v45, %v9621_v8  ;;  %7204 = vmatpush1.bf16.msra.mxu0 %v8744_v49 }
 0x25c   :  { %7245 = vmatpush1.bf16.msra.mxu1 %v8747_v36  ;;  %7205 = vmatprep.subr.bf16.mxu0 %v8752_v27  ;;  %v8776_v36 = vld [vmem:[#allocation8 + $0x674] ss:$8 sps:$4 sm:$0xff]  }
 0x25d   :  { %v3133_v25 = vcombine.low %v3124_v31, %v3131_v20  ;;  %7246 = vmatprep.subr.bf16.mxu1 %v8755_v50 }
 0x25f   :  { %v3147_v61 = vrot.slane %v3133_v25, %v9621_v8  ;;  %7206 = vmatpush1.bf16.msra.mxu0 %v8750_v57  ;;  %v10468_v57 = vld [vmem:[#allocation24_spill] sm:$0xff]  ;;  %v10470_v25 = vld [vmem:[#allocation22_spill] sm:$0xff] }
 0x260   :  { %7247 = vmatpush1.bf16.msra.mxu1 %v8753_v10  ;;  %7207 = vmatprep.subr.bf16.mxu0 %v8758_v19  ;;  %v10469_v10 = vld [vmem:[#allocation25_spill] sm:$0xff] }
 0x261   :  { %v3148_v11 = vcombine.low %v3140_v24, %v3147_v61  ;;  %7248 = vmatprep.subr.bf16.mxu1 %v8761_v26 }
 0x263   :  { %v3156_v3 = vmul.f32 %v3148_v11, %v2848_v48  ;;  %7208 = vmatpush1.bf16.msra.mxu0 %v8756_v29  ;;  %v10471_v29 = vld [vmem:[#allocation23_spill] sm:$0xff]  ;;  %v10472_v11 = vld [vmem:[#allocation21_spill] sm:$0xff] }
 0x264   :  { %7249 = vmatpush1.bf16.msra.mxu1 %v8759_v60  ;;  %7209 = vmatprep.subr.bf16.mxu0 %v8764_v16  ;;  %v8782_v60 = vld [vmem:[#allocation8 + $0x684] ss:$8 sps:$4 sm:$0xff]  }
 0x265   :  { %v3276_v14 = vrot.slane %v3156_v3, %v9672_v41  ;;  %v3280_v13 = vrot.slane %v3156_v3, %v9675_v42  ;;  %v3284_v53 = vrot.slane %v3156_v3, %v9680_v47  ;;  %v3288_v38 = vrot.slane %v3156_v3, %v9729_v0  ;;  %7250 = vmatprep.subr.bf16.mxu1 %v8767_v51 }
 0x266   :  { %v3260_v52 = vrot.slane %v3156_v3, %v9732_v6  ;;  %v3264_v32 = vrot.slane %v3156_v3, %v9735_v1  ;;  %v3268_v15 = vrot.slane %v3156_v3, %v9738_v7  ;;  %v3272_v4 = vrot.slane %v3156_v3, %v9741_v34  ;;  %v10473_v3 = vld [vmem:[#allocation18_spill] sm:$0xff] }
 0x267   :  { %v3349_v55 = vmul.f32 %v3276_v14, %v10233_v54  ;;  %v3350_v46 = vmul.f32 %v3280_v13, %v10241_v9  ;;  %v3351_v40 = vmul.f32 %v3284_v53, %v10239_v63  ;;  %v3352_v18 = vmul.f32 %v3288_v38, %v10257_v12  ;;  %7210 = vmatpush1.bf16.msra.mxu0 %v8762_v5  ;;  %v8779_v9 = vld [vmem:[#allocation8 + $0x774] ss:$8 sps:$4 sm:$0xff]   ;;  %v10467_v12 = vld [vmem:[#allocation26_spill] sm:$0xff] }
 0x268   :  { %v10318_v49 = vmul.f32 %v3288_v38, %v10214_v30  ;;  %7251 = vmatpush1.bf16.msra.mxu1 %v8765_v44  ;;  %7211 = vmatprep.subr.bf16.mxu0 %v8770_v2  ;;  %v3345_v27 = vmul.f32 %v3260_v52, %v10113_v22  ;;  %v3346_v31 = vmul.f32 %v3264_v32, %v10118_v56  ;;  %v8774_v56 = vld [vmem:[#allocation8 + $0x670] ss:$8 sps:$4 sm:$0xff]   ;;  %v8785_v2 = vld [vmem:[#allocation8 + $0x784] ss:$8 sps:$4 sm:$0xff]  }
 0x269   :  { %v3534_v54 = vcombine.low %v3349_v55, %v3350_v46  ;;  %v3535_v45 = vcombine.low %v3351_v40, %v3352_v18  ;;  %7252 = vmatprep.subr.bf16.mxu1 %v8773_v21  ;;  %v3347_v63 = vmul.f32 %v3268_v15, %v10116_v35  ;;  %v3348_v50 = vmul.f32 %v3272_v4, %v10467_v12  ;;  %v8777_v35 = vld [vmem:[#allocation8 + $0x770] ss:$8 sps:$4 sm:$0xff]   ;;  %v8783_v55 = vld [vmem:[#allocation8 + $0x780] ss:$8 sps:$4 sm:$0xff]   ;;  %v8788_v46 = vld [vmem:[#allocation8 + $0x694] ss:$8 sps:$4 sm:$0xff]  }
 0x26a   :  { %v3532_v20 = vcombine.low %v3345_v27, %v3346_v31  ;;  %v3614_v30 = vmul.f32 %v3264_v32, %v10468_v57  ;;  %v3616_v19 = vmul.f32 %v3272_v4, %v10469_v10  ;;  %v3613_v26 = vmul.f32 %v3260_v52, %v10470_v25  ;;  %v10474_v21 = vld [vmem:[#allocation20_spill] sm:$0xff]  ;;  %v8792_v31 = vld [vmem:[#allocation8 + $0x6a0] ss:$8 sps:$4 sm:$0xff]  }
 0x26b   :  { %v3556_v24 = vrot.slane %v3534_v54, %v9621_v8  ;;  %v3563_v22 = vrot.slane %v3535_v45, %v9621_v8  ;;  %7212 = vmatpush1.bf16.msra.mxu0 %v8768_v33  ;;  %v3533_v61 = vcombine.low %v3347_v63, %v3348_v50  ;;  %v3615_v48 = vmul.f32 %v3268_v15, %v10471_v29  ;;  %v8780_v15 = vld [vmem:[#allocation8 + $0x680] ss:$8 sps:$4 sm:$0xff]   ;;  %v2856_v40 = vld [vmem:[#allocation7 + $0x31] ss:$2 sm:$0xff] }
 0x26c   :  { %7253 = vmatpush1.bf16.msra.mxu1 %v8771_v37  ;;  %7213 = vmatprep.subr.bf16.mxu0 %v8776_v36  ;;  %v3542_v16 = vrot.slane %v3532_v20, %v9621_v8  ;;  %v3618_v51 = vmul.f32 %v3280_v13, %v10472_v11  ;;  %v3617_v5 = vmul.f32 %v3276_v14, %v10473_v3  ;;  %v8791_v13 = vld [vmem:[#allocation8 + $0x794] ss:$8 sps:$4 sm:$0xff]   ;;  %v8786_v18 = vld [vmem:[#allocation8 + $0x690] ss:$8 sps:$4 sm:$0xff]   ;;  %v8794_v37 = vld [vmem:[#allocation8 + $0x6a4] ss:$8 sps:$4 sm:$0xff]  }
 0x26d   :  { %v3565_v44 = vcombine.low %v3556_v24, %v3563_v22  ;;  %7254 = vmatprep.subr.bf16.mxu1 %v8779_v9  ;;  %v3549_v38 = vrot.slane %v3533_v61, %v9621_v8  ;;  %v3619_v52 = vmul.f32 %v3284_v53, %v10474_v21  ;;  %v8789_v53 = vld [vmem:[#allocation8 + $0x790] ss:$8 sps:$4 sm:$0xff]   ;;  %v8797_v36 = vld [vmem:[#allocation8 + $0x7a4] ss:$8 sps:$4 sm:$0xff]   ;;  %v8795_v63 = vld [vmem:[#allocation8 + $0x7a0] ss:$8 sps:$4 sm:$0xff]  }
 0x26e   :  { %v8800_v12 = vld [vmem:[#allocation8 + $0x6b4] ss:$8 sps:$4 sm:$0xff]   ;;  %v8804_v29 = vld [vmem:[#allocation8 + $0x6c0] ss:$8 sps:$4 sm:$0xff]   ;;  %v8821_v11 = vld [vmem:[#allocation8 + $0x7e4] ss:$8 sps:$4 sm:$0xff]  }
 0x26f   :  { %v3579_v32 = vrot.slane %v3565_v44, %v9621_v8  ;;  %7214 = vmatpush1.bf16.msra.mxu0 %v8774_v56  ;;  %v3564_v4 = vcombine.low %v3542_v16, %v3549_v38  ;;  %v8803_v10 = vld [vmem:[#allocation8 + $0x7b4] ss:$8 sps:$4 sm:$0xff]   ;;  %v8818_v16 = vld [vmem:[#allocation8 + $0x6e4] ss:$8 sps:$4 sm:$0xff]   ;;  %v8819_v3 = vld [vmem:[#allocation8 + $0x7e0] ss:$8 sps:$4 sm:$0xff]  }
 0x270   :  { %7255 = vmatpush1.bf16.msra.mxu1 %v8777_v35  ;;  %7215 = vmatprep.subr.bf16.mxu0 %v8782_v60  ;;  %v8815_v35 = vld [vmem:[#allocation8 + $0x7d4] ss:$8 sps:$4 sm:$0xff]   ;;  %v8813_v60 = vld [vmem:[#allocation8 + $0x7d0] ss:$8 sps:$4 sm:$0xff]  }
 0x271   :  { %7256 = vmatprep.subr.bf16.mxu1 %v8785_v2  ;;  %v3572_v14 = vrot.slane %v3564_v4, %v9621_v8  ;;  %v8827_v44 = vld [vmem:[#allocation8 + $0x7f4] ss:$8 sps:$4 sm:$0xff]   ;;  %v8822_v2 = vld [vmem:[#allocation8 + $0x6f0] ss:$8 sps:$4 sm:$0xff]  }
 0x272   :  { %v8825_v38 = vld [vmem:[#allocation8 + $0x7f0] ss:$8 sps:$4 sm:$0xff]  }
 0x273   :  { %7216 = vmatpush1.bf16.msra.mxu0 %v8780_v15  ;;  %v3580_v33 = vcombine.low %v3572_v14, %v3579_v32  ;;  %v10475_v21 = vld [vmem:[#allocation17_spill] sm:$0xff]  ;;  %v8830_v32 = vld [vmem:[#allocation8 + $0x804] ss:$8 sps:$4 sm:$0xff]   ;;  %v3836_v14 = vmax.f32 %v10274_v43, 0.0 }
 0x274   :  { %7257 = vmatpush1.bf16.msra.mxu1 %v8783_v55  ;;  %7217 = vmatprep.subr.bf16.mxu0 %v8788_v46  ;;  %v10476_v15 = vld [vmem:[#allocation27_spill] sm:$0xff]  ;;  %v3834_v46 = vmax.f32 %v10271_v28, 0.0 }
 0x275   :  { %7258 = vmatprep.subr.bf16.mxu1 %v8791_v13  ;;  %v3588_v27 = vsub.f32 %v2856_v40, %v3580_v33  ;;  %v3831_v4 = vmax.f32 %v10476_v15, 0.0  ;;  %v8833_v55 = vld [vmem:[#allocation8 + $0x904] ss:$8 sps:$4 sm:$0xff]   ;;  %v8828_v13 = vld [vmem:[#allocation8 + $0x800] ss:$8 sps:$4 sm:$0xff]  }
 0x276   :  { %v8837_v28 = vld [vmem:[#allocation8 + $0x910] ss:$8 sps:$4 sm:$0xff]   ;;  %v8845_v43 = vld [vmem:[#allocation8 + $0x924] ss:$8 sps:$4 sm:$0xff]  }
 0x277   :  { %7218 = vmatpush1.bf16.msra.mxu0 %v8786_v18  ;;  %v3728_v54 = vrot.slane %v3588_v27, %v9735_v1  ;;  %v3736_v45 = vrot.slane %v3588_v27, %v9741_v34  ;;  %v3724_v9 = vrot.slane %v3588_v27, %v9732_v6  ;;  %v3732_v8 = vrot.slane %v3588_v27, %v9738_v7  ;;  %v8831_v18 = vld [vmem:[#allocation8 + $0x900] ss:$8 sps:$4 sm:$0xff]   ;;  %v8873_v15 = vld [vmem:[#allocation8 + $0x970] ss:$8 sps:$4 sm:$0xff]  }
 0x278   :  { %7259 = vmatpush1.bf16.msra.mxu1 %v8789_v53  ;;  %7219 = vmatprep.subr.bf16.mxu0 %v8794_v37  ;;  %v3744_v50 = vrot.slane %v3588_v27, %v9675_v42  ;;  %v3752_v20 = vrot.slane %v3588_v27, %v9729_v0  ;;  %v3740_v57 = vrot.slane %v3588_v27, %v9672_v41  ;;  %v8798_v41 = vld [vmem:[#allocation8 + $0x6b0] ss:$8 sps:$4 sm:$0xff]   ;;  %v8836_v53 = vld [vmem:[#allocation8 + $0x814] ss:$8 sps:$4 sm:$0xff]  }
 0x279   :  { %7260 = vmatprep.subr.bf16.mxu1 %v8797_v36  ;;  %v10344_v25 = vadd.f32 %v3728_v54, %v3614_v30  ;;  %v10346_v24 = vadd.f32 %v3736_v45, %v3616_v19  ;;  %v10348_v34 = vadd.f32 %v3724_v9, %v3613_v26  ;;  %v10350_v22 = vadd.f32 %v3732_v8, %v3615_v48  ;;  %v8801_v30 = vld [vmem:[#allocation8 + $0x7b0] ss:$8 sps:$4 sm:$0xff]   ;;  %v8806_v19 = vld [vmem:[#allocation8 + $0x6c4] ss:$8 sps:$4 sm:$0xff]   ;;  %v8812_v48 = vld [vmem:[#allocation8 + $0x6d4] ss:$8 sps:$4 sm:$0xff]  }
 0x27a   :  { %v10352_v7 = vadd.f32 %v3744_v50, %v3618_v51  ;;  %v10355_v56 = vadd.f32 %v3752_v20, %v10318_v49  ;;  %v10357_v42 = vadd.f32 %v3740_v57, %v3617_v5  ;;  %v3748_v0 = vrot.slane %v3588_v27, %v9680_v47  ;;  %v8809_v26 = vld [vmem:[#allocation8 + $0x7c4] ss:$8 sps:$4 sm:$0xff]   ;;  %v8807_v49 = vld [vmem:[#allocation8 + $0x7c0] ss:$8 sps:$4 sm:$0xff]   ;;  %v8810_v47 = vld [vmem:[#allocation8 + $0x6d0] ss:$8 sps:$4 sm:$0xff]  }
 0x27b   :  { %7220 = vmatpush1.bf16.msra.mxu0 %v8792_v31  ;;  %v8816_v51 = vld [vmem:[#allocation8 + $0x6e0] ss:$8 sps:$4 sm:$0xff]   ;;  %v8824_v5 = vld [vmem:[#allocation8 + $0x6f4] ss:$8 sps:$4 sm:$0xff]   ;;  %v3863_v33 = vpack.c.bf16 %v3831_v4, %v3831_v4  ;;  %v3866_v37 = vpack.c.bf16 %v3834_v46, %v3834_v46  ;;  %v3868_v27 = vpack.c.bf16 %v3836_v14, %v3836_v14  ;;  %v8834_v31 = vld [vmem:[#allocation8 + $0x810] ss:$8 sps:$4 sm:$0xff]  }
 0x27c   :  { %7261 = vmatpush1.bf16.msra.mxu1 %v8795_v63  ;;  %7221 = vmatprep.subr.bf16.mxu0 %v8800_v12  ;;  %v10360_v61 = vadd.f32 %v3748_v0, %v3619_v52  ;;  %v3829_v52 = vmax.f32 %v10475_v21, 0.0  ;;  %v8839_v36 = vld [vmem:[#allocation8 + $0x914] ss:$8 sps:$4 sm:$0xff]   ;;  %v8842_v54 = vld [vmem:[#allocation8 + $0x824] ss:$8 sps:$4 sm:$0xff]  }
 0x27d   :  { %7262 = vmatprep.subr.bf16.mxu1 %v8803_v10  ;;  %v8840_v45 = vld [vmem:[#allocation8 + $0x820] ss:$8 sps:$4 sm:$0xff]   ;;  %v8848_v8 = vld [vmem:[#allocation8 + $0x834] ss:$8 sps:$4 sm:$0xff]   ;;  %v8846_v12 = vld [vmem:[#allocation8 + $0x830] ss:$8 sps:$4 sm:$0xff]  }
 0x27e   :  { %v3861_v40 = vpack.c.bf16 %v3829_v52, %v3829_v52  ;;  %v8843_v9 = vld [vmem:[#allocation8 + $0x920] ss:$8 sps:$4 sm:$0xff]   ;;  %v8851_v63 = vld [vmem:[#allocation8 + $0x934] ss:$8 sps:$4 sm:$0xff]   ;;  %v8849_v50 = vld [vmem:[#allocation8 + $0x930] ss:$8 sps:$4 sm:$0xff]  }
 0x27f   :  { %7222 = vmatpush1.bf16.msra.mxu0 %v8798_v41  ;;  %v8854_v20 = vld [vmem:[#allocation8 + $0x844] ss:$8 sps:$4 sm:$0xff]   ;;  %v8852_v10 = vld [vmem:[#allocation8 + $0x840] ss:$8 sps:$4 sm:$0xff]   ;;  %v8860_v41 = vld [vmem:[#allocation8 + $0x854] ss:$8 sps:$4 sm:$0xff]  }
 0x280   :  { %7263 = vmatpush1.bf16.msra.mxu1 %v8801_v30  ;;  %7223 = vmatprep.subr.bf16.mxu0 %v8806_v19  ;;  %v8857_v57 = vld [vmem:[#allocation8 + $0x944] ss:$8 sps:$4 sm:$0xff]   ;;  %v8855_v0 = vld [vmem:[#allocation8 + $0x940] ss:$8 sps:$4 sm:$0xff]   ;;  %v8863_v30 = vld [vmem:[#allocation8 + $0x954] ss:$8 sps:$4 sm:$0xff]  }
 0x281   :  { %7264 = vmatprep.subr.bf16.mxu1 %v8809_v26  ;;  %v8858_v19 = vld [vmem:[#allocation8 + $0x850] ss:$8 sps:$4 sm:$0xff]   ;;  %v8872_v21 = vld [vmem:[#allocation8 + $0x874] ss:$8 sps:$4 sm:$0xff]   ;;  %v8878_v4 = vld [vmem:[#allocation8 + $0x884] ss:$8 sps:$4 sm:$0xff]  }
 0x282   :  { %v8861_v26 = vld [vmem:[#allocation8 + $0x950] ss:$8 sps:$4 sm:$0xff]   ;;  %v8875_v52 = vld [vmem:[#allocation8 + $0x974] ss:$8 sps:$4 sm:$0xff]   ;;  %v8876_v46 = vld [vmem:[#allocation8 + $0x880] ss:$8 sps:$4 sm:$0xff]  }
 0x283   :  { %7224 = vmatpush1.bf16.msra.mxu0 %v8804_v29  ;;  %v8866_v29 = vld [vmem:[#allocation8 + $0x864] ss:$8 sps:$4 sm:$0xff]   ;;  %v8884_v14 = vld [vmem:[#allocation8 + $0x894] ss:$8 sps:$4 sm:$0xff]  }
 0x284   :  { %7265 = vmatpush1.bf16.msra.mxu1 %v8807_v49  ;;  %7225 = vmatprep.subr.bf16.mxu0 %v8812_v48 }
 0x285   :  { %7266 = vmatprep.subr.bf16.mxu1 %v8815_v35  ;;  %v8869_v35 = vld [vmem:[#allocation8 + $0x964] ss:$8 sps:$4 sm:$0xff]  }
 0x287   :  { %7226 = vmatpush1.bf16.msra.mxu0 %v8810_v47 }
 0x288   :  { %7267 = vmatpush1.bf16.msra.mxu1 %v8813_v60  ;;  %7227 = vmatprep.subr.bf16.mxu0 %v8818_v16 }
 0x289   :  { %7268 = vmatprep.subr.bf16.mxu1 %v8821_v11 }
 0x28b   :  { %7228 = vmatpush1.bf16.msra.mxu0 %v8816_v51 }
 0x28c   :  { %7269 = vmatpush1.bf16.msra.mxu1 %v8819_v3  ;;  %7229 = vmatprep.subr.bf16.mxu0 %v8824_v5  ;;  %v8864_v5 = vld [vmem:[#allocation8 + $0x860] ss:$8 sps:$4 sm:$0xff]  }
 0x28d   :  { %7270 = vmatprep.subr.bf16.mxu1 %v8827_v44 }
 0x28f   :  { %7230 = vmatpush1.bf16.msra.mxu0 %v8822_v2 }
 0x290   :  { %7271 = vmatpush1.bf16.msra.mxu1 %v8825_v38  ;;  %7281 = vmatprep.subr.bf16.mxu0 %v8830_v32  ;;  %v8867_v38 = vld [vmem:[#allocation8 + $0x960] ss:$8 sps:$4 sm:$0xff]   ;;  %v8870_v32 = vld [vmem:[#allocation8 + $0x870] ss:$8 sps:$4 sm:$0xff]  }
 0x291   :  { %7322 = vmatprep.subr.bf16.mxu1 %v8833_v55  ;;  %v8881_v55 = vld [vmem:[#allocation8 + $0x984] ss:$8 sps:$4 sm:$0xff]  }
 0x292   :  { %7232 = vmatmul.mubr.bf16.vlgmr.msra.gmra.mrb[44].mxu0 %v3861_v40  ;;  %v8887_v40 = vld [vmem:[#allocation8 + $0x994] ss:$8 sps:$4 sm:$0xff]  }
 0x293   :  { %7273 = vmatmul.mubr.bf16.vlgmr.msra.gmra.mrb[44].mxu1 %v3863_v33  ;;  %7282 = vmatpush1.bf16.msra.mxu0 %v8828_v13  ;;  %v8879_v13 = vld [vmem:[#allocation8 + $0x980] ss:$8 sps:$4 sm:$0xff]   ;;  %v8885_v33 = vld [vmem:[#allocation8 + $0x990] ss:$8 sps:$4 sm:$0xff]  }
 0x294   :  { %7313 = vmatprep.mubr.bf16.mxu0 %v3866_v37  ;;  %7323 = vmatpush1.bf16.msra.mxu1 %v8831_v18  ;;  %v8882_v18 = vld [vmem:[#allocation8 + $0x890] ss:$8 sps:$4 sm:$0xff]   ;;  %v8893_v37 = vld [vmem:[#allocation8 + $0x9a4] ss:$8 sps:$4 sm:$0xff]  }
 0x295   :  { %7354 = vmatprep.mubr.bf16.mxu1 %v3868_v27  ;;  %7283 = vmatprep.subr.bf16.mxu0 %v8836_v53  ;;  %v8890_v53 = vld [vmem:[#allocation8 + $0x8a4] ss:$8 sps:$4 sm:$0xff]   ;;  %v8891_v27 = vld [vmem:[#allocation8 + $0x9a0] ss:$8 sps:$4 sm:$0xff]  }
 0x296   :  { %7324 = vmatprep.subr.bf16.mxu1 %v8839_v36  ;;  %v8888_v36 = vld [vmem:[#allocation8 + $0x8a0] ss:$8 sps:$4 sm:$0xff]  }
 0x297   :  { %7284 = vmatpush1.bf16.msra.mxu0 %v8834_v31  ;;  %v8896_v31 = vld [vmem:[#allocation8 + $0x8b4] ss:$8 sps:$4 sm:$0xff]  }
 0x298   :  { %7325 = vmatpush1.bf16.msra.mxu1 %v8837_v28  ;;  %7285 = vmatprep.subr.bf16.mxu0 %v8842_v54  ;;  %v8899_v28 = vld [vmem:[#allocation8 + $0x9b4] ss:$8 sps:$4 sm:$0xff]   ;;  %v8894_v54 = vld [vmem:[#allocation8 + $0x8b0] ss:$8 sps:$4 sm:$0xff]  }
 0x299   :  { %7326 = vmatprep.subr.bf16.mxu1 %v8845_v43  ;;  %v8897_v43 = vld [vmem:[#allocation8 + $0x9b0] ss:$8 sps:$4 sm:$0xff]  }
 0x29b   :  { %7286 = vmatpush1.bf16.msra.mxu0 %v8840_v45  ;;  %v8902_v45 = vld [vmem:[#allocation8 + $0x8c4] ss:$8 sps:$4 sm:$0xff]  }
 0x29c   :  { %7327 = vmatpush1.bf16.msra.mxu1 %v8843_v9  ;;  %7287 = vmatprep.subr.bf16.mxu0 %v8848_v8  ;;  %v8905_v9 = vld [vmem:[#allocation8 + $0x9c4] ss:$8 sps:$4 sm:$0xff]   ;;  %v8900_v8 = vld [vmem:[#allocation8 + $0x8c0] ss:$8 sps:$4 sm:$0xff]  }
 0x29d   :  { %7328 = vmatprep.subr.bf16.mxu1 %v8851_v63  ;;  %v8903_v63 = vld [vmem:[#allocation8 + $0x9c0] ss:$8 sps:$4 sm:$0xff]  }
 0x29f   :  { %7288 = vmatpush1.bf16.msra.mxu0 %v8846_v12  ;;  %v8908_v12 = vld [vmem:[#allocation8 + $0x8d4] ss:$8 sps:$4 sm:$0xff]  }
 0x2a0   :  { %7329 = vmatpush1.bf16.msra.mxu1 %v8849_v50  ;;  %7289 = vmatprep.subr.bf16.mxu0 %v8854_v20  ;;  %v8911_v50 = vld [vmem:[#allocation8 + $0x9d4] ss:$8 sps:$4 sm:$0xff]   ;;  %v8906_v20 = vld [vmem:[#allocation8 + $0x8d0] ss:$8 sps:$4 sm:$0xff]  }
 0x2a1   :  { %7330 = vmatprep.subr.bf16.mxu1 %v8857_v57  ;;  %v8909_v57 = vld [vmem:[#allocation8 + $0x9d0] ss:$8 sps:$4 sm:$0xff]  }
 0x2a3   :  { %7290 = vmatpush1.bf16.msra.mxu0 %v8852_v10  ;;  %v8914_v10 = vld [vmem:[#allocation8 + $0x8e4] ss:$8 sps:$4 sm:$0xff]  }
 0x2a4   :  { %7331 = vmatpush1.bf16.msra.mxu1 %v8855_v0  ;;  %7291 = vmatprep.subr.bf16.mxu0 %v8860_v41  ;;  %v8917_v0 = vld [vmem:[#allocation8 + $0x9e4] ss:$8 sps:$4 sm:$0xff]   ;;  %v8912_v41 = vld [vmem:[#allocation8 + $0x8e0] ss:$8 sps:$4 sm:$0xff]  }
 0x2a5   :  { %v6987_v49 = vpop.f32.mrb[32].mxu0  ;;  %v7028_v48 = vpop.f32.mrb[32].mxu1  ;;  %7332 = vmatprep.subr.bf16.mxu1 %v8863_v30  ;;  %v8915_v30 = vld [vmem:[#allocation8 + $0x9e0] ss:$8 sps:$4 sm:$0xff]  }
 0x2a6   :  { %v10366_v47 = vadd.f32 %v7028_v48, %v6987_v49  ;;  %v6989_v60 = vpop.f32.mrb[33].mxu0  ;;  %v7030_v16 = vpop.f32.mrb[33].mxu1  ;;  %v8921_v49 = vld [vmem:[#allocation8 + $0x9f0] ss:$8 sps:$4 sm:$0xff]   ;;  %v3833_v48 = vmax.f32 %v10277_v62, 0.0 }
 0x2a7   :  { %v10368_v11 = vadd.f32 %v7030_v16, %v6989_v60  ;;  %7292 = vmatpush1.bf16.msra.mxu0 %v8858_v19  ;;  %v6991_v51 = vpop.f32.mrb[34].mxu0  ;;  %v7032_v3 = vpop.f32.mrb[34].mxu1  ;;  %v8920_v19 = vld [vmem:[#allocation8 + $0x8f4] ss:$8 sps:$4 sm:$0xff]   ;;  %v3835_v60 = vmax.f32 %v10280_v23, 0.0 }
 0x2a8   :  { %7333 = vmatpush1.bf16.msra.mxu1 %v8861_v26  ;;  %v6992_v44 = vpop.f32.mrb[35].mxu0  ;;  %v7033_v2 = vpop.f32.mrb[35].mxu1  ;;  %7293 = vmatprep.subr.bf16.mxu0 %v8866_v29  ;;  %v8923_v26 = vld [vmem:[#allocation8 + $0x9f4] ss:$8 sps:$4 sm:$0xff]   ;;  %v8918_v29 = vld [vmem:[#allocation8 + $0x8f0] ss:$8 sps:$4 sm:$0xff]  }
 0x2a9   :  { %7334 = vmatprep.subr.bf16.mxu1 %v8869_v35  ;;  %v8926_v35 = vld [vmem:[#allocation8 + $0xa04] ss:$8 sps:$4 sm:$0xff]   ;;  %v3838_v51 = vmax.f32 %v10283_v39, 0.0  ;;  %v8924_v3 = vld [vmem:[#allocation8 + $0xa00] ss:$8 sps:$4 sm:$0xff]   ;;  %v3865_v44 = vpack.c.bf16 %v3833_v48, %v3833_v48 }
 0x2aa   :  { %v8929_v16 = vld [vmem:[#allocation8 + $0xb04] ss:$8 sps:$4 sm:$0xff]   ;;  %v8927_v2 = vld [vmem:[#allocation8 + $0xb00] ss:$8 sps:$4 sm:$0xff]   ;;  %v8933_v39 = vld [vmem:[#allocation8 + $0xb10] ss:$8 sps:$4 sm:$0xff]  }
 0x2ab   :  { %7294 = vmatpush1.bf16.msra.mxu0 %v8864_v5  ;;  %v3840_v5 = vmax.f32 %v10286_v17, 0.0  ;;  %v3870_v62 = vpack.c.bf16 %v3838_v51, %v3838_v51  ;;  %v8941_v17 = vld [vmem:[#allocation8 + $0xb24] ss:$8 sps:$4 sm:$0xff]   ;;  %v8980_v51 = vld [vmem:[#allocation8 + $0xa94] ss:$8 sps:$4 sm:$0xff]  }
 0x2ac   :  { %7335 = vmatpush1.bf16.msra.mxu1 %v8867_v38  ;;  %7295 = vmatprep.subr.bf16.mxu0 %v8872_v21  ;;  %v3867_v38 = vpack.c.bf16 %v3835_v60, %v3835_v60  ;;  %v8932_v21 = vld [vmem:[#allocation8 + $0xa14] ss:$8 sps:$4 sm:$0xff]   ;;  %v8974_v48 = vld [vmem:[#allocation8 + $0xa84] ss:$8 sps:$4 sm:$0xff]   ;;  %v8972_v60 = vld [vmem:[#allocation8 + $0xa80] ss:$8 sps:$4 sm:$0xff]  }
 0x2ad   :  { %7336 = vmatprep.subr.bf16.mxu1 %v8875_v52  ;;  %v8935_v52 = vld [vmem:[#allocation8 + $0xb14] ss:$8 sps:$4 sm:$0xff]   ;;  %v3872_v23 = vpack.c.bf16 %v3840_v5, %v3840_v5  ;;  %v8978_v5 = vld [vmem:[#allocation8 + $0xa90] ss:$8 sps:$4 sm:$0xff]  }
 0x2af   :  { %7296 = vmatpush1.bf16.msra.mxu0 %v8870_v32  ;;  %v8930_v32 = vld [vmem:[#allocation8 + $0xa10] ss:$8 sps:$4 sm:$0xff]  }
 0x2b0   :  { %7337 = vmatpush1.bf16.msra.mxu1 %v8873_v15  ;;  %7297 = vmatprep.subr.bf16.mxu0 %v8878_v4  ;;  %v8938_v15 = vld [vmem:[#allocation8 + $0xa24] ss:$8 sps:$4 sm:$0xff]   ;;  %v8936_v4 = vld [vmem:[#allocation8 + $0xa20] ss:$8 sps:$4 sm:$0xff]  }
 0x2b1   :  { %7338 = vmatprep.subr.bf16.mxu1 %v8881_v55  ;;  %v8939_v55 = vld [vmem:[#allocation8 + $0xb20] ss:$8 sps:$4 sm:$0xff]  }
 0x2b3   :  { %7298 = vmatpush1.bf16.msra.mxu0 %v8876_v46  ;;  %v8944_v46 = vld [vmem:[#allocation8 + $0xa34] ss:$8 sps:$4 sm:$0xff]  }
 0x2b4   :  { %7339 = vmatpush1.bf16.msra.mxu1 %v8879_v13  ;;  %7299 = vmatprep.subr.bf16.mxu0 %v8884_v14  ;;  %v8947_v13 = vld [vmem:[#allocation8 + $0xb34] ss:$8 sps:$4 sm:$0xff]   ;;  %v8942_v14 = vld [vmem:[#allocation8 + $0xa30] ss:$8 sps:$4 sm:$0xff]  }
 0x2b5   :  { %7340 = vmatprep.subr.bf16.mxu1 %v8887_v40  ;;  %v8945_v40 = vld [vmem:[#allocation8 + $0xb30] ss:$8 sps:$4 sm:$0xff]  }
 0x2b7   :  { %7300 = vmatpush1.bf16.msra.mxu0 %v8882_v18  ;;  %v8950_v18 = vld [vmem:[#allocation8 + $0xa44] ss:$8 sps:$4 sm:$0xff]  }
 0x2b8   :  { %7341 = vmatpush1.bf16.msra.mxu1 %v8885_v33  ;;  %7301 = vmatprep.subr.bf16.mxu0 %v8890_v53  ;;  %v8953_v33 = vld [vmem:[#allocation8 + $0xb44] ss:$8 sps:$4 sm:$0xff]   ;;  %v8948_v53 = vld [vmem:[#allocation8 + $0xa40] ss:$8 sps:$4 sm:$0xff]  }
 0x2b9   :  { %7342 = vmatprep.subr.bf16.mxu1 %v8893_v37  ;;  %v8951_v37 = vld [vmem:[#allocation8 + $0xb40] ss:$8 sps:$4 sm:$0xff]  }
 0x2bb   :  { %7302 = vmatpush1.bf16.msra.mxu0 %v8888_v36  ;;  %v8956_v36 = vld [vmem:[#allocation8 + $0xa54] ss:$8 sps:$4 sm:$0xff]  }
 0x2bc   :  { %7343 = vmatpush1.bf16.msra.mxu1 %v8891_v27  ;;  %7303 = vmatprep.subr.bf16.mxu0 %v8896_v31  ;;  %v8959_v27 = vld [vmem:[#allocation8 + $0xb54] ss:$8 sps:$4 sm:$0xff]   ;;  %v8954_v31 = vld [vmem:[#allocation8 + $0xa50] ss:$8 sps:$4 sm:$0xff]  }
 0x2bd   :  { %7344 = vmatprep.subr.bf16.mxu1 %v8899_v28  ;;  %v8957_v28 = vld [vmem:[#allocation8 + $0xb50] ss:$8 sps:$4 sm:$0xff]  }
 0x2bf   :  { %7304 = vmatpush1.bf16.msra.mxu0 %v8894_v54  ;;  %v8962_v54 = vld [vmem:[#allocation8 + $0xa64] ss:$8 sps:$4 sm:$0xff]  }
 0x2c0   :  { %7345 = vmatpush1.bf16.msra.mxu1 %v8897_v43  ;;  %7305 = vmatprep.subr.bf16.mxu0 %v8902_v45  ;;  %v8965_v45 = vld [vmem:[#allocation8 + $0xb64] ss:$8 sps:$4 sm:$0xff]  }
 0x2c1   :  { %7346 = vmatprep.subr.bf16.mxu1 %v8905_v9 }
 0x2c3   :  { %7306 = vmatpush1.bf16.msra.mxu0 %v8900_v8 }
 0x2c4   :  { %7347 = vmatpush1.bf16.msra.mxu1 %v8903_v63  ;;  %7307 = vmatprep.subr.bf16.mxu0 %v8908_v12 }
 0x2c5   :  { %7348 = vmatprep.subr.bf16.mxu1 %v8911_v50 }
 0x2c7   :  { %7308 = vmatpush1.bf16.msra.mxu0 %v8906_v20 }
 0x2c8   :  { %7349 = vmatpush1.bf16.msra.mxu1 %v8909_v57  ;;  %7309 = vmatprep.subr.bf16.mxu0 %v8914_v10  ;;  %v8960_v57 = vld [vmem:[#allocation8 + $0xa60] ss:$8 sps:$4 sm:$0xff]  }
 0x2c9   :  { %7350 = vmatprep.subr.bf16.mxu1 %v8917_v0 }
 0x2cb   :  { %7310 = vmatpush1.bf16.msra.mxu0 %v8912_v41 }
 0x2cc   :  { %7351 = vmatpush1.bf16.msra.mxu1 %v8915_v30  ;;  %7311 = vmatprep.subr.bf16.mxu0 %v8920_v19  ;;  %v8963_v30 = vld [vmem:[#allocation8 + $0xb60] ss:$8 sps:$4 sm:$0xff]   ;;  %v8968_v19 = vld [vmem:[#allocation8 + $0xa74] ss:$8 sps:$4 sm:$0xff]  }
 0x2cd   :  { %7352 = vmatprep.subr.bf16.mxu1 %v8923_v26 }
 0x2cf   :  { %7312 = vmatpush1.bf16.msra.mxu0 %v8918_v29 }
 0x2d0   :  { %7353 = vmatpush1.bf16.msra.mxu1 %v8921_v49  ;;  %7363 = vmatprep.subr.bf16.mxu0 %v8926_v35  ;;  %v8966_v49 = vld [vmem:[#allocation8 + $0xa70] ss:$8 sps:$4 sm:$0xff]   ;;  %v8977_v35 = vld [vmem:[#allocation8 + $0xb84] ss:$8 sps:$4 sm:$0xff]  }
 0x2d1   :  { %7404 = vmatprep.subr.bf16.mxu1 %v8929_v16  ;;  %v8975_v16 = vld [vmem:[#allocation8 + $0xb80] ss:$8 sps:$4 sm:$0xff]  }
 0x2d2   :  { %7314 = vmatmul.mubr.bf16.vlgmr.msra.gmra.mrb[48].mxu0 %v3865_v44  ;;  %v8981_v44 = vld [vmem:[#allocation8 + $0xb90] ss:$8 sps:$4 sm:$0xff]  }
 0x2d3   :  { %7355 = vmatmul.mubr.bf16.vlgmr.msra.gmra.mrb[48].mxu1 %v3867_v38  ;;  %7364 = vmatpush1.bf16.msra.mxu0 %v8924_v3  ;;  %v8983_v3 = vld [vmem:[#allocation8 + $0xb94] ss:$8 sps:$4 sm:$0xff]   ;;  %v8989_v38 = vld [vmem:[#allocation8 + $0xba4] ss:$8 sps:$4 sm:$0xff]  }
 0x2d4   :  { %7395 = vmatprep.mubr.bf16.mxu0 %v3870_v62  ;;  %7405 = vmatpush1.bf16.msra.mxu1 %v8927_v2  ;;  %v8986_v2 = vld [vmem:[#allocation8 + $0xaa4] ss:$8 sps:$4 sm:$0xff]   ;;  %v8987_v62 = vld [vmem:[#allocation8 + $0xba0] ss:$8 sps:$4 sm:$0xff]  }
 0x2d5   :  { %7436 = vmatprep.mubr.bf16.mxu1 %v3872_v23  ;;  %7365 = vmatprep.subr.bf16.mxu0 %v8932_v21  ;;  %v8984_v21 = vld [vmem:[#allocation8 + $0xaa0] ss:$8 sps:$4 sm:$0xff]   ;;  %v8995_v23 = vld [vmem:[#allocation8 + $0xbb4] ss:$8 sps:$4 sm:$0xff]  }
 0x2d6   :  { %7406 = vmatprep.subr.bf16.mxu1 %v8935_v52  ;;  %v8992_v52 = vld [vmem:[#allocation8 + $0xab4] ss:$8 sps:$4 sm:$0xff]  }
 0x2d7   :  { %7366 = vmatpush1.bf16.msra.mxu0 %v8930_v32  ;;  %v8990_v32 = vld [vmem:[#allocation8 + $0xab0] ss:$8 sps:$4 sm:$0xff]  }
 0x2d8   :  { %7407 = vmatpush1.bf16.msra.mxu1 %v8933_v39  ;;  %7367 = vmatprep.subr.bf16.mxu0 %v8938_v15  ;;  %v8993_v39 = vld [vmem:[#allocation8 + $0xbb0] ss:$8 sps:$4 sm:$0xff]   ;;  %v8998_v15 = vld [vmem:[#allocation8 + $0xac4] ss:$8 sps:$4 sm:$0xff]  }
 0x2d9   :  { %7408 = vmatprep.subr.bf16.mxu1 %v8941_v17  ;;  %v9001_v17 = vld [vmem:[#allocation8 + $0xbc4] ss:$8 sps:$4 sm:$0xff]  }
 0x2db   :  { %7368 = vmatpush1.bf16.msra.mxu0 %v8936_v4  ;;  %v8996_v4 = vld [vmem:[#allocation8 + $0xac0] ss:$8 sps:$4 sm:$0xff]  }
 0x2dc   :  { %7409 = vmatpush1.bf16.msra.mxu1 %v8939_v55  ;;  %7369 = vmatprep.subr.bf16.mxu0 %v8944_v46  ;;  %v8999_v55 = vld [vmem:[#allocation8 + $0xbc0] ss:$8 sps:$4 sm:$0xff]   ;;  %v9004_v46 = vld [vmem:[#allocation8 + $0xad4] ss:$8 sps:$4 sm:$0xff]  }
 0x2dd   :  { %7410 = vmatprep.subr.bf16.mxu1 %v8947_v13  ;;  %v9007_v13 = vld [vmem:[#allocation8 + $0xbd4] ss:$8 sps:$4 sm:$0xff]  }
 0x2df   :  { %7370 = vmatpush1.bf16.msra.mxu0 %v8942_v14  ;;  %v9002_v14 = vld [vmem:[#allocation8 + $0xad0] ss:$8 sps:$4 sm:$0xff]  }
 0x2e0   :  { %7411 = vmatpush1.bf16.msra.mxu1 %v8945_v40  ;;  %7371 = vmatprep.subr.bf16.mxu0 %v8950_v18  ;;  %v9005_v40 = vld [vmem:[#allocation8 + $0xbd0] ss:$8 sps:$4 sm:$0xff]   ;;  %v9010_v18 = vld [vmem:[#allocation8 + $0xae4] ss:$8 sps:$4 sm:$0xff]  }
 0x2e1   :  { %7412 = vmatprep.subr.bf16.mxu1 %v8953_v33  ;;  %v9013_v33 = vld [vmem:[#allocation8 + $0xbe4] ss:$8 sps:$4 sm:$0xff]  }
 0x2e3   :  { %7372 = vmatpush1.bf16.msra.mxu0 %v8948_v53  ;;  %v9008_v53 = vld [vmem:[#allocation8 + $0xae0] ss:$8 sps:$4 sm:$0xff]  }
 0x2e4   :  { %7413 = vmatpush1.bf16.msra.mxu1 %v8951_v37  ;;  %7373 = vmatprep.subr.bf16.mxu0 %v8956_v36  ;;  %v9011_v37 = vld [vmem:[#allocation8 + $0xbe0] ss:$8 sps:$4 sm:$0xff]   ;;  %v9016_v36 = vld [vmem:[#allocation8 + $0xaf4] ss:$8 sps:$4 sm:$0xff]  }
 0x2e5   :  { %v7069_v43 = vpop.f32.mrb[36].mxu0  ;;  %7414 = vmatprep.subr.bf16.mxu1 %v8959_v27  ;;  %v9019_v27 = vld [vmem:[#allocation8 + $0xbf4] ss:$8 sps:$4 sm:$0xff]  }
 0x2e6   :  { %v7070_v9 = vadd.f32 %v7069_v43, %v10366_v47  ;;  %v7110_v8 = vpop.f32.mrb[36].mxu1  ;;  %v7071_v63 = vpop.f32.mrb[37].mxu0  ;;  %v8971_v47 = vld [vmem:[#allocation8 + $0xb74] ss:$8 sps:$4 sm:$0xff]   ;;  %v9022_v43 = vld [vmem:[#allocation8 + $0xc04] ss:$8 sps:$4 sm:$0xff]  }
 0x2e7   :  { %v7072_v12 = vadd.f32 %v7071_v63, %v10368_v11  ;;  %v7112_v50 = vpop.f32.mrb[37].mxu1  ;;  %v7073_v20 = vpop.f32.mrb[38].mxu0  ;;  %7374 = vmatpush1.bf16.msra.mxu0 %v8954_v31  ;;  %v8969_v11 = vld [vmem:[#allocation8 + $0xb70] ss:$8 sps:$4 sm:$0xff]   ;;  %v9020_v63 = vld [vmem:[#allocation8 + $0xc00] ss:$8 sps:$4 sm:$0xff]  }
 0x2e8   :  { %v10376_v10 = vadd.f32 %v7110_v8, %v7070_v9  ;;  %v7114_v0 = vpop.f32.mrb[38].mxu1  ;;  %7415 = vmatpush1.bf16.msra.mxu1 %v8957_v28  ;;  %v7074_v41 = vpop.f32.mrb[39].mxu0  ;;  %7375 = vmatprep.subr.bf16.mxu0 %v8962_v54  ;;  %v9014_v31 = vld [vmem:[#allocation8 + $0xaf0] ss:$8 sps:$4 sm:$0xff]   ;;  %v3837_v54 = vmax.f32 %v10289_v58, 0.0  ;;  %v3842_v8 = vmax.f32 %v10344_v25, 0.0 }
 0x2e9   :  { %v10378_v26 = vadd.f32 %v7112_v50, %v7072_v12  ;;  %v7115_v29 = vpop.f32.mrb[39].mxu1  ;;  %7416 = vmatprep.subr.bf16.mxu1 %v8965_v45  ;;  %v9017_v28 = vld [vmem:[#allocation8 + $0xbf0] ss:$8 sps:$4 sm:$0xff]   ;;  %v3839_v45 = vmax.f32 %v10296_v59, 0.0  ;;  %v9025_v9 = vld [vmem:[#allocation8 + $0xd04] ss:$8 sps:$4 sm:$0xff]  }
 0x2ea   :  { %v3844_v12 = vmax.f32 %v10346_v24, 0.0  ;;  %v3869_v50 = vpack.c.bf16 %v3837_v54, %v3837_v54  ;;  %v9023_v20 = vld [vmem:[#allocation8 + $0xd00] ss:$8 sps:$4 sm:$0xff]   ;;  %v9028_v0 = vld [vmem:[#allocation8 + $0xc14] ss:$8 sps:$4 sm:$0xff]   ;;  %v3874_v58 = vpack.c.bf16 %v3842_v8, %v3842_v8 }
 0x2eb   :  { %7376 = vmatpush1.bf16.msra.mxu0 %v8960_v57  ;;  %v3871_v57 = vpack.c.bf16 %v3839_v45, %v3839_v45  ;;  %v9031_v41 = vld [vmem:[#allocation8 + $0xd14] ss:$8 sps:$4 sm:$0xff]   ;;  %v9029_v25 = vld [vmem:[#allocation8 + $0xd10] ss:$8 sps:$4 sm:$0xff]   ;;  %v9037_v24 = vld [vmem:[#allocation8 + $0xd24] ss:$8 sps:$4 sm:$0xff]  }
 0x2ec   :  { %7417 = vmatpush1.bf16.msra.mxu1 %v8963_v30  ;;  %7377 = vmatprep.subr.bf16.mxu0 %v8968_v19  ;;  %v3876_v59 = vpack.c.bf16 %v3844_v12, %v3844_v12  ;;  %v9026_v30 = vld [vmem:[#allocation8 + $0xc10] ss:$8 sps:$4 sm:$0xff]   ;;  %v9034_v19 = vld [vmem:[#allocation8 + $0xc24] ss:$8 sps:$4 sm:$0xff]   ;;  %v9032_v29 = vld [vmem:[#allocation8 + $0xc20] ss:$8 sps:$4 sm:$0xff]  }
 0x2ed   :  { %7418 = vmatprep.subr.bf16.mxu1 %v8971_v47  ;;  %v9035_v47 = vld [vmem:[#allocation8 + $0xd20] ss:$8 sps:$4 sm:$0xff]   ;;  %v9076_v54 = vld [vmem:[#allocation8 + $0xc94] ss:$8 sps:$4 sm:$0xff]   ;;  %v9074_v45 = vld [vmem:[#allocation8 + $0xc90] ss:$8 sps:$4 sm:$0xff]  }
 0x2ee   :  { %v9082_v8 = vld [vmem:[#allocation8 + $0xca4] ss:$8 sps:$4 sm:$0xff]   ;;  %v9080_v12 = vld [vmem:[#allocation8 + $0xca0] ss:$8 sps:$4 sm:$0xff]  }
 0x2ef   :  { %7378 = vmatpush1.bf16.msra.mxu0 %v8966_v49  ;;  %v9040_v49 = vld [vmem:[#allocation8 + $0xc34] ss:$8 sps:$4 sm:$0xff]  }
 0x2f0   :  { %7419 = vmatpush1.bf16.msra.mxu1 %v8969_v11  ;;  %7379 = vmatprep.subr.bf16.mxu0 %v8974_v48  ;;  %v9043_v11 = vld [vmem:[#allocation8 + $0xd34] ss:$8 sps:$4 sm:$0xff]   ;;  %v9038_v48 = vld [vmem:[#allocation8 + $0xc30] ss:$8 sps:$4 sm:$0xff]  }
 0x2f1   :  { %7420 = vmatprep.subr.bf16.mxu1 %v8977_v35  ;;  %v9041_v35 = vld [vmem:[#allocation8 + $0xd30] ss:$8 sps:$4 sm:$0xff]  }
 0x2f3   :  { %7380 = vmatpush1.bf16.msra.mxu0 %v8972_v60  ;;  %v9046_v60 = vld [vmem:[#allocation8 + $0xc44] ss:$8 sps:$4 sm:$0xff]  }
 0x2f4   :  { %7421 = vmatpush1.bf16.msra.mxu1 %v8975_v16  ;;  %7381 = vmatprep.subr.bf16.mxu0 %v8980_v51  ;;  %v9049_v16 = vld [vmem:[#allocation8 + $0xd44] ss:$8 sps:$4 sm:$0xff]   ;;  %v9044_v51 = vld [vmem:[#allocation8 + $0xc40] ss:$8 sps:$4 sm:$0xff]  }
 0x2f5   :  { %7422 = vmatprep.subr.bf16.mxu1 %v8983_v3  ;;  %v9047_v3 = vld [vmem:[#allocation8 + $0xd40] ss:$8 sps:$4 sm:$0xff]  }
 0x2f7   :  { %7382 = vmatpush1.bf16.msra.mxu0 %v8978_v5  ;;  %v9052_v5 = vld [vmem:[#allocation8 + $0xc54] ss:$8 sps:$4 sm:$0xff]  }
 0x2f8   :  { %7423 = vmatpush1.bf16.msra.mxu1 %v8981_v44  ;;  %7383 = vmatprep.subr.bf16.mxu0 %v8986_v2  ;;  %v9055_v44 = vld [vmem:[#allocation8 + $0xd54] ss:$8 sps:$4 sm:$0xff]   ;;  %v9050_v2 = vld [vmem:[#allocation8 + $0xc50] ss:$8 sps:$4 sm:$0xff]  }
 0x2f9   :  { %7424 = vmatprep.subr.bf16.mxu1 %v8989_v38  ;;  %v9053_v38 = vld [vmem:[#allocation8 + $0xd50] ss:$8 sps:$4 sm:$0xff]  }
 0x2fb   :  { %7384 = vmatpush1.bf16.msra.mxu0 %v8984_v21  ;;  %v9058_v21 = vld [vmem:[#allocation8 + $0xc64] ss:$8 sps:$4 sm:$0xff]  }
 0x2fc   :  { %7425 = vmatpush1.bf16.msra.mxu1 %v8987_v62  ;;  %7385 = vmatprep.subr.bf16.mxu0 %v8992_v52  ;;  %v9061_v52 = vld [vmem:[#allocation8 + $0xd64] ss:$8 sps:$4 sm:$0xff]  }
 0x2fd   :  { %7426 = vmatprep.subr.bf16.mxu1 %v8995_v23 }
 0x2ff   :  { %7386 = vmatpush1.bf16.msra.mxu0 %v8990_v32 }
 0x300   :  { %7427 = vmatpush1.bf16.msra.mxu1 %v8993_v39  ;;  %7387 = vmatprep.subr.bf16.mxu0 %v8998_v15 }
 0x301   :  { %7428 = vmatprep.subr.bf16.mxu1 %v9001_v17 }
 0x303   :  { %7388 = vmatpush1.bf16.msra.mxu0 %v8996_v4 }
 0x304   :  { %7429 = vmatpush1.bf16.msra.mxu1 %v8999_v55  ;;  %7389 = vmatprep.subr.bf16.mxu0 %v9004_v46  ;;  %v9056_v55 = vld [vmem:[#allocation8 + $0xc60] ss:$8 sps:$4 sm:$0xff]  }
 0x305   :  { %7430 = vmatprep.subr.bf16.mxu1 %v9007_v13 }
 0x307   :  { %7390 = vmatpush1.bf16.msra.mxu0 %v9002_v14 }
 0x308   :  { %7431 = vmatpush1.bf16.msra.mxu1 %v9005_v40  ;;  %7391 = vmatprep.subr.bf16.mxu0 %v9010_v18  ;;  %v9059_v40 = vld [vmem:[#allocation8 + $0xd60] ss:$8 sps:$4 sm:$0xff]   ;;  %v9064_v18 = vld [vmem:[#allocation8 + $0xc74] ss:$8 sps:$4 sm:$0xff]  }
 0x309   :  { %7432 = vmatprep.subr.bf16.mxu1 %v9013_v33 }
 0x30b   :  { %7392 = vmatpush1.bf16.msra.mxu0 %v9008_v53 }
 0x30c   :  { %7433 = vmatpush1.bf16.msra.mxu1 %v9011_v37  ;;  %7393 = vmatprep.subr.bf16.mxu0 %v9016_v36  ;;  %v9062_v37 = vld [vmem:[#allocation8 + $0xc70] ss:$8 sps:$4 sm:$0xff]   ;;  %v9070_v36 = vld [vmem:[#allocation8 + $0xc84] ss:$8 sps:$4 sm:$0xff]  }
 0x30d   :  { %7434 = vmatprep.subr.bf16.mxu1 %v9019_v27  ;;  %v9073_v27 = vld [vmem:[#allocation8 + $0xd84] ss:$8 sps:$4 sm:$0xff]  }
 0x30f   :  { %7394 = vmatpush1.bf16.msra.mxu0 %v9014_v31  ;;  %v9068_v31 = vld [vmem:[#allocation8 + $0xc80] ss:$8 sps:$4 sm:$0xff]  }
 0x310   :  { %7435 = vmatpush1.bf16.msra.mxu1 %v9017_v28  ;;  %7445 = vmatprep.subr.bf16.mxu0 %v9022_v43  ;;  %v9071_v28 = vld [vmem:[#allocation8 + $0xd80] ss:$8 sps:$4 sm:$0xff]   ;;  %v9079_v43 = vld [vmem:[#allocation8 + $0xd94] ss:$8 sps:$4 sm:$0xff]  }
 0x311   :  { %7486 = vmatprep.subr.bf16.mxu1 %v9025_v9  ;;  %v9077_v9 = vld [vmem:[#allocation8 + $0xd90] ss:$8 sps:$4 sm:$0xff]  }
 0x312   :  { %7396 = vmatmul.mubr.bf16.vlgmr.msra.gmra.mrb[52].mxu0 %v3869_v50  ;;  %v9083_v50 = vld [vmem:[#allocation8 + $0xda0] ss:$8 sps:$4 sm:$0xff]  }
 0x313   :  { %7437 = vmatmul.mubr.bf16.vlgmr.msra.gmra.mrb[52].mxu1 %v3871_v57  ;;  %7446 = vmatpush1.bf16.msra.mxu0 %v9020_v63  ;;  %v9085_v63 = vld [vmem:[#allocation8 + $0xda4] ss:$8 sps:$4 sm:$0xff]   ;;  %v9091_v57 = vld [vmem:[#allocation8 + $0xdb4] ss:$8 sps:$4 sm:$0xff]  }
 0x314   :  { %7477 = vmatprep.mubr.bf16.mxu0 %v3874_v58  ;;  %7487 = vmatpush1.bf16.msra.mxu1 %v9023_v20  ;;  %v9088_v20 = vld [vmem:[#allocation8 + $0xcb4] ss:$8 sps:$4 sm:$0xff]   ;;  %v9089_v58 = vld [vmem:[#allocation8 + $0xdb0] ss:$8 sps:$4 sm:$0xff]  }
 0x315   :  { %7518 = vmatprep.mubr.bf16.mxu1 %v3876_v59  ;;  %7447 = vmatprep.subr.bf16.mxu0 %v9028_v0  ;;  %v9086_v0 = vld [vmem:[#allocation8 + $0xcb0] ss:$8 sps:$4 sm:$0xff]   ;;  %v9097_v59 = vld [vmem:[#allocation8 + $0xdc4] ss:$8 sps:$4 sm:$0xff]  }
 0x316   :  { %7488 = vmatprep.subr.bf16.mxu1 %v9031_v41  ;;  %v9094_v41 = vld [vmem:[#allocation8 + $0xcc4] ss:$8 sps:$4 sm:$0xff]  }
 0x317   :  { %7448 = vmatpush1.bf16.msra.mxu0 %v9026_v30  ;;  %v9092_v30 = vld [vmem:[#allocation8 + $0xcc0] ss:$8 sps:$4 sm:$0xff]  }
 0x318   :  { %7489 = vmatpush1.bf16.msra.mxu1 %v9029_v25  ;;  %7449 = vmatprep.subr.bf16.mxu0 %v9034_v19  ;;  %v9095_v25 = vld [vmem:[#allocation8 + $0xdc0] ss:$8 sps:$4 sm:$0xff]   ;;  %v9100_v19 = vld [vmem:[#allocation8 + $0xcd4] ss:$8 sps:$4 sm:$0xff]  }
 0x319   :  { %7490 = vmatprep.subr.bf16.mxu1 %v9037_v24  ;;  %v9103_v24 = vld [vmem:[#allocation8 + $0xdd4] ss:$8 sps:$4 sm:$0xff]  }
 0x31b   :  { %7450 = vmatpush1.bf16.msra.mxu0 %v9032_v29  ;;  %v9098_v29 = vld [vmem:[#allocation8 + $0xcd0] ss:$8 sps:$4 sm:$0xff]  }
 0x31c   :  { %7491 = vmatpush1.bf16.msra.mxu1 %v9035_v47  ;;  %7451 = vmatprep.subr.bf16.mxu0 %v9040_v49  ;;  %v9101_v47 = vld [vmem:[#allocation8 + $0xdd0] ss:$8 sps:$4 sm:$0xff]   ;;  %v9106_v49 = vld [vmem:[#allocation8 + $0xce4] ss:$8 sps:$4 sm:$0xff]  }
 0x31d   :  { %7492 = vmatprep.subr.bf16.mxu1 %v9043_v11  ;;  %v9109_v11 = vld [vmem:[#allocation8 + $0xde4] ss:$8 sps:$4 sm:$0xff]  }
 0x31f   :  { %7452 = vmatpush1.bf16.msra.mxu0 %v9038_v48  ;;  %v9104_v48 = vld [vmem:[#allocation8 + $0xce0] ss:$8 sps:$4 sm:$0xff]  }
 0x320   :  { %7493 = vmatpush1.bf16.msra.mxu1 %v9041_v35  ;;  %7453 = vmatprep.subr.bf16.mxu0 %v9046_v60  ;;  %v9107_v35 = vld [vmem:[#allocation8 + $0xde0] ss:$8 sps:$4 sm:$0xff]   ;;  %v9112_v60 = vld [vmem:[#allocation8 + $0xcf4] ss:$8 sps:$4 sm:$0xff]  }
 0x321   :  { %7494 = vmatprep.subr.bf16.mxu1 %v9049_v16  ;;  %v9115_v16 = vld [vmem:[#allocation8 + $0xdf4] ss:$8 sps:$4 sm:$0xff]  }
 0x323   :  { %7454 = vmatpush1.bf16.msra.mxu0 %v9044_v51  ;;  %v9110_v51 = vld [vmem:[#allocation8 + $0xcf0] ss:$8 sps:$4 sm:$0xff]  }
 0x324   :  { %7495 = vmatpush1.bf16.msra.mxu1 %v9047_v3  ;;  %7455 = vmatprep.subr.bf16.mxu0 %v9052_v5  ;;  %v9113_v3 = vld [vmem:[#allocation8 + $0xdf0] ss:$8 sps:$4 sm:$0xff]   ;;  %v3841_v5 = vmax.f32 %v10348_v34, 0.0 }
 0x325   :  { %v7151_v62 = vpop.f32.mrb[40].mxu0  ;;  %7496 = vmatprep.subr.bf16.mxu1 %v9055_v44  ;;  %v9118_v44 = vld [vmem:[#allocation8 + $0xe04] ss:$8 sps:$4 sm:$0xff]  }
 0x326   :  { %v7152_v23 = vadd.f32 %v7151_v62, %v10376_v10  ;;  %v7192_v32 = vpop.f32.mrb[40].mxu1  ;;  %v7153_v39 = vpop.f32.mrb[41].mxu0  ;;  %v9067_v10 = vld [vmem:[#allocation8 + $0xd74] ss:$8 sps:$4 sm:$0xff]   ;;  %v9116_v62 = vld [vmem:[#allocation8 + $0xe00] ss:$8 sps:$4 sm:$0xff]  }
 0x327   :  { %v7154_v15 = vadd.f32 %v7153_v39, %v10378_v26  ;;  %v7194_v17 = vpop.f32.mrb[41].mxu1  ;;  %v7155_v4 = vpop.f32.mrb[42].mxu0  ;;  %7456 = vmatpush1.bf16.msra.mxu0 %v9050_v2  ;;  %v9065_v26 = vld [vmem:[#allocation8 + $0xd70] ss:$8 sps:$4 sm:$0xff]   ;;  %v3843_v2 = vmax.f32 %v10350_v22, 0.0 }
 0x328   :  { %v10386_v46 = vadd.f32 %v7192_v32, %v7152_v23  ;;  %v7196_v13 = vpop.f32.mrb[42].mxu1  ;;  %7497 = vmatpush1.bf16.msra.mxu1 %v9053_v38  ;;  %v7156_v14 = vpop.f32.mrb[43].mxu0  ;;  %7457 = vmatprep.subr.bf16.mxu0 %v9058_v21  ;;  %v9121_v38 = vld [vmem:[#allocation8 + $0xf04] ss:$8 sps:$4 sm:$0xff]   ;;  %v3846_v21 = vmax.f32 %v10352_v7, 0.0  ;;  %v3873_v23 = vpack.c.bf16 %v3841_v5, %v3841_v5 }
 0x329   :  { %v10388_v33 = vadd.f32 %v7194_v17, %v7154_v15  ;;  %v7197_v53 = vpop.f32.mrb[43].mxu1  ;;  %7498 = vmatprep.subr.bf16.mxu1 %v9061_v52  ;;  %v3848_v52 = vmax.f32 %v10355_v56, 0.0  ;;  %v9119_v32 = vld [vmem:[#allocation8 + $0xf00] ss:$8 sps:$4 sm:$0xff]   ;;  %v3875_v39 = vpack.c.bf16 %v3843_v2, %v3843_v2  ;;  %v9124_v15 = vld [vmem:[#allocation8 + $0xe14] ss:$8 sps:$4 sm:$0xff]  }
 0x32a   :  { %v3878_v34 = vpack.c.bf16 %v3846_v21, %v3846_v21  ;;  %v9127_v17 = vld [vmem:[#allocation8 + $0xf14] ss:$8 sps:$4 sm:$0xff]   ;;  %v9122_v4 = vld [vmem:[#allocation8 + $0xe10] ss:$8 sps:$4 sm:$0xff]   ;;  %v9133_v56 = vld [vmem:[#allocation8 + $0xf24] ss:$8 sps:$4 sm:$0xff]  }
 0x32b   :  { %7458 = vmatpush1.bf16.msra.mxu0 %v9056_v55  ;;  %v3880_v22 = vpack.c.bf16 %v3848_v52, %v3848_v52  ;;  %v9125_v7 = vld [vmem:[#allocation8 + $0xf10] ss:$8 sps:$4 sm:$0xff]   ;;  %v9130_v55 = vld [vmem:[#allocation8 + $0xe24] ss:$8 sps:$4 sm:$0xff]   ;;  %v9128_v13 = vld [vmem:[#allocation8 + $0xe20] ss:$8 sps:$4 sm:$0xff]  }
 0x32c   :  { %7499 = vmatpush1.bf16.msra.mxu1 %v9059_v40  ;;  %7459 = vmatprep.subr.bf16.mxu0 %v9064_v18  ;;  %v9131_v14 = vld [vmem:[#allocation8 + $0xf20] ss:$8 sps:$4 sm:$0xff]   ;;  %v9136_v40 = vld [vmem:[#allocation8 + $0xe34] ss:$8 sps:$4 sm:$0xff]   ;;  %v9134_v53 = vld [vmem:[#allocation8 + $0xe30] ss:$8 sps:$4 sm:$0xff]  }
 0x32d   :  { %7500 = vmatprep.subr.bf16.mxu1 %v9067_v10  ;;  %v9139_v18 = vld [vmem:[#allocation8 + $0xf34] ss:$8 sps:$4 sm:$0xff]   ;;  %v9137_v10 = vld [vmem:[#allocation8 + $0xf30] ss:$8 sps:$4 sm:$0xff]   ;;  %v9178_v5 = vld [vmem:[#allocation8 + $0xea4] ss:$8 sps:$4 sm:$0xff]  }
 0x32e   :  { %v9176_v2 = vld [vmem:[#allocation8 + $0xea0] ss:$8 sps:$4 sm:$0xff]   ;;  %v9184_v21 = vld [vmem:[#allocation8 + $0xeb4] ss:$8 sps:$4 sm:$0xff]   ;;  %v9182_v52 = vld [vmem:[#allocation8 + $0xeb0] ss:$8 sps:$4 sm:$0xff]  }
 0x32f   :  { %7460 = vmatpush1.bf16.msra.mxu0 %v9062_v37  ;;  %v9142_v37 = vld [vmem:[#allocation8 + $0xe44] ss:$8 sps:$4 sm:$0xff]  }
 0x330   :  { %7501 = vmatpush1.bf16.msra.mxu1 %v9065_v26  ;;  %7461 = vmatprep.subr.bf16.mxu0 %v9070_v36  ;;  %v9145_v26 = vld [vmem:[#allocation8 + $0xf44] ss:$8 sps:$4 sm:$0xff]   ;;  %v9140_v36 = vld [vmem:[#allocation8 + $0xe40] ss:$8 sps:$4 sm:$0xff]  }
 0x331   :  { %7502 = vmatprep.subr.bf16.mxu1 %v9073_v27  ;;  %v9143_v27 = vld [vmem:[#allocation8 + $0xf40] ss:$8 sps:$4 sm:$0xff]  }
 0x333   :  { %7462 = vmatpush1.bf16.msra.mxu0 %v9068_v31  ;;  %v9148_v31 = vld [vmem:[#allocation8 + $0xe54] ss:$8 sps:$4 sm:$0xff]  }
 0x334   :  { %7503 = vmatpush1.bf16.msra.mxu1 %v9071_v28  ;;  %7463 = vmatprep.subr.bf16.mxu0 %v9076_v54  ;;  %v9151_v28 = vld [vmem:[#allocation8 + $0xf54] ss:$8 sps:$4 sm:$0xff]   ;;  %v9146_v54 = vld [vmem:[#allocation8 + $0xe50] ss:$8 sps:$4 sm:$0xff]  }
 0x335   :  { %7504 = vmatprep.subr.bf16.mxu1 %v9079_v43  ;;  %v9149_v43 = vld [vmem:[#allocation8 + $0xf50] ss:$8 sps:$4 sm:$0xff]  }
 0x337   :  { %7464 = vmatpush1.bf16.msra.mxu0 %v9074_v45  ;;  %v9154_v45 = vld [vmem:[#allocation8 + $0xe64] ss:$8 sps:$4 sm:$0xff]  }
 0x338   :  { %7505 = vmatpush1.bf16.msra.mxu1 %v9077_v9  ;;  %7465 = vmatprep.subr.bf16.mxu0 %v9082_v8  ;;  %v9157_v8 = vld [vmem:[#allocation8 + $0xf64] ss:$8 sps:$4 sm:$0xff]  }
 0x339   :  { %7506 = vmatprep.subr.bf16.mxu1 %v9085_v63 }
 0x33b   :  { %7466 = vmatpush1.bf16.msra.mxu0 %v9080_v12 }
 0x33c   :  { %7507 = vmatpush1.bf16.msra.mxu1 %v9083_v50  ;;  %7467 = vmatprep.subr.bf16.mxu0 %v9088_v20 }
 0x33d   :  { %7508 = vmatprep.subr.bf16.mxu1 %v9091_v57 }
 0x33f   :  { %7468 = vmatpush1.bf16.msra.mxu0 %v9086_v0 }
 0x340   :  { %7509 = vmatpush1.bf16.msra.mxu1 %v9089_v58  ;;  %7469 = vmatprep.subr.bf16.mxu0 %v9094_v41  ;;  %v9152_v58 = vld [vmem:[#allocation8 + $0xe60] ss:$8 sps:$4 sm:$0xff]  }
 0x341   :  { %7510 = vmatprep.subr.bf16.mxu1 %v9097_v59 }
 0x343   :  { %7470 = vmatpush1.bf16.msra.mxu0 %v9092_v30 }
 0x344   :  { %7511 = vmatpush1.bf16.msra.mxu1 %v9095_v25  ;;  %7471 = vmatprep.subr.bf16.mxu0 %v9100_v19  ;;  %v9155_v25 = vld [vmem:[#allocation8 + $0xf60] ss:$8 sps:$4 sm:$0xff]   ;;  %v9160_v19 = vld [vmem:[#allocation8 + $0xe74] ss:$8 sps:$4 sm:$0xff]  }
 0x345   :  { %7512 = vmatprep.subr.bf16.mxu1 %v9103_v24 }
 0x347   :  { %7472 = vmatpush1.bf16.msra.mxu0 %v9098_v29 }
 0x348   :  { %7513 = vmatpush1.bf16.msra.mxu1 %v9101_v47  ;;  %7473 = vmatprep.subr.bf16.mxu0 %v9106_v49  ;;  %v9158_v47 = vld [vmem:[#allocation8 + $0xe70] ss:$8 sps:$4 sm:$0xff]   ;;  %v9166_v49 = vld [vmem:[#allocation8 + $0xe84] ss:$8 sps:$4 sm:$0xff]  }
 0x349   :  { %7514 = vmatprep.subr.bf16.mxu1 %v9109_v11  ;;  %v9169_v11 = vld [vmem:[#allocation8 + $0xf84] ss:$8 sps:$4 sm:$0xff]  }
 0x34b   :  { %7474 = vmatpush1.bf16.msra.mxu0 %v9104_v48  ;;  %v9164_v48 = vld [vmem:[#allocation8 + $0xe80] ss:$8 sps:$4 sm:$0xff]  }
 0x34c   :  { %7515 = vmatpush1.bf16.msra.mxu1 %v9107_v35  ;;  %7475 = vmatprep.subr.bf16.mxu0 %v9112_v60  ;;  %v9167_v35 = vld [vmem:[#allocation8 + $0xf80] ss:$8 sps:$4 sm:$0xff]   ;;  %v9172_v60 = vld [vmem:[#allocation8 + $0xe94] ss:$8 sps:$4 sm:$0xff]  }
 0x34d   :  { %7516 = vmatprep.subr.bf16.mxu1 %v9115_v16  ;;  %v9175_v16 = vld [vmem:[#allocation8 + $0xf94] ss:$8 sps:$4 sm:$0xff]  }
 0x34f   :  { %7476 = vmatpush1.bf16.msra.mxu0 %v9110_v51  ;;  %v9170_v51 = vld [vmem:[#allocation8 + $0xe90] ss:$8 sps:$4 sm:$0xff]  }
 0x350   :  { %7517 = vmatpush1.bf16.msra.mxu1 %v9113_v3  ;;  %7527 = vmatprep.subr.bf16.mxu0 %v9118_v44  ;;  %v9173_v3 = vld [vmem:[#allocation8 + $0xf90] ss:$8 sps:$4 sm:$0xff]   ;;  %v9181_v44 = vld [vmem:[#allocation8 + $0xfa4] ss:$8 sps:$4 sm:$0xff]  }
 0x351   :  { %7568 = vmatprep.subr.bf16.mxu1 %v9121_v38  ;;  %v9179_v38 = vld [vmem:[#allocation8 + $0xfa0] ss:$8 sps:$4 sm:$0xff]  }
 0x352   :  { %7478 = vmatmul.mubr.bf16.vlgmr.msra.gmra.mrb[56].mxu0 %v3873_v23  ;;  %v9185_v23 = vld [vmem:[#allocation8 + $0xfb0] ss:$8 sps:$4 sm:$0xff]  }
 0x353   :  { %7519 = vmatmul.mubr.bf16.vlgmr.msra.gmra.mrb[56].mxu1 %v3875_v39  ;;  %7528 = vmatpush1.bf16.msra.mxu0 %v9116_v62  ;;  %v9187_v62 = vld [vmem:[#allocation8 + $0xfb4] ss:$8 sps:$4 sm:$0xff]   ;;  %v9193_v39 = vld [vmem:[#allocation8 + $0xfc4] ss:$8 sps:$4 sm:$0xff]  }
 0x354   :  { %7559 = vmatprep.mubr.bf16.mxu0 %v3878_v34  ;;  %7569 = vmatpush1.bf16.msra.mxu1 %v9119_v32  ;;  %v9190_v32 = vld [vmem:[#allocation8 + $0xec4] ss:$8 sps:$4 sm:$0xff]   ;;  %v9191_v34 = vld [vmem:[#allocation8 + $0xfc0] ss:$8 sps:$4 sm:$0xff]  }
 0x355   :  { %7600 = vmatprep.mubr.bf16.mxu1 %v3880_v22  ;;  %7529 = vmatprep.subr.bf16.mxu0 %v9124_v15  ;;  %v9188_v15 = vld [vmem:[#allocation8 + $0xec0] ss:$8 sps:$4 sm:$0xff]   ;;  %v9199_v22 = vld [vmem:[#allocation8 + $0xfd4] ss:$8 sps:$4 sm:$0xff]  }
 0x356   :  { %7570 = vmatprep.subr.bf16.mxu1 %v9127_v17  ;;  %v9196_v17 = vld [vmem:[#allocation8 + $0xed4] ss:$8 sps:$4 sm:$0xff]  }
 0x357   :  { %7530 = vmatpush1.bf16.msra.mxu0 %v9122_v4  ;;  %v9194_v4 = vld [vmem:[#allocation8 + $0xed0] ss:$8 sps:$4 sm:$0xff]  }
 0x358   :  { %7571 = vmatpush1.bf16.msra.mxu1 %v9125_v7  ;;  %7531 = vmatprep.subr.bf16.mxu0 %v9130_v55  ;;  %v9197_v7 = vld [vmem:[#allocation8 + $0xfd0] ss:$8 sps:$4 sm:$0xff]   ;;  %v9202_v55 = vld [vmem:[#allocation8 + $0xee4] ss:$8 sps:$4 sm:$0xff]  }
 0x359   :  { %7572 = vmatprep.subr.bf16.mxu1 %v9133_v56  ;;  %v9205_v56 = vld [vmem:[#allocation8 + $0xfe4] ss:$8 sps:$4 sm:$0xff]  }
 0x35b   :  { %7532 = vmatpush1.bf16.msra.mxu0 %v9128_v13  ;;  %v9200_v13 = vld [vmem:[#allocation8 + $0xee0] ss:$8 sps:$4 sm:$0xff]  }
 0x35c   :  { %7573 = vmatpush1.bf16.msra.mxu1 %v9131_v14  ;;  %7533 = vmatprep.subr.bf16.mxu0 %v9136_v40  ;;  %v9203_v14 = vld [vmem:[#allocation8 + $0xfe0] ss:$8 sps:$4 sm:$0xff]   ;;  %v9208_v40 = vld [vmem:[#allocation8 + $0xef4] ss:$8 sps:$4 sm:$0xff]  }
 0x35d   :  { %7574 = vmatprep.subr.bf16.mxu1 %v9139_v18  ;;  %v9211_v18 = vld [vmem:[#allocation8 + $0xff4] ss:$8 sps:$4 sm:$0xff]  }
 0x35f   :  { %7534 = vmatpush1.bf16.msra.mxu0 %v9134_v53  ;;  %v9206_v53 = vld [vmem:[#allocation8 + $0xef0] ss:$8 sps:$4 sm:$0xff]  }
 0x360   :  { %7575 = vmatpush1.bf16.msra.mxu1 %v9137_v10  ;;  %7535 = vmatprep.subr.bf16.mxu0 %v9142_v37  ;;  %v9209_v10 = vld [vmem:[#allocation8 + $0xff0] ss:$8 sps:$4 sm:$0xff]   ;;  %v3845_v37 = vmax.f32 %v10357_v42, 0.0 }
 0x361   :  { %7576 = vmatprep.subr.bf16.mxu1 %v9145_v26  ;;  %v3847_v26 = vmax.f32 %v10360_v61, 0.0 }
 0x363   :  { %7536 = vmatpush1.bf16.msra.mxu0 %v9140_v36  ;;  %v3877_v36 = vpack.c.bf16 %v3845_v37, %v3845_v37 }
 0x364   :  { %7577 = vmatpush1.bf16.msra.mxu1 %v9143_v27  ;;  %7537 = vmatprep.subr.bf16.mxu0 %v9148_v31  ;;  %v3879_v27 = vpack.c.bf16 %v3847_v26, %v3847_v26 }
 0x365   :  { %v7233_v9 = vpop.f32.mrb[44].mxu0  ;;  %7578 = vmatprep.subr.bf16.mxu1 %v9151_v28 }
 0x366   :  { %v7234_v63 = vadd.f32 %v7233_v9, %v10386_v46  ;;  %v7274_v12 = vpop.f32.mrb[44].mxu1  ;;  %v7235_v50 = vpop.f32.mrb[45].mxu0  ;;  %v9163_v46 = vld [vmem:[#allocation8 + $0xf74] ss:$8 sps:$4 sm:$0xff]  }
 0x367   :  { %v7236_v20 = vadd.f32 %v7235_v50, %v10388_v33  ;;  %v7276_v57 = vpop.f32.mrb[45].mxu1  ;;  %v7237_v0 = vpop.f32.mrb[46].mxu0  ;;  %7538 = vmatpush1.bf16.msra.mxu0 %v9146_v54  ;;  %v9161_v33 = vld [vmem:[#allocation8 + $0xf70] ss:$8 sps:$4 sm:$0xff]  }
 0x368   :  { %v10396_v41 = vadd.f32 %v7274_v12, %v7234_v63  ;;  %v7278_v59 = vpop.f32.mrb[46].mxu1  ;;  %7579 = vmatpush1.bf16.msra.mxu1 %v9149_v43  ;;  %v7238_v30 = vpop.f32.mrb[47].mxu0  ;;  %7539 = vmatprep.subr.bf16.mxu0 %v9154_v45 }
 0x369   :  { %v10398_v24 = vadd.f32 %v7276_v57, %v7236_v20  ;;  %v7279_v29 = vpop.f32.mrb[47].mxu1  ;;  %7580 = vmatprep.subr.bf16.mxu1 %v9157_v8 }
 0x36b   :  { %7540 = vmatpush1.bf16.msra.mxu0 %v9152_v58 }
 0x36c   :  { %7581 = vmatpush1.bf16.msra.mxu1 %v9155_v25  ;;  %7541 = vmatprep.subr.bf16.mxu0 %v9160_v19 }
 0x36d   :  { %7582 = vmatprep.subr.bf16.mxu1 %v9163_v46 }
 0x36f   :  { %7542 = vmatpush1.bf16.msra.mxu0 %v9158_v47 }
 0x370   :  { %7583 = vmatpush1.bf16.msra.mxu1 %v9161_v33  ;;  %7543 = vmatprep.subr.bf16.mxu0 %v9166_v49 }
 0x371   :  { %7584 = vmatprep.subr.bf16.mxu1 %v9169_v11 }
 0x373   :  { %7544 = vmatpush1.bf16.msra.mxu0 %v9164_v48 }
 0x374   :  { %7585 = vmatpush1.bf16.msra.mxu1 %v9167_v35  ;;  %7545 = vmatprep.subr.bf16.mxu0 %v9172_v60 }
 0x375   :  { %7586 = vmatprep.subr.bf16.mxu1 %v9175_v16 }
 0x377   :  { %7546 = vmatpush1.bf16.msra.mxu0 %v9170_v51 }
 0x378   :  { %7587 = vmatpush1.bf16.msra.mxu1 %v9173_v3  ;;  %7547 = vmatprep.subr.bf16.mxu0 %v9178_v5 }
 0x379   :  { %7588 = vmatprep.subr.bf16.mxu1 %v9181_v44 }
 0x37b   :  { %7548 = vmatpush1.bf16.msra.mxu0 %v9176_v2  ;;  %v7632_v2 = vld [vmem:[#allocation10] sm:$0x3] }
 0x37c   :  { %7589 = vmatpush1.bf16.msra.mxu1 %v9179_v38  ;;  %7549 = vmatprep.subr.bf16.mxu0 %v9184_v21 }
 0x37d   :  { %7590 = vmatprep.subr.bf16.mxu1 %v9187_v62 }
 0x37f   :  { %7550 = vmatpush1.bf16.msra.mxu0 %v9182_v52 }
 0x380   :  { %7591 = vmatpush1.bf16.msra.mxu1 %v9185_v23  ;;  %7551 = vmatprep.subr.bf16.mxu0 %v9190_v32  ;;  %v7637_v23 = vrot.slane %v7632_v2, %v9732_v6 }
 0x381   :  { %7592 = vmatprep.subr.bf16.mxu1 %v9193_v39 }
 0x383   :  { %7552 = vmatpush1.bf16.msra.mxu0 %v9188_v15 }
 0x384   :  { %7593 = vmatpush1.bf16.msra.mxu1 %v9191_v34  ;;  %7553 = vmatprep.subr.bf16.mxu0 %v9196_v17  ;;  %v7641_v34 = vrot.slane %v7632_v2, %v9735_v1 }
 0x385   :  { %7594 = vmatprep.subr.bf16.mxu1 %v9199_v22 }
 0x387   :  { %7554 = vmatpush1.bf16.msra.mxu0 %v9194_v4 }
 0x388   :  { %7595 = vmatpush1.bf16.msra.mxu1 %v9197_v7  ;;  %7555 = vmatprep.subr.bf16.mxu0 %v9202_v55 }
 0x389   :  { %7596 = vmatprep.subr.bf16.mxu1 %v9205_v56 }
 0x38b   :  { %7556 = vmatpush1.bf16.msra.mxu0 %v9200_v13 }
 0x38c   :  { %7597 = vmatpush1.bf16.msra.mxu1 %v9203_v14  ;;  %7557 = vmatprep.subr.bf16.mxu0 %v9208_v40 }
 0x38d   :  { %7598 = vmatprep.subr.bf16.mxu1 %v9211_v18 }
 0x38f   :  { %7558 = vmatpush1.bf16.msra.mxu0 %v9206_v53 }
 0x390   :  { %7599 = vmatpush1.bf16.msra.mxu1 %v9209_v10 }
 0x392   :  { %7560 = vmatmul.mubr.bf16.vlgmr.msra.gmra.mrb[60].mxu0 %v3877_v36 }
 0x393   :  { %7601 = vmatmul.mubr.bf16.vlgmr.msra.gmra.mrb[60].mxu1 %v3879_v27 }
 0x3a5   :  { %v7315_v31 = vpop.f32.mrb[48].mxu0 }
 0x3a6   :  { %v7316_v28 = vadd.f32 %v7315_v31, %v10396_v41  ;;  %v7356_v54 = vpop.f32.mrb[48].mxu1  ;;  %v7317_v43 = vpop.f32.mrb[49].mxu0 }
 0x3a7   :  { %v7318_v45 = vadd.f32 %v7317_v43, %v10398_v24  ;;  %v7358_v9 = vpop.f32.mrb[49].mxu1  ;;  %v7319_v8 = vpop.f32.mrb[50].mxu0 }
 0x3a8   :  { %v7357_v63 = vadd.f32 %v7356_v54, %v7316_v28  ;;  %v7360_v42 = vpop.f32.mrb[50].mxu1  ;;  %v7320_v12 = vpop.f32.mrb[51].mxu0 }
 0x3a9   :  { %v7359_v50 = vadd.f32 %v7358_v9, %v7318_v45  ;;  %v7361_v61 = vpop.f32.mrb[51].mxu1 }
 0x3e5   :  { %v7397_v20 = vpop.f32.mrb[52].mxu0 }
 0x3e6   :  { %v7398_v57 = vadd.f32 %v7397_v20, %v7357_v63  ;;  %v7438_v0 = vpop.f32.mrb[52].mxu1  ;;  %v7399_v58 = vpop.f32.mrb[53].mxu0 }
 0x3e7   :  { %v7400_v59 = vadd.f32 %v7399_v58, %v7359_v50  ;;  %v7440_v30 = vpop.f32.mrb[53].mxu1  ;;  %v7401_v25 = vpop.f32.mrb[54].mxu0 }
 0x3e8   :  { %v7439_v19 = vadd.f32 %v7438_v0, %v7398_v57  ;;  %v7442_v41 = vpop.f32.mrb[54].mxu1  ;;  %v7402_v29 = vpop.f32.mrb[55].mxu0 }
 0x3e9   :  { %v7441_v46 = vadd.f32 %v7440_v30, %v7400_v59  ;;  %v7443_v47 = vpop.f32.mrb[55].mxu1 }
 0x425   :  { %v7479_v24 = vpop.f32.mrb[56].mxu0 }
 0x426   :  { %v7480_v33 = vadd.f32 %v7479_v24, %v7439_v19  ;;  %v7520_v49 = vpop.f32.mrb[56].mxu1  ;;  %v7481_v11 = vpop.f32.mrb[57].mxu0 }
 0x427   :  { %v7482_v48 = vadd.f32 %v7481_v11, %v7441_v46  ;;  %v7522_v35 = vpop.f32.mrb[57].mxu1  ;;  %v7483_v60 = vpop.f32.mrb[58].mxu0 }
 0x428   :  { %v7521_v16 = vadd.f32 %v7520_v49, %v7480_v33  ;;  %v7524_v51 = vpop.f32.mrb[58].mxu1  ;;  %v7484_v3 = vpop.f32.mrb[59].mxu0 }
 0x429   :  { %v7523_v5 = vadd.f32 %v7522_v35, %v7482_v48  ;;  %v7525_v44 = vpop.f32.mrb[59].mxu1 }
 0x465   :  { %v7561_v38 = vpop.f32.mrb[60].mxu0 }
 0x466   :  { %v7562_v21 = vadd.f32 %v7561_v38, %v7521_v16  ;;  %v7602_v62 = vpop.f32.mrb[60].mxu1  ;;  %v7563_v52 = vpop.f32.mrb[61].mxu0 }
 0x467   :  { %v7564_v32 = vadd.f32 %v7563_v52, %v7523_v5  ;;  %v7604_v39 = vpop.f32.mrb[61].mxu1  ;;  %v7565_v15 = vpop.f32.mrb[62].mxu0 }
 0x468   :  { %v7603_v17 = vadd.f32 %v7602_v62, %v7562_v21  ;;  %v7606_v22 = vpop.f32.mrb[62].mxu1  ;;  %v7566_v4 = vpop.f32.mrb[63].mxu0 }
 0x469   :  { %v7605_v7 = vadd.f32 %v7604_v39, %v7564_v32  ;;  %v7607_v55 = vpop.f32.mrb[63].mxu1 }
 0x46a   :  { %v7644_v56 = vadd.f32 %v7637_v23, %v7603_v17 }
 0x46b   :  { %v7645_v13 = vadd.f32 %v7641_v34, %v7605_v7 }
 0x46c   :  { %7646 = vst [vmem:[#allocation11] sm:$0xff] %v7644_v56 }
 0x46d   :  { %7647 = vst [vmem:[#allocation11 + $0x8] sm:$0xff] %v7645_v13 }
 0x46e   :  { %9397 = shalt.err (!%p9394_p2)
}
 0x46f   :  { %s9398_s3 = scalar_lea.hbm %s10423_s5, 256 }
 0x470   :  { %p9399_p3 = scmp.ne.s32.totalorder %s10423_s5, %s9398_s3  ;;  %p9402_p4 = scmp.lt.u32.totalorder %s9398_s3, %s10423_s5 }
 0x472   :  { %p9404_p5 = pnand %p9402_p4, %p9399_p3 }
 0x474   :  { %9407 = shalt.err (!%p9404_p5)
}
 0x475   :  { %7657 = dma.vmem_to_hbm [thread:$0]  %s7655_s26, 256, %s10423_s5, [#allocation4]  }
 0x476   :  { %9414 = dma.done.wait [#allocation4], 256  }
 0x477   :  { %9415 = vsyncadd [#allocation4], 4294967040 }
 0x478   :  { %7661 = vsyncpa [#allocation3], 1 }
 0x479   :  { %7662 = vsyncpa [#allocation6], 1 }
 0x47a   :  { %7663 = vsyncpa [#allocation9], 1 }
 0x47b   :  { %7664 = vsyncpa [#allocation4], 1 }

</bundles_post_ra>
